<compile_context>
chip_gen: v7x
topology: tpu7x:2x2x1
jax: 0.10.0
libtpu: 0.0.40
codegen_flags: <defaults>
</compile_context>

<pallas_src>
import functools

import jax
import jax.numpy as jnp
from jax.experimental import pallas as pl
from jax.experimental.pallas import tpu as pltpu

BN_EPS = 1e-5


def _resblocks_kernel(x_ref, gb_ref, w1_ref, b1_ref, w2_ref, skip_ref,
                      out_ref, pad_ref, *, B, H, W, C):
    """One grid step == one ResBlockFiLM; out_ref stays resident in VMEM."""
    i = pl.program_id(0)
    bf16 = jnp.bfloat16

    @pl.when(i == 0)
    def _init():
        out_ref[...] = x_ref[...]                                # resblock 0 input
        pad_ref[...] = jnp.zeros(pad_ref.shape, pad_ref.dtype)   # halo zeroed once

    cur = out_ref[...].reshape(B * H * W, C)

    # ---- conv1: 1x1 conv + bias, relu -> resid ------------------------------
    y1 = jnp.dot(cur.astype(bf16), w1_ref[0],
                 preferred_element_type=jnp.float32) + b1_ref[0]
    resid = jnp.maximum(y1, 0.0)                                 # (B*H*W, C) f32
    resid4 = resid.reshape(B, H, W, C)

    # ---- conv2: 3x3 conv, padding=1, no bias --------------------------------
    # Interior of the zero-padded bf16 buffer is rewritten each step at a
    # sublane-aligned W-offset of 8 (real halo columns sit at 7 and 8+W, the
    # 1-px H halo at rows 0 and H+1; all zeroed at i == 0, never touched
    # again).  The conv is 9 accumulated matmuls -- no materialized im2col.
    pad_ref[:, 1:H + 1, 8:8 + W, :] = resid4.astype(bf16)
    acc = None
    for k in range(9):
        dy, dx = k // 3, k % 3
        lhs = pad_ref[:, dy:dy + H, dx + 7:dx + 7 + W, :].reshape(B * H * W, C)
        part = jnp.dot(lhs, w2_ref[0, k * C:(k + 1) * C, :],
                       preferred_element_type=jnp.float32)
        acc = part if acc is None else acc + part                # (B*H*W, C) f32

    # ---- BatchNorm2d(affine=False), training-mode batch stats (1 pass) ------
    inv_n = 1.0 / float(B * H * W)
    mean = jnp.sum(acc, axis=0, keepdims=True) * inv_n           # (1, C)
    ex2 = jnp.sum(acc * acc, axis=0, keepdims=True) * inv_n
    var = jnp.maximum(ex2 - mean * mean, 0.0)                    # guard rsqrt
    inv_std = jax.lax.rsqrt(var + BN_EPS)                        # (1, C), EUP

    # ---- FiLM folded with BN-apply into one scale/shift ---------------------
    # gamma*((acc-mean)*inv_std) + beta == acc*scale + shift
    gamma = gb_ref[0, :, :C]                                     # (B, C)
    beta = gb_ref[0, :, C:]                                      # (B, C)
    scale = (gamma * inv_std)[:, None, None, :]                  # (B,1,1,C)
    shift = (beta - mean * (gamma * inv_std))[:, None, None, :]  # (B,1,1,C)

    acc4 = acc.reshape(B, H, W, C)
    y = jnp.maximum(acc4 * scale + shift, 0.0) + resid4
    out_ref[...] = y + skip_ref[0].astype(jnp.float32)


def _vmem_limit_bytes():
    """Generation-aware VMEM ceiling (~75% of physical, capped at 112 MiB)."""
    try:
        info = pltpu.get_tpu_info()
        cap = getattr(info, "vmem_capacity_bytes", None) or (64 << 20)
    except Exception:  # CPU / interpret / older runtime: safe everywhere.
        cap = 64 << 20
    return min(int(cap * 3 // 4), 112 << 20)


def film_plus_map_skip(x, gate, map_skip, params, *, n_resblock):
    """x: (B,H,W,C) NHWC; gate: (B,G); map_skip: (n_resblock,B,H,W,C)."""
    B, H, W, C = x.shape
    bf16 = jnp.bfloat16
    # Left pad of 8 so the per-step interior store is sublane-aligned; one
    # right halo column; total rounded up to a sublane multiple of 8.
    Wp = ((8 + W + 1 + 7) // 8) * 8

    # ---- film_net hoisted out of the grid (tiny; wf columns are ordered
    # [gamma_0 | beta_0 | gamma_1 | beta_1 | ...], i.e. the PyTorch
    # film_net(gate).chunk(2n, 1) layout; wf == film_net.weight.T when
    # porting real weights). -------------------------------------------------
    film = jnp.dot(gate.astype(bf16), params["wf"].astype(bf16),
                   preferred_element_type=jnp.float32) + params["bf"][0]
    gb = film.reshape(B, n_resblock, 2 * C).transpose(1, 0, 2)   # (n, B, 2C)

    # Trace-time weight re-layout + bf16 cast.
    w1_r = params["w1"].astype(bf16)                             # (n, C, C)
    w2_r = params["w2"].reshape(n_resblock, 9 * C, C).astype(bf16)
    skip_bf = map_skip.astype(bf16)                              # half the DMA

    kernel = functools.partial(_resblocks_kernel, B=B, H=H, W=W, C=C)

    return pl.pallas_call(
        kernel,
        out_shape=jax.ShapeDtypeStruct((B, H, W, C), jnp.float32),
        grid_spec=pltpu.PrefetchScalarGridSpec(
            num_scalar_prefetch=0,
            grid=(n_resblock,),
            in_specs=[
                pl.BlockSpec((B, H, W, C), lambda i: (0, 0, 0, 0)),        # x
                pl.BlockSpec((1, B, 2 * C), lambda i: (i, 0, 0)),          # gamma/beta_i
                pl.BlockSpec((1, C, C), lambda i: (i, 0, 0)),              # w1_i
                pl.BlockSpec((1, 1, C), lambda i: (i, 0, 0)),              # b1_i
                pl.BlockSpec((1, 9 * C, C), lambda i: (i, 0, 0)),          # w2_i
                pl.BlockSpec((1, B, H, W, C), lambda i: (i, 0, 0, 0, 0)),  # skip_i
            ],
            out_specs=pl.BlockSpec((B, H, W, C), lambda i: (0, 0, 0, 0)),
            scratch_shapes=[pltpu.VMEM((B, H + 2, Wp, C), jnp.bfloat16)],
        ),
        compiler_params=pltpu.CompilerParams(
            dimension_semantics=("arbitrary",),
            vmem_limit_bytes=_vmem_limit_bytes()),
    )(x, gb, w1_r, params["b1"], w2_r, skip_bf)


# ----------------------------------------------------------------------------
# Pure-JAX reference with the SAME bf16 operand rounding (f32 accumulation),
# so the comparison only sees accumulation-order differences.
# ----------------------------------------------------------------------------
def reference(x, gate, map_skip, params, *, n_resblock):
    B, H, W, C = x.shape
    bf16 = jnp.bfloat16
    film = jnp.dot(gate.astype(bf16), params["wf"].astype(bf16),
                   preferred_element_type=jnp.float32) + params["bf"][0]
    chunks = jnp.split(film, 2 * n_resblock, axis=1)
    out = x
    for i in range(n_resblock):
        w1 = params["w1"][i].astype(bf16)
        y1 = jnp.dot(out.reshape(-1, C).astype(bf16), w1,
                     preferred_element_type=jnp.float32).reshape(B, H, W, C)
        y1 = y1 + params["b1"][i, 0]
        resid = jax.nn.relu(y1)
        w2 = params["w2"][i].reshape(3, 3, C, C).astype(bf16)    # HWIO
        conv = jax.lax.conv_general_dilated(
            resid.astype(bf16), w2, (1, 1), "SAME",
            dimension_numbers=("NHWC", "HWIO", "NHWC"),
            preferred_element_type=jnp.float32)
        mean = conv.mean(axis=(0, 1, 2), keepdims=True)
        var = jnp.maximum(
            (conv * conv).mean(axis=(0, 1, 2), keepdims=True) - mean * mean, 0.0)
        normed = (conv - mean) * jax.lax.rsqrt(var + BN_EPS)
        gamma = chunks[2 * i][:, None, None, :]
        beta = chunks[2 * i + 1][:, None, None, :]
        y = jax.nn.relu(gamma * normed + beta) + resid
        # Kernel rounds map_skip to bf16 (perf); mirror it here.
        out = y + map_skip[i].astype(bf16).astype(jnp.float32)
    return out


if __name__ == "__main__":
    # Small config consistent with FiLMplusMapSkip(n_resblock, conv_hidden,
    # gate_size); conv_hidden kept at the module default 128 so channels are
    # exactly one lane-tile wide.
    n_resblock, conv_hidden, gate_size = 2, 128, 256
    B, H, W, C = 2, 8, 8, conv_hidden

    key = jax.random.PRNGKey(0)
    ks = jax.random.split(key, 8)
    params = {
        "w1": jax.random.normal(ks[0], (n_resblock, C, C), jnp.float32) * 0.05,
        "b1": jax.random.normal(ks[1], (n_resblock, 1, C), jnp.float32) * 0.1,
        "w2": jax.random.normal(ks[2], (n_resblock, 9, C, C), jnp.float32) * 0.02,
        "wf": jax.random.normal(ks[3], (gate_size, 2 * n_resblock * C),
                                jnp.float32) * 0.05,
        "bf": jax.random.normal(ks[4], (1, 2 * n_resblock * C),
                                jnp.float32) * 0.1,
    }
    x = jax.random.normal(ks[5], (B, H, W, C), jnp.float32)
    gate = jax.random.normal(ks[6], (B, gate_size), jnp.float32)
    map_skip = jax.random.normal(ks[7], (n_resblock, B, H, W, C), jnp.float32)

    run = jax.jit(functools.partial(film_plus_map_skip, n_resblock=n_resblock))
    out = jax.block_until_ready(run(x, gate, map_skip, params))

    ref = jax.block_until_ready(
        jax.jit(functools.partial(reference, n_resblock=n_resblock))(
            x, gate, map_skip, params))

    assert out.shape == (B, H, W, C) and out.dtype == jnp.float32
    # Kernel and reference use identical bf16 operand rounding; residual
    # differences are f32 accumulation-order only.  Real bugs show up as O(1).
    err = float(jnp.max(jnp.abs(out - ref)))
    assert jnp.allclose(out, ref, rtol=1e-2, atol=1e-2), err
    print("KERNEL_OK")
</pallas_src>

<mosaic_0001>
module attributes {stable_mosaic.version = 11 : i64} {
  func.func @_resblocks_kernel(%arg0: i32, %arg1: memref<2x8x8x128xf32, #tpu.memory_space<vmem>>, %arg2: memref<1x2x256xf32, #tpu.memory_space<vmem>>, %arg3: memref<1x128x128xbf16, #tpu.memory_space<vmem>>, %arg4: memref<1x1x128xf32, #tpu.memory_space<vmem>>, %arg5: memref<1x1152x128xbf16, #tpu.memory_space<vmem>>, %arg6: memref<1x2x8x8x128xbf16, #tpu.memory_space<vmem>>, %arg7: memref<2x8x8x128xf32, #tpu.memory_space<vmem>>, %arg8: memref<2x10x24x128xbf16, #tpu.memory_space<vmem>>) attributes {dimension_semantics = [#tpu.dimension_semantics<arbitrary>], iteration_bounds = array<i64: 2>, scalar_prefetch = 0 : i64, scratch_operands = 1 : i64, tpu.core_type = #tpu.core_type<tc>, window_params = [{pipeline_mode = #tpu.pipeline_mode<synchronous>, transform_indices = @transform_0, window_bounds = array<i64: 2, 8, 8, 128>}, {transform_indices = @transform_1, window_bounds = array<i64: 1, 2, 256>}, {transform_indices = @transform_2, window_bounds = array<i64: 1, 128, 128>}, {transform_indices = @transform_3, window_bounds = array<i64: 1, 1, 128>}, {transform_indices = @transform_4, window_bounds = array<i64: 1, 1152, 128>}, {transform_indices = @transform_5, window_bounds = array<i64: 1, 2, 8, 8, 128>}, {pipeline_mode = #tpu.pipeline_mode<synchronous>, transform_indices = @transform_6, window_bounds = array<i64: 2, 8, 8, 128>}]} {
    %c0_i32 = arith.constant 0 : i32
    %0 = arith.cmpi eq, %arg0, %c0_i32 : i32
    %1 = arith.extui %0 : i1 to i32
    %c0_i32_0 = arith.constant 0 : i32
    %2 = arith.cmpi ne, %1, %c0_i32_0 : i32
    scf.if %2 {
      %c0_96 = arith.constant 0 : index
      %c0_97 = arith.constant 0 : index
      %c0_98 = arith.constant 0 : index
      %c0_99 = arith.constant 0 : index
      %113 = vector.load %arg1[%c0_96, %c0_97, %c0_98, %c0_99] : memref<2x8x8x128xf32, #tpu.memory_space<vmem>>, vector<2x8x8x128xf32>
      %c0_100 = arith.constant 0 : index
      %c0_101 = arith.constant 0 : index
      %c0_102 = arith.constant 0 : index
      %c0_103 = arith.constant 0 : index
      %114 = vector.load %arg7[%c0_100, %c0_101, %c0_102, %c0_103] : memref<2x8x8x128xf32, #tpu.memory_space<vmem>>, vector<2x8x8x128xf32>
      tpu.vector_store %arg7[%c0_100, %c0_101, %c0_102, %c0_103], %113 {strides = array<i32>} : memref<2x8x8x128xf32, #tpu.memory_space<vmem>>, vector<2x8x8x128xf32>,
      %cst_104 = arith.constant 0.000000e+00 : bf16
      %115 = vector.broadcast %cst_104 : bf16 to vector<2x10x24x128xbf16>
      %c0_105 = arith.constant 0 : index
      %c0_106 = arith.constant 0 : index
      %c0_107 = arith.constant 0 : index
      %c0_108 = arith.constant 0 : index
      %116 = vector.load %arg8[%c0_105, %c0_106, %c0_107, %c0_108] : memref<2x10x24x128xbf16, #tpu.memory_space<vmem>>, vector<2x10x24x128xbf16>
      tpu.vector_store %arg8[%c0_105, %c0_106, %c0_107, %c0_108], %115 {strides = array<i32>} : memref<2x10x24x128xbf16, #tpu.memory_space<vmem>>, vector<2x10x24x128xbf16>,
    } else {
    }
    %c0 = arith.constant 0 : index
    %c0_1 = arith.constant 0 : index
    %c0_2 = arith.constant 0 : index
    %c0_3 = arith.constant 0 : index
    %3 = vector.load %arg7[%c0, %c0_1, %c0_2, %c0_3] : memref<2x8x8x128xf32, #tpu.memory_space<vmem>>, vector<2x8x8x128xf32>
    %4 = vector.shape_cast %3 : vector<2x8x8x128xf32> to vector<128x128xf32>
    %5 = arith.truncf %4 : vector<128x128xf32> to vector<128x128xbf16>
    %c0_4 = arith.constant 0 : index
    %c0_5 = arith.constant 0 : index
    %c0_6 = arith.constant 0 : index
    %6 = vector.load %arg3[%c0_4, %c0_5, %c0_6] : memref<1x128x128xbf16, #tpu.memory_space<vmem>>, vector<1x128x128xbf16>
    %7 = vector.shape_cast %6 : vector<1x128x128xbf16> to vector<128x128xbf16>
    %cst = arith.constant dense<0.000000e+00> : vector<128x128xf32>
    %8 = tpu.matmul %5, %7, %cst {dimension_numbers = #tpu.dot_dimension_numbers<[1], [0], [0], [1], [0, 0, 1, 1], [], []>} : vector<128x128xbf16>, vector<128x128xbf16>, vector<128x128xf32> -> vector<128x128xf32>
    %c0_7 = arith.constant 0 : index
    %c0_8 = arith.constant 0 : index
    %c0_9 = arith.constant 0 : index
    %9 = vector.load %arg4[%c0_7, %c0_8, %c0_9] : memref<1x1x128xf32, #tpu.memory_space<vmem>>, vector<1x1x128xf32>
    %10 = vector.shape_cast %9 : vector<1x1x128xf32> to vector<1x128xf32>
    %11 = vector.broadcast %10 : vector<1x128xf32> to vector<128x128xf32>
    %12 = arith.addf %8, %11 : vector<128x128xf32>
    %cst_10 = arith.constant 0.000000e+00 : f32
    %13 = vector.broadcast %cst_10 : f32 to vector<128x128xf32>
    %14 = arith.maximumf %12, %13 : vector<128x128xf32>
    %15 = vector.shape_cast %14 : vector<128x128xf32> to vector<2x8x8x128xf32>
    %16 = arith.truncf %15 : vector<2x8x8x128xf32> to vector<2x8x8x128xbf16>
    %c0_11 = arith.constant 0 : index
    %c1 = arith.constant 1 : index
    %c8 = arith.constant 8 : index
    %c0_12 = arith.constant 0 : index
    %17 = vector.load %arg8[%c0_11, %c1, %c8, %c0_12] : memref<2x10x24x128xbf16, #tpu.memory_space<vmem>>, vector<2x8x8x128xbf16>
    tpu.vector_store %arg8[%c0_11, %c1, %c8, %c0_12], %16 {strides = array<i32>} : memref<2x10x24x128xbf16, #tpu.memory_space<vmem>>, vector<2x8x8x128xbf16>,
    %c0_13 = arith.constant 0 : index
    %c0_14 = arith.constant 0 : index
    %c7 = arith.constant 7 : index
    %c0_15 = arith.constant 0 : index
    %18 = vector.load %arg8[%c0_13, %c0_14, %c7, %c0_15] : memref<2x10x24x128xbf16, #tpu.memory_space<vmem>>, vector<2x8x8x128xbf16>
    %19 = vector.shape_cast %18 : vector<2x8x8x128xbf16> to vector<128x128xbf16>
    %c0_16 = arith.constant 0 : index
    %c0_17 = arith.constant 0 : index
    %c0_18 = arith.constant 0 : index
    %20 = vector.load %arg5[%c0_16, %c0_17, %c0_18] : memref<1x1152x128xbf16, #tpu.memory_space<vmem>>, vector<1x128x128xbf16>
    %21 = vector.shape_cast %20 : vector<1x128x128xbf16> to vector<128x128xbf16>
    %cst_19 = arith.constant dense<0.000000e+00> : vector<128x128xf32>
    %22 = tpu.matmul %19, %21, %cst_19 {dimension_numbers = #tpu.dot_dimension_numbers<[1], [0], [0], [1], [0, 0, 1, 1], [], []>} : vector<128x128xbf16>, vector<128x128xbf16>, vector<128x128xf32> -> vector<128x128xf32>
    %c0_20 = arith.constant 0 : index
    %c0_21 = arith.constant 0 : index
    %c8_22 = arith.constant 8 : index
    %c0_23 = arith.constant 0 : index
    %23 = vector.load %arg8[%c0_20, %c0_21, %c8_22, %c0_23] : memref<2x10x24x128xbf16, #tpu.memory_space<vmem>>, vector<2x8x8x128xbf16>
    %24 = vector.shape_cast %23 : vector<2x8x8x128xbf16> to vector<128x128xbf16>
    %c0_24 = arith.constant 0 : index
    %c128 = arith.constant 128 : index
    %c0_25 = arith.constant 0 : index
    %25 = vector.load %arg5[%c0_24, %c128, %c0_25] : memref<1x1152x128xbf16, #tpu.memory_space<vmem>>, vector<1x128x128xbf16>
    %26 = vector.shape_cast %25 : vector<1x128x128xbf16> to vector<128x128xbf16>
    %cst_26 = arith.constant dense<0.000000e+00> : vector<128x128xf32>
    %27 = tpu.matmul %24, %26, %cst_26 {dimension_numbers = #tpu.dot_dimension_numbers<[1], [0], [0], [1], [0, 0, 1, 1], [], []>} : vector<128x128xbf16>, vector<128x128xbf16>, vector<128x128xf32> -> vector<128x128xf32>
    %28 = arith.addf %22, %27 : vector<128x128xf32>
    %c0_27 = arith.constant 0 : index
    %c0_28 = arith.constant 0 : index
    %c9 = arith.constant 9 : index
    %c0_29 = arith.constant 0 : index
    %29 = vector.load %arg8[%c0_27, %c0_28, %c9, %c0_29] : memref<2x10x24x128xbf16, #tpu.memory_space<vmem>>, vector<2x8x8x128xbf16>
    %30 = vector.shape_cast %29 : vector<2x8x8x128xbf16> to vector<128x128xbf16>
    %c0_30 = arith.constant 0 : index
    %c256 = arith.constant 256 : index
    %c0_31 = arith.constant 0 : index
    %31 = vector.load %arg5[%c0_30, %c256, %c0_31] : memref<1x1152x128xbf16, #tpu.memory_space<vmem>>, vector<1x128x128xbf16>
    %32 = vector.shape_cast %31 : vector<1x128x128xbf16> to vector<128x128xbf16>
    %cst_32 = arith.constant dense<0.000000e+00> : vector<128x128xf32>
    %33 = tpu.matmul %30, %32, %cst_32 {dimension_numbers = #tpu.dot_dimension_numbers<[1], [0], [0], [1], [0, 0, 1, 1], [], []>} : vector<128x128xbf16>, vector<128x128xbf16>, vector<128x128xf32> -> vector<128x128xf32>
    %34 = arith.addf %28, %33 : vector<128x128xf32>
    %c0_33 = arith.constant 0 : index
    %c1_34 = arith.constant 1 : index
    %c7_35 = arith.constant 7 : index
    %c0_36 = arith.constant 0 : index
    %35 = vector.load %arg8[%c0_33, %c1_34, %c7_35, %c0_36] : memref<2x10x24x128xbf16, #tpu.memory_space<vmem>>, vector<2x8x8x128xbf16>
    %36 = vector.shape_cast %35 : vector<2x8x8x128xbf16> to vector<128x128xbf16>
    %c0_37 = arith.constant 0 : index
    %c384 = arith.constant 384 : index
    %c0_38 = arith.constant 0 : index
    %37 = vector.load %arg5[%c0_37, %c384, %c0_38] : memref<1x1152x128xbf16, #tpu.memory_space<vmem>>, vector<1x128x128xbf16>
    %38 = vector.shape_cast %37 : vector<1x128x128xbf16> to vector<128x128xbf16>
    %cst_39 = arith.constant dense<0.000000e+00> : vector<128x128xf32>
    %39 = tpu.matmul %36, %38, %cst_39 {dimension_numbers = #tpu.dot_dimension_numbers<[1], [0], [0], [1], [0, 0, 1, 1], [], []>} : vector<128x128xbf16>, vector<128x128xbf16>, vector<128x128xf32> -> vector<128x128xf32>
    %40 = arith.addf %34, %39 : vector<128x128xf32>
    %c0_40 = arith.constant 0 : index
    %c1_41 = arith.constant 1 : index
    %c8_42 = arith.constant 8 : index
    %c0_43 = arith.constant 0 : index
    %41 = vector.load %arg8[%c0_40, %c1_41, %c8_42, %c0_43] : memref<2x10x24x128xbf16, #tpu.memory_space<vmem>>, vector<2x8x8x128xbf16>
    %42 = vector.shape_cast %41 : vector<2x8x8x128xbf16> to vector<128x128xbf16>
    %c0_44 = arith.constant 0 : index
    %c512 = arith.constant 512 : index
    %c0_45 = arith.constant 0 : index
    %43 = vector.load %arg5[%c0_44, %c512, %c0_45] : memref<1x1152x128xbf16, #tpu.memory_space<vmem>>, vector<1x128x128xbf16>
    %44 = vector.shape_cast %43 : vector<1x128x128xbf16> to vector<128x128xbf16>
    %cst_46 = arith.constant dense<0.000000e+00> : vector<128x128xf32>
    %45 = tpu.matmul %42, %44, %cst_46 {dimension_numbers = #tpu.dot_dimension_numbers<[1], [0], [0], [1], [0, 0, 1, 1], [], []>} : vector<128x128xbf16>, vector<128x128xbf16>, vector<128x128xf32> -> vector<128x128xf32>
    %46 = arith.addf %40, %45 : vector<128x128xf32>
    %c0_47 = arith.constant 0 : index
    %c1_48 = arith.constant 1 : index
    %c9_49 = arith.constant 9 : index
    %c0_50 = arith.constant 0 : index
    %47 = vector.load %arg8[%c0_47, %c1_48, %c9_49, %c0_50] : memref<2x10x24x128xbf16, #tpu.memory_space<vmem>>, vector<2x8x8x128xbf16>
    %48 = vector.shape_cast %47 : vector<2x8x8x128xbf16> to vector<128x128xbf16>
    %c0_51 = arith.constant 0 : index
    %c640 = arith.constant 640 : index
    %c0_52 = arith.constant 0 : index
    %49 = vector.load %arg5[%c0_51, %c640, %c0_52] : memref<1x1152x128xbf16, #tpu.memory_space<vmem>>, vector<1x128x128xbf16>
    %50 = vector.shape_cast %49 : vector<1x128x128xbf16> to vector<128x128xbf16>
    %cst_53 = arith.constant dense<0.000000e+00> : vector<128x128xf32>
    %51 = tpu.matmul %48, %50, %cst_53 {dimension_numbers = #tpu.dot_dimension_numbers<[1], [0], [0], [1], [0, 0, 1, 1], [], []>} : vector<128x128xbf16>, vector<128x128xbf16>, vector<128x128xf32> -> vector<128x128xf32>
    %52 = arith.addf %46, %51 : vector<128x128xf32>
    %c0_54 = arith.constant 0 : index
    %c2 = arith.constant 2 : index
    %c7_55 = arith.constant 7 : index
    %c0_56 = arith.constant 0 : index
    %53 = vector.load %arg8[%c0_54, %c2, %c7_55, %c0_56] : memref<2x10x24x128xbf16, #tpu.memory_space<vmem>>, vector<2x8x8x128xbf16>
    %54 = vector.shape_cast %53 : vector<2x8x8x128xbf16> to vector<128x128xbf16>
    %c0_57 = arith.constant 0 : index
    %c768 = arith.constant 768 : index
    %c0_58 = arith.constant 0 : index
    %55 = vector.load %arg5[%c0_57, %c768, %c0_58] : memref<1x1152x128xbf16, #tpu.memory_space<vmem>>, vector<1x128x128xbf16>
    %56 = vector.shape_cast %55 : vector<1x128x128xbf16> to vector<128x128xbf16>
    %cst_59 = arith.constant dense<0.000000e+00> : vector<128x128xf32>
    %57 = tpu.matmul %54, %56, %cst_59 {dimension_numbers = #tpu.dot_dimension_numbers<[1], [0], [0], [1], [0, 0, 1, 1], [], []>} : vector<128x128xbf16>, vector<128x128xbf16>, vector<128x128xf32> -> vector<128x128xf32>
    %58 = arith.addf %52, %57 : vector<128x128xf32>
    %c0_60 = arith.constant 0 : index
    %c2_61 = arith.constant 2 : index
    %c8_62 = arith.constant 8 : index
    %c0_63 = arith.constant 0 : index
    %59 = vector.load %arg8[%c0_60, %c2_61, %c8_62, %c0_63] : memref<2x10x24x128xbf16, #tpu.memory_space<vmem>>, vector<2x8x8x128xbf16>
    %60 = vector.shape_cast %59 : vector<2x8x8x128xbf16> to vector<128x128xbf16>
    %c0_64 = arith.constant 0 : index
    %c896 = arith.constant 896 : index
    %c0_65 = arith.constant 0 : index
    %61 = vector.load %arg5[%c0_64, %c896, %c0_65] : memref<1x1152x128xbf16, #tpu.memory_space<vmem>>, vector<1x128x128xbf16>
    %62 = vector.shape_cast %61 : vector<1x128x128xbf16> to vector<128x128xbf16>
    %cst_66 = arith.constant dense<0.000000e+00> : vector<128x128xf32>
    %63 = tpu.matmul %60, %62, %cst_66 {dimension_numbers = #tpu.dot_dimension_numbers<[1], [0], [0], [1], [0, 0, 1, 1], [], []>} : vector<128x128xbf16>, vector<128x128xbf16>, vector<128x128xf32> -> vector<128x128xf32>
    %64 = arith.addf %58, %63 : vector<128x128xf32>
    %c0_67 = arith.constant 0 : index
    %c2_68 = arith.constant 2 : index
    %c9_69 = arith.constant 9 : index
    %c0_70 = arith.constant 0 : index
    %65 = vector.load %arg8[%c0_67, %c2_68, %c9_69, %c0_70] : memref<2x10x24x128xbf16, #tpu.memory_space<vmem>>, vector<2x8x8x128xbf16>
    %66 = vector.shape_cast %65 : vector<2x8x8x128xbf16> to vector<128x128xbf16>
    %c0_71 = arith.constant 0 : index
    %c1024 = arith.constant 1024 : index
    %c0_72 = arith.constant 0 : index
    %67 = vector.load %arg5[%c0_71, %c1024, %c0_72] : memref<1x1152x128xbf16, #tpu.memory_space<vmem>>, vector<1x128x128xbf16>
    %68 = vector.shape_cast %67 : vector<1x128x128xbf16> to vector<128x128xbf16>
    %cst_73 = arith.constant dense<0.000000e+00> : vector<128x128xf32>
    %69 = tpu.matmul %66, %68, %cst_73 {dimension_numbers = #tpu.dot_dimension_numbers<[1], [0], [0], [1], [0, 0, 1, 1], [], []>} : vector<128x128xbf16>, vector<128x128xbf16>, vector<128x128xf32> -> vector<128x128xf32>
    %70 = arith.addf %64, %69 : vector<128x128xf32>
    %cst_74 = arith.constant dense<0.000000e+00> : vector<128xf32>
    %71 = vector.multi_reduction <add>, %70, %cst_74 [0] : vector<128x128xf32> to vector<128xf32>
    %72 = vector.shape_cast %71 : vector<128xf32> to vector<1x128xf32>
    %cst_75 = arith.constant 7.812500e-03 : f32
    %73 = vector.broadcast %cst_75 : f32 to vector<1x128xf32>
    %74 = arith.mulf %72, %73 : vector<1x128xf32>
    %75 = arith.mulf %70, %70 : vector<128x128xf32>
    %cst_76 = arith.constant dense<0.000000e+00> : vector<128xf32>
    %76 = vector.multi_reduction <add>, %75, %cst_76 [0] : vector<128x128xf32> to vector<128xf32>
    %77 = vector.shape_cast %76 : vector<128xf32> to vector<1x128xf32>
    %cst_77 = arith.constant 7.812500e-03 : f32
    %78 = vector.broadcast %cst_77 : f32 to vector<1x128xf32>
    %79 = arith.mulf %77, %78 : vector<1x128xf32>
    %80 = arith.mulf %74, %74 : vector<1x128xf32>
    %81 = arith.subf %79, %80 : vector<1x128xf32>
    %cst_78 = arith.constant 0.000000e+00 : f32
    %82 = vector.broadcast %cst_78 : f32 to vector<1x128xf32>
    %83 = arith.maximumf %81, %82 : vector<1x128xf32>
    %cst_79 = arith.constant 9.99999974E-6 : f32
    %84 = vector.broadcast %cst_79 : f32 to vector<1x128xf32>
    %85 = arith.addf %83, %84 : vector<1x128xf32>
    %86 = math.rsqrt %85 : vector<1x128xf32>
    %c0_80 = arith.constant 0 : index
    %c0_81 = arith.constant 0 : index
    %c0_82 = arith.constant 0 : index
    %87 = vector.load %arg2[%c0_80, %c0_81, %c0_82] : memref<1x2x256xf32, #tpu.memory_space<vmem>>, vector<1x2x128xf32>
    %88 = vector.shape_cast %87 : vector<1x2x128xf32> to vector<2x128xf32>
    %c0_83 = arith.constant 0 : index
    %c0_84 = arith.constant 0 : index
    %c128_85 = arith.constant 128 : index
    %89 = vector.load %arg2[%c0_83, %c0_84, %c128_85] : memref<1x2x256xf32, #tpu.memory_space<vmem>>, vector<1x2x128xf32>
    %90 = vector.shape_cast %89 : vector<1x2x128xf32> to vector<2x128xf32>
    %91 = vector.broadcast %86 : vector<1x128xf32> to vector<2x128xf32>
    %92 = arith.mulf %88, %91 : vector<2x128xf32>
    %93 = vector.shape_cast %92 : vector<2x128xf32> to vector<2x1x1x128xf32>
    %94 = vector.broadcast %86 : vector<1x128xf32> to vector<2x128xf32>
    %95 = arith.mulf %88, %94 : vector<2x128xf32>
    %96 = vector.broadcast %74 : vector<1x128xf32> to vector<2x128xf32>
    %97 = arith.mulf %96, %95 : vector<2x128xf32>
    %98 = arith.subf %90, %97 : vector<2x128xf32>
    %99 = vector.shape_cast %98 : vector<2x128xf32> to vector<2x1x1x128xf32>
    %100 = vector.shape_cast %70 : vector<128x128xf32> to vector<2x8x8x128xf32>
    %101 = vector.broadcast %93 : vector<2x1x1x128xf32> to vector<2x8x8x128xf32>
    %102 = arith.mulf %100, %101 : vector<2x8x8x128xf32>
    %103 = vector.broadcast %99 : vector<2x1x1x128xf32> to vector<2x8x8x128xf32>
    %104 = arith.addf %102, %103 : vector<2x8x8x128xf32>
    %cst_86 = arith.constant 0.000000e+00 : f32
    %105 = vector.broadcast %cst_86 : f32 to vector<2x8x8x128xf32>
    %106 = arith.maximumf %104, %105 : vector<2x8x8x128xf32>
    %107 = arith.addf %106, %15 : vector<2x8x8x128xf32>
    %c0_87 = arith.constant 0 : index
    %c0_88 = arith.constant 0 : index
    %c0_89 = arith.constant 0 : index
    %c0_90 = arith.constant 0 : index
    %c0_91 = arith.constant 0 : index
    %108 = vector.load %arg6[%c0_87, %c0_88, %c0_89, %c0_90, %c0_91] : memref<1x2x8x8x128xbf16, #tpu.memory_space<vmem>>, vector<1x2x8x8x128xbf16>
    %109 = vector.shape_cast %108 : vector<1x2x8x8x128xbf16> to vector<2x8x8x128xbf16>
    %110 = arith.extf %109 : vector<2x8x8x128xbf16> to vector<2x8x8x128xf32>
    %111 = arith.addf %107, %110 : vector<2x8x8x128xf32>
    %c0_92 = arith.constant 0 : index
    %c0_93 = arith.constant 0 : index
    %c0_94 = arith.constant 0 : index
    %c0_95 = arith.constant 0 : index
    %112 = vector.load %arg7[%c0_92, %c0_93, %c0_94, %c0_95] : memref<2x8x8x128xf32, #tpu.memory_space<vmem>>, vector<2x8x8x128xf32>
    tpu.vector_store %arg7[%c0_92, %c0_93, %c0_94, %c0_95], %111 {strides = array<i32>} : memref<2x8x8x128xf32, #tpu.memory_space<vmem>>, vector<2x8x8x128xf32>,
    return
  }
  func.func @transform_0(%arg0: i32) -> (i32, i32, i32, i32) {
    %c0_i32 = arith.constant 0 : i32
    %c0_i32_0 = arith.constant 0 : i32
    %c0_i32_1 = arith.constant 0 : i32
    %c0_i32_2 = arith.constant 0 : i32
    %c0_i32_3 = arith.constant 0 : i32
    return %c0_i32, %c0_i32_0, %c0_i32_1, %c0_i32_2 : i32, i32, i32, i32
  }
  func.func @transform_1(%arg0: i32) -> (i32, i32, i32) {
    %c0_i32 = arith.constant 0 : i32
    %c0_i32_0 = arith.constant 0 : i32
    %c0_i32_1 = arith.constant 0 : i32
    return %arg0, %c0_i32, %c0_i32_0 : i32, i32, i32
  }
  func.func @transform_2(%arg0: i32) -> (i32, i32, i32) {
    %c0_i32 = arith.constant 0 : i32
    %c0_i32_0 = arith.constant 0 : i32
    %c0_i32_1 = arith.constant 0 : i32
    return %arg0, %c0_i32, %c0_i32_0 : i32, i32, i32
  }
  func.func @transform_3(%arg0: i32) -> (i32, i32, i32) {
    %c0_i32 = arith.constant 0 : i32
    %c0_i32_0 = arith.constant 0 : i32
    %c0_i32_1 = arith.constant 0 : i32
    return %arg0, %c0_i32, %c0_i32_0 : i32, i32, i32
  }
  func.func @transform_4(%arg0: i32) -> (i32, i32, i32) {
    %c0_i32 = arith.constant 0 : i32
    %c0_i32_0 = arith.constant 0 : i32
    %c0_i32_1 = arith.constant 0 : i32
    return %arg0, %c0_i32, %c0_i32_0 : i32, i32, i32
  }
  func.func @transform_5(%arg0: i32) -> (i32, i32, i32, i32, i32) {
    %c0_i32 = arith.constant 0 : i32
    %c0_i32_0 = arith.constant 0 : i32
    %c0_i32_1 = arith.constant 0 : i32
    %c0_i32_2 = arith.constant 0 : i32
    %c0_i32_3 = arith.constant 0 : i32
    return %arg0, %c0_i32, %c0_i32_0, %c0_i32_1, %c0_i32_2 : i32, i32, i32, i32, i32
  }
  func.func @transform_6(%arg0: i32) -> (i32, i32, i32, i32) {
    %c0_i32 = arith.constant 0 : i32
    %c0_i32_0 = arith.constant 0 : i32
    %c0_i32_1 = arith.constant 0 : i32
    %c0_i32_2 = arith.constant 0 : i32
    %c0_i32_3 = arith.constant 0 : i32
    return %c0_i32, %c0_i32_0, %c0_i32_1, %c0_i32_2 : i32, i32, i32, i32
  }
}

</mosaic_0001>

<bundles_post_ra>
// kernel: film_plus_map_skip.1
= control target key start
LH: loop header
LB: loop body
LE: loop exit
PB: predicated region body
PF: predicated region fallthrough
CT: control target
= control target key end

     0   :  { %11 = vsyncpa [#allocation4], 0  ;;  %s5446_s21 = smov 0   ;;  %s6817_s0 = inlined_call_operand.vmem [shape: f32[2,8,8,128], index: 0, kind: input, shape index: {}]   ;;  %s6818_s1 = inlined_call_operand.vmem [shape: f32[2,2,256], index: 1, kind: input, shape index: {}]   ;;  %s6819_s2 = inlined_call_operand.vmem [shape: bf16[2,128,128], index: 2, kind: input, shape index: {}]   ;;  %s6820_s3 = inlined_call_operand.vmem [shape: f32[2,1,128], index: 3, kind: input, shape index: {}]   ;;  %s6821_s4 = inlined_call_operand.vmem [shape: bf16[2,1152,128], index: 4, kind: input, shape index: {}]   ;;  %s6822_s5 = inlined_call_operand.vmem [shape: bf16[2,2,8,8,128], index: 5, kind: input, shape index: {}]   ;;  %s6823_s6 = inlined_call_operand.hbm [shape: f32[2,8,8,128], index: 6, kind: output, shape index: {}]  }
   0x1 LB: > { %s5452_s22 = sadd.s32 4294967295, %s5404_s21   ;;  %p4374_p0 = scmp.ge.s32.totalorder %s5404_s21, 1  ;;  %s5404_s21 = sphi %s5446_s21, %s17_s21  }
   0x2   : > { %p246_p1 = scmp.lt.s32.totalorder %s5404_s21, 3 }
   0x4   : > { %p247_p2 = pnand %p4374_p0, %p246_p1 }
   0x6   : > { %250 = sbr.rel (%p247_p2) target bundleno = 817 (0x331), region = 44 }
   0xd   : > { %p289_p3 = scmp.lt.s32.totalorder %s5452_s22, 1  ;;  %p4382_p4 = scmp.ne.s32.totalorder %s5452_s22, 0 }
   0xe   : > { %v317_v0 = vld [vmem:[%s6817_s0] sm:$0xff] (!%p4382_p4)  ;;  %v318_v1 = vld [vmem:[%s6817_s0 + $0x8] sm:$0xff] (!%p4382_p4)  ;;  %v319_v2 = vld [vmem:[%s6817_s0 + $0x10] sm:$0xff] (!%p4382_p4)  ;;  %v5406_v6 = vmov (!%p4382_p4), 0  }
   0xf   : > { %s5458_s23 = scalar_select %p289_p3, %s5452_s22, 1 }
  0x10   : > { %316 = sbr.rel (%p4382_p4) target bundleno = 54 (0x36), region = 48  ;;  %333 = vst [vmem:[#allocation3] sm:$0xff] (!%p4382_p4), %v317_v0  ;;  %334 = vst [vmem:[#allocation3 + $0x8] sm:$0xff] (!%p4382_p4), %v318_v1  ;;  %v5500_v3 = vld [vmem:[%s6817_s0 + $0x18] sm:$0xff] (!%p4382_p4)  ;;  %v5505_v4 = vld [vmem:[%s6817_s0 + $0x20] sm:$0xff] (!%p4382_p4) }
  0x11   : > { %s4588_s24 = sshll.u32 %s5458_s23, 2  ;;  %s4589_s25 = sshll.u32 %s5458_s23, 6  ;;  %335 = vst [vmem:[#allocation3 + $0x10] sm:$0xff] (!%p4382_p4), %v319_v2  ;;  %v5510_v5 = vld [vmem:[%s6817_s0 + $0x28] sm:$0xff] (!%p4382_p4)  ;;  %349 = vst [vmem:[#allocation2] sm:$0xf] (!%p4382_p4), %v5406_v6 }
  0x12   : > { %s5465_s28 = scalar_lea.vmem %s6818_s1, %s4588_s24  ;;  %s5470_s7 = scalar_lea.vmem %s6819_s2, %s4589_s25  ;;  %350 = vst [vmem:[#allocation2 + $0x4] sm:$0xf] (!%p4382_p4), %v5406_v6  ;;  %351 = vst [vmem:[#allocation2 + $0x8] sm:$0xf] (!%p4382_p4), %v5406_v6  ;;  %v323_v7 = vld [vmem:[%s6817_s0 + $0x30] sm:$0xff] (!%p4382_p4)  ;;  %v324_v8 = vld [vmem:[%s6817_s0 + $0x38] sm:$0xff] (!%p4382_p4) }
  0x13   : > { %s301_s10 = scalar_lea.vmem %s6820_s3, %s5458_s23  ;;  %s5238_s11 = smul.u32 576, %s5458_s23  ;;  %352 = vst [vmem:[#allocation2 + $0xc] sm:$0xf] (!%p4382_p4), %v5406_v6  ;;  %353 = vst [vmem:[#allocation2 + $0x10] sm:$0xf] (!%p4382_p4), %v5406_v6  ;;  %v325_v9 = vld [vmem:[%s6817_s0 + $0x40] sm:$0xff] (!%p4382_p4) }
  0x14   : > { %s5480_s14 = scalar_lea.vmem %s6822_s5, %s4589_s25  ;;  %354 = vst [vmem:[#allocation2 + $0x14] sm:$0xf] (!%p4382_p4), %v5406_v6  ;;  %355 = vst [vmem:[#allocation2 + $0x18] sm:$0xf] (!%p4382_p4), %v5406_v6  ;;  %v326_v10 = vld [vmem:[%s6817_s0 + $0x48] sm:$0xff] (!%p4382_p4)  ;;  %v327_v11 = vld [vmem:[%s6817_s0 + $0x50] sm:$0xff] (!%p4382_p4) }
  0x15   : > { %s5485_s17 = scalar_lea.vmem %s6821_s4, %s5238_s11  ;;  %356 = vst [vmem:[#allocation2 + $0x1c] sm:$0xf] (!%p4382_p4), %v5406_v6  ;;  %357 = vst [vmem:[#allocation2 + $0x20] sm:$0xf] (!%p4382_p4), %v5406_v6  ;;  %v328_v12 = vld [vmem:[%s6817_s0 + $0x58] sm:$0xff] (!%p4382_p4)  ;;  %v329_v13 = vld [vmem:[%s6817_s0 + $0x60] sm:$0xff] (!%p4382_p4) }
  0x16   : > { %358 = vst [vmem:[#allocation2 + $0x24] sm:$0xf] (!%p4382_p4), %v5406_v6  ;;  %359 = vst [vmem:[#allocation2 + $0x28] sm:$0xf] (!%p4382_p4), %v5406_v6  ;;  %v330_v14 = vld [vmem:[%s6817_s0 + $0x68] sm:$0xff] (!%p4382_p4)  ;;  %v331_v15 = vld [vmem:[%s6817_s0 + $0x70] sm:$0xff] (!%p4382_p4) }
  0x17   : > { %360 = vst [vmem:[#allocation2 + $0x2c] sm:$0xf] %v5406_v6  ;;  %361 = vst [vmem:[#allocation2 + $0x30] sm:$0xf] %v5406_v6  ;;  %v332_v16 = vld [vmem:[%s6817_s0 + $0x78] sm:$0xff] }
  0x18   : > { %362 = vst [vmem:[#allocation2 + $0x34] sm:$0xf] %v5406_v6  ;;  %363 = vst [vmem:[#allocation2 + $0x38] sm:$0xf] %v5406_v6 }
  0x19   : > { %364 = vst [vmem:[#allocation2 + $0x3c] sm:$0xf] %v5406_v6  ;;  %365 = vst [vmem:[#allocation2 + $0x40] sm:$0xf] %v5406_v6 }
  0x1a   : > { %366 = vst [vmem:[#allocation2 + $0x44] sm:$0xf] %v5406_v6  ;;  %367 = vst [vmem:[#allocation2 + $0x48] sm:$0xf] %v5406_v6 }
  0x1b   : > { %368 = vst [vmem:[#allocation2 + $0x4c] sm:$0xf] %v5406_v6  ;;  %369 = vst [vmem:[#allocation2 + $0x50] sm:$0xf] %v5406_v6 }
  0x1c   : > { %370 = vst [vmem:[#allocation2 + $0x54] sm:$0xf] %v5406_v6  ;;  %371 = vst [vmem:[#allocation2 + $0x58] sm:$0xf] %v5406_v6 }
  0x1d   : > { %372 = vst [vmem:[#allocation2 + $0x5c] sm:$0xf] %v5406_v6  ;;  %373 = vst [vmem:[#allocation2 + $0x60] sm:$0xf] %v5406_v6 }
  0x1e   : > { %374 = vst [vmem:[#allocation2 + $0x64] sm:$0xf] %v5406_v6  ;;  %375 = vst [vmem:[#allocation2 + $0x68] sm:$0xf] %v5406_v6 }
  0x1f   : > { %376 = vst [vmem:[#allocation2 + $0x6c] sm:$0xf] %v5406_v6  ;;  %377 = vst [vmem:[#allocation2 + $0x70] sm:$0xf] %v5406_v6 }
  0x20   : > { %378 = vst [vmem:[#allocation2 + $0x74] sm:$0xf] %v5406_v6  ;;  %379 = vst [vmem:[#allocation2 + $0x78] sm:$0xf] %v5406_v6 }
  0x21   : > { %380 = vst [vmem:[#allocation2 + $0x7c] sm:$0xf] %v5406_v6  ;;  %381 = vst [vmem:[#allocation2 + $0x80] sm:$0xf] %v5406_v6 }
  0x22   : > { %382 = vst [vmem:[#allocation2 + $0x84] sm:$0xf] %v5406_v6  ;;  %383 = vst [vmem:[#allocation2 + $0x88] sm:$0xf] %v5406_v6 }
  0x23   : > { %384 = vst [vmem:[#allocation2 + $0x8c] sm:$0xf] %v5406_v6  ;;  %385 = vst [vmem:[#allocation2 + $0x90] sm:$0xf] %v5406_v6 }
  0x24   : > { %386 = vst [vmem:[#allocation2 + $0x94] sm:$0xf] %v5406_v6  ;;  %387 = vst [vmem:[#allocation2 + $0x98] sm:$0xf] %v5406_v6 }
  0x25   : > { %388 = vst [vmem:[#allocation2 + $0x9c] sm:$0xf] %v5406_v6  ;;  %389 = vst [vmem:[#allocation2 + $0xa0] sm:$0xf] %v5406_v6 }
  0x26   : > { %390 = vst [vmem:[#allocation2 + $0xa4] sm:$0xf] %v5406_v6  ;;  %391 = vst [vmem:[#allocation2 + $0xa8] sm:$0xf] %v5406_v6 }
  0x27   : > { %392 = vst [vmem:[#allocation2 + $0xac] sm:$0xf] %v5406_v6  ;;  %393 = vst [vmem:[#allocation2 + $0xb0] sm:$0xf] %v5406_v6 }
  0x28   : > { %394 = vst [vmem:[#allocation2 + $0xb4] sm:$0xf] %v5406_v6  ;;  %395 = vst [vmem:[#allocation2 + $0xb8] sm:$0xf] %v5406_v6 }
  0x29   : > { %396 = vst [vmem:[#allocation2 + $0xbc] sm:$0xf] %v5406_v6  ;;  %397 = vst [vmem:[#allocation2 + $0xc0] sm:$0xf] %v5406_v6 }
  0x2a   : > { %398 = vst [vmem:[#allocation2 + $0xc4] sm:$0xf] %v5406_v6  ;;  %399 = vst [vmem:[#allocation2 + $0xc8] sm:$0xf] %v5406_v6 }
  0x2b   : > { %400 = vst [vmem:[#allocation2 + $0xcc] sm:$0xf] %v5406_v6  ;;  %401 = vst [vmem:[#allocation2 + $0xd0] sm:$0xf] %v5406_v6 }
  0x2c   : > { %402 = vst [vmem:[#allocation2 + $0xd4] sm:$0xf] %v5406_v6  ;;  %403 = vst [vmem:[#allocation2 + $0xd8] sm:$0xf] %v5406_v6 }
  0x2d   : > { %404 = vst [vmem:[#allocation2 + $0xdc] sm:$0xf] %v5406_v6  ;;  %405 = vst [vmem:[#allocation2 + $0xe0] sm:$0xf] %v5406_v6 }
  0x2e   : > { %406 = vst [vmem:[#allocation2 + $0xe4] sm:$0xf] %v5406_v6  ;;  %407 = vst [vmem:[#allocation2 + $0xe8] sm:$0xf] %v5406_v6 }
  0x2f   : > { %408 = vst [vmem:[#allocation2 + $0xec] sm:$0xf] %v5406_v6  ;;  %336 = vst [vmem:[#allocation3 + $0x18] sm:$0xff] %v5500_v3 }
  0x30   : > { %337 = vst [vmem:[#allocation3 + $0x20] sm:$0xff] %v5505_v4  ;;  %338 = vst [vmem:[#allocation3 + $0x28] sm:$0xff] %v5510_v5 }
  0x31   : > { %339 = vst [vmem:[#allocation3 + $0x30] sm:$0xff] %v323_v7  ;;  %340 = vst [vmem:[#allocation3 + $0x38] sm:$0xff] %v324_v8 }
  0x32   : > { %341 = vst [vmem:[#allocation3 + $0x40] sm:$0xff] %v325_v9  ;;  %342 = vst [vmem:[#allocation3 + $0x48] sm:$0xff] %v326_v10 }
  0x33   : > { %343 = vst [vmem:[#allocation3 + $0x50] sm:$0xff] %v327_v11  ;;  %344 = vst [vmem:[#allocation3 + $0x58] sm:$0xff] %v328_v12 }
  0x34   : > { %345 = vst [vmem:[#allocation3 + $0x60] sm:$0xff] %v329_v13  ;;  %346 = vst [vmem:[#allocation3 + $0x68] sm:$0xff] %v330_v14 }
  0x35   : > { %347 = vst [vmem:[#allocation3 + $0x70] sm:$0xff] %v331_v15  ;;  %348 = vst [vmem:[#allocation3 + $0x78] sm:$0xff] %v332_v16 }
  0x36 PF: > { %v5258_v17 = vld [vmem:[%s5470_s7] sm:$0xff]   ;;  %v5259_v18 = vld [vmem:[%s5470_s7 + $0x8] sm:$0xff]   ;;  %v5260_v19 = vld [vmem:[%s5470_s7 + $0x10] sm:$0xff]   ;;  %vm682_vm0 = vsmask.f32 256  ;;  %s5408_s23 = smov [#allocation3]  }
  0x37   : > { %4790 = vmatprep.subr.bf16.mxu0 %v5258_v17  ;;  %v5261_v20 = vld [vmem:[%s5470_s7 + $0x18] sm:$0xff]   ;;  %v409_v21 = vld [vmem:[#allocation3] sm:$0xff]  ;;  %v5262_v24 = vld [vmem:[%s5470_s7 + $0x20] sm:$0xff]   ;;  %vm683_vm1 = vsmask.f32 4368  ;;  %p5243_p5 = scmp.eq.s32.totalorder %s5452_s22, 1 }
  0x38   : > { %4791 = vmatpush3.bf16.msra.mxu0 %v5258_v17  ;;  %v410_v22 = vld [vmem:[#allocation3 + $0x8] sm:$0xff]  ;;  %v5267_v25 = vld [vmem:[%s5485_s17 + $0x100] sm:$0xff]   ;;  %v5263_v26 = vld [vmem:[%s5470_s7 + $0x28] sm:$0xff]   ;;  %vm1327_vm2 = vsmask.f32 3328 }
  0x39   : > { %4792 = vmatprep.subr.bf16.mxu0 %v5259_v18  ;;  %v425_v23 = vpack.c.bf16 %v410_v22, %v409_v21  ;;  %4950 = vmatprep.subr.bf16.mxu1 %v5267_v25  ;;  %v5269_v27 = vld [vmem:[%s5485_s17 + $0x108] sm:$0xff]   ;;  %v5264_v28 = vld [vmem:[%s5470_s7 + $0x30] sm:$0xff]   ;;  %v5265_v30 = vld [vmem:[%s5470_s7 + $0x38] sm:$0xff]   ;;  %vm1328_vm3 = vsmask.f32 7440 }
  0x3a   : > { %4951 = vmatpush3.bf16.msra.mxu1 %v5267_v25  ;;  %v5271_v29 = vld [vmem:[%s5485_s17 + $0x110] sm:$0xff]   ;;  %v411_v31 = vld [vmem:[#allocation3 + $0x10] sm:$0xff]  ;;  %v412_v32 = vld [vmem:[#allocation3 + $0x18] sm:$0xff] }
  0x3b   : > { %4806 = vmatprep.mubr.bf16.mxu0 %v425_v23  ;;  %4952 = vmatprep.subr.bf16.mxu1 %v5269_v27  ;;  %v413_v33 = vld [vmem:[#allocation3 + $0x20] sm:$0xff]  ;;  %v414_v34 = vld [vmem:[#allocation3 + $0x28] sm:$0xff]  ;;  %v5266_v35 = vld [vmem:[%s5485_s17 + $0x40] sm:$0xff]   ;;  %v426_v36 = vpack.c.bf16 %v412_v32, %v411_v31 }
  0x3c   : > { %4793 = vmatpush3.bf16.msra.mxu0 %v5259_v18  ;;  %v5268_v37 = vld [vmem:[%s5485_s17 + $0x48] sm:$0xff]   ;;  %v427_v38 = vpack.c.bf16 %v414_v34, %v413_v33  ;;  %v415_v39 = vld [vmem:[#allocation3 + $0x30] sm:$0xff]  ;;  %v417_v41 = vld [vmem:[#allocation3 + $0x40] sm:$0xff] }
  0x3d   : > { %4794 = vmatprep.subr.bf16.mxu0 %v5260_v19  ;;  %v416_v40 = vld [vmem:[#allocation3 + $0x38] sm:$0xff]  ;;  %v418_v42 = vld [vmem:[#allocation3 + $0x48] sm:$0xff]  ;;  %v5270_v43 = vld [vmem:[%s5485_s17 + $0x50] sm:$0xff]  }
  0x3e   : > { %4953 = vmatpush3.bf16.msra.mxu1 %v5269_v27  ;;  %v428_v44 = vpack.c.bf16 %v416_v40, %v415_v39  ;;  %v429_v45 = vpack.c.bf16 %v418_v42, %v417_v41  ;;  %v419_v46 = vld [vmem:[#allocation3 + $0x50] sm:$0xff]  ;;  %v420_v47 = vld [vmem:[#allocation3 + $0x58] sm:$0xff]  ;;  %v421_v48 = vld [vmem:[#allocation3 + $0x60] sm:$0xff] }
  0x3f   : > { %4954 = vmatprep.subr.bf16.mxu1 %v5271_v29  ;;  %v422_v49 = vld [vmem:[#allocation3 + $0x68] sm:$0xff]  ;;  %v430_v50 = vpack.c.bf16 %v420_v47, %v419_v46  ;;  %v423_v52 = vld [vmem:[#allocation3 + $0x70] sm:$0xff]  ;;  %v424_v53 = vld [vmem:[#allocation3 + $0x78] sm:$0xff] }
  0x40   : > { %4795 = vmatpush3.bf16.msra.mxu0 %v5260_v19  ;;  %v431_v51 = vpack.c.bf16 %v422_v49, %v421_v48  ;;  %v432_v54 = vpack.c.bf16 %v424_v53, %v423_v52  ;;  %v5272_v55 = vld [vmem:[%s5485_s17 + $0x58] sm:$0xff]   ;;  %v5274_v57 = vld [vmem:[%s5485_s17 + $0x60] sm:$0xff]   ;;  %v5276_v59 = vld [vmem:[%s5485_s17 + $0x68] sm:$0xff]  }
  0x41   : > { %4796 = vmatprep.subr.bf16.mxu0 %v5261_v20  ;;  %v5273_v56 = vld [vmem:[%s5485_s17 + $0x118] sm:$0xff]   ;;  %v5275_v58 = vld [vmem:[%s5485_s17 + $0x120] sm:$0xff]   ;;  %v5277_v60 = vld [vmem:[%s5485_s17 + $0x128] sm:$0xff]  }
  0x42   : > { %4955 = vmatpush3.bf16.msra.mxu1 %v5271_v29  ;;  %v5278_v61 = vld [vmem:[%s5485_s17 + $0x70] sm:$0xff]   ;;  %v5280_v63 = vld [vmem:[%s5485_s17 + $0x78] sm:$0xff]   ;;  %v5570_v1 = vld [vmem:[%s5485_s17] sm:$0xff]  }
  0x43   : > { %4956 = vmatprep.subr.bf16.mxu1 %v5273_v56  ;;  %v5279_v62 = vld [vmem:[%s5485_s17 + $0x130] sm:$0xff]   ;;  %v5281_v0 = vld [vmem:[%s5485_s17 + $0x138] sm:$0xff]   ;;  %v5574_v2 = vld [vmem:[%s5485_s17 + $0x140] sm:$0xff]  }
  0x44   : > { %4797 = vmatpush3.bf16.msra.mxu0 %v5261_v20  ;;  %v5577_v3 = vld [vmem:[#allocation2 + $0x4] sm:$0xf]  ;;  %v650_v4 = vld [vmem:[#allocation2] sm:$0x8]  ;;  %v652_v5 = vld [vmem:[#allocation2 + $0xc] sm:$0x8] }
  0x45   : > { %4798 = vmatprep.subr.bf16.mxu0 %v5262_v24  ;;  %v691_v6 = vshrl.u32 %v5577_v3, 16  ;;  %v686_v7 = vshrl.u32 %v650_v4, 16  ;;  %v699_v8 = vshrl.u32 %v652_v5, 16  ;;  %v1295_v9 = vld [vmem:[#allocation2 + $0x4] sm:$0xf]  ;;  %vm5686_vm4 = vmor %vm682_vm0, %vm683_vm1 }
  0x46   : > { %4957 = vmatpush3.bf16.msra.mxu1 %v5273_v56  ;;  %v5580_v10 = vld [vmem:[#allocation2 + $0x7c] sm:$0xf]  ;;  %v1331_v14 = vshrl.u32 %v1295_v9, 16  ;;  %v1334_v15 = vshll.u32 %v1295_v9, 16  ;;  %v2438_v18 = vld [vmem:[#allocation2 + $0x14] sm:$0x1]  ;;  %vm5736_vm5 = vmor %vm1327_vm2, %vm1328_vm3 }
  0x47   : > { %4958 = vmatprep.subr.bf16.mxu1 %v5275_v58  ;;  %v5582_v11 = vrot.slane %v691_v6, 7  ;;  %v5585_v13 = vrot.slane %v686_v7, 11  ;;  %v795_v16 = vshrl.u32 %v5580_v10, 16  ;;  %v5588_v17 = vrot.slane %v699_v8, 11  ;;  %v2440_v19 = vld [vmem:[#allocation2 + $0x20] sm:$0x1] }
  0x48   : > { %4799 = vmatpush3.bf16.msra.mxu0 %v5262_v24  ;;  %v654_v20 = vld [vmem:[#allocation2 + $0x18] sm:$0x8]  ;;  %v656_v21 = vld [vmem:[#allocation2 + $0x24] sm:$0x8]  ;;  %v658_v22 = vld [vmem:[#allocation2 + $0x30] sm:$0x8] }
  0x49   : > { %4800 = vmatprep.subr.bf16.mxu0 %v5263_v26  ;;  %v660_v23 = vld [vmem:[#allocation2 + $0x3c] sm:$0x8]  ;;  %v2442_v24 = vld [vmem:[#allocation2 + $0x2c] sm:$0x1]  ;;  %v2444_v25 = vld [vmem:[#allocation2 + $0x38] sm:$0x1] }
  0x4a   : > { %4959 = vmatpush3.bf16.msra.mxu1 %v5275_v58  ;;  %v1296_v27 = vld [vmem:[#allocation2 + $0x8] sm:$0x1]  ;;  %v1336_v29 = vrot.slane %v1334_v15, 5  ;;  %v712_v31 = vshrl.u32 %v654_v20, 16  ;;  %v725_v32 = vshrl.u32 %v656_v21, 16  ;;  %v738_v33 = vshrl.u32 %v658_v22, 16 }
  0x4b   : > { %4960 = vmatprep.subr.bf16.mxu1 %v5277_v60  ;;  %v2493_v34 = vshll.u32 %v2440_v19, 16  ;;  %v2450_v41 = vld [vmem:[#allocation2 + $0x5c] sm:$0x1]  ;;  %v1340_v42 = vshll.u32 %v1296_v27, 16  ;;  %v668_v4 = vld [vmem:[#allocation2 + $0x84] sm:$0x8] }
  0x4c   : > { %4801 = vmatpush3.bf16.msra.mxu0 %v5263_v26  ;;  %v664_v26 = vld [vmem:[#allocation2 + $0x54] sm:$0x8]  ;;  %v5595_v48 = vrot.slane %v712_v31, 11  ;;  %v5597_v49 = vrot.slane %v725_v32, 11  ;;  %v672_v5 = vld [vmem:[#allocation2 + $0x9c] sm:$0x8] }
  0x4d   : > { %4802 = vmatprep.subr.bf16.mxu0 %v5264_v28  ;;  %v777_v40 = vshrl.u32 %v664_v26, 16  ;;  %v5601_v52 = vrot.slane %v2493_v34, 5  ;;  %v674_v6 = vld [vmem:[#allocation2 + $0xa8] sm:$0x8]  ;;  %v2454_v7 = vld [vmem:[#allocation2 + $0x8c] sm:$0x1] }
  0x4e   : > { %4961 = vmatpush3.bf16.msra.mxu1 %v5277_v60  ;;  %v2456_v8 = vld [vmem:[#allocation2 + $0x98] sm:$0x1]  ;;  %v670_v9 = vld [vmem:[#allocation2 + $0x90] sm:$0x8]  ;;  %v803_v20 = vshrl.u32 %v668_v4, 16  ;;  %v829_v22 = vshrl.u32 %v672_v5, 16 }
  0x4f   : > { %4962 = vmatprep.subr.bf16.mxu1 %v5279_v62  ;;  %v5609_v60 = vrot.slane %v777_v40, 11  ;;  %v2605_v26 = vshll.u32 %v2456_v8, 16  ;;  %v816_v27 = vshrl.u32 %v670_v9, 16  ;;  %v680_v31 = vld [vmem:[#allocation2 + $0xcc] sm:$0x8] }
  0x50   : > { %4803 = vmatpush3.bf16.msra.mxu0 %v5264_v28  ;;  %v1333_v28 = vrot.slane %v1331_v14, 4  ;;  %v2903_v32 = vld [vmem:[#allocation2 + $0x18] sm:$0x8]  ;;  %v2464_v34 = vld [vmem:[#allocation2 + $0xc8] sm:$0x1] }
  0x51   : > { %4804 = vmatprep.subr.bf16.mxu0 %v5265_v30  ;;  %v5635_v4 = vrot.slane %v816_v27, 11 }
  0x52   : > { %4963 = vmatpush3.bf16.msra.mxu1 %v5279_v62  ;;  %v1337_v46 = vor.u32 %v1336_v29, %v1333_v28  ;;  %v842_v28 = vshrl.u32 %v674_v6, 16  ;;  %v2460_v29 = vld [vmem:[#allocation2 + $0xb0] sm:$0x1]  ;;  %v2468_v6 = vld [vmem:[#allocation2 + $0xe0] sm:$0x1] }
  0x53   : > { %4964 = vmatprep.subr.bf16.mxu1 %v5281_v0  ;;  %6868 = vst [vmem:[#allocation13_spill] sm:$0xff] %v5635_v4 }
  0x54   : > { %4805 = vmatpush3.bf16.msra.mxu0 %v5265_v30  ;;  %v2479_v30 = vshll.u32 %v2438_v18, 16  ;;  %v5637_v5 = vrot.slane %v842_v28, 11  ;;  %v2689_v28 = vshll.u32 %v2468_v6, 16 }
  0x55   : > { %4822 = vmatprep.subr.bf16.mxu0 %v5266_v35 }
  0x56   : > { %4965 = vmatpush3.bf16.msra.mxu1 %v5281_v0  ;;  %v5593_v47 = vrot.slane %v2479_v30, 5  ;;  %v5613_v0 = vrot.slane %v1340_v42, 5  ;;  %v676_v30 = vld [vmem:[#allocation2 + $0xb4] sm:$0x8]  ;;  %v2905_v42 = vld [vmem:[#allocation2 + $0x24] sm:$0x8] }
  0x57   : > { %4807 = vmatmul.mubr.bf16.vlgmr.msra.gmra.mrb[0].mxu0 %v426_v36  ;;  %4982 = vmatprep.subr.bf16.mxu1 %v5574_v2  ;;  %v2507_v36 = vshll.u32 %v2442_v24, 16  ;;  %v1298_v24 = vld [vmem:[#allocation2 + $0x14] sm:$0x1]  ;;  %6869 = vst [vmem:[#allocation14_spill] sm:$0xff] %v5637_v5  ;;  %v5304_v5 = vld [vmem:[%s5485_s17 + $0x28] sm:$0xff]  }
  0x58   : > { %4810 = vmatprep.mubr.bf16.mxu0 %v427_v38  ;;  %4823 = vmatpush3.bf16.msra.mxu0 %v5266_v35  ;;  %v751_v35 = vshrl.u32 %v660_v23, 16  ;;  %v5590_v38 = vrot.slane %v795_v16, 7  ;;  %6862 = vst [vmem:[#allocation7_spill] sm:$0xff] %v5613_v0  ;;  %v2458_v23 = vld [vmem:[#allocation2 + $0xa4] sm:$0x1] }
  0x59   : > { %4824 = vmatprep.subr.bf16.mxu0 %v5268_v37  ;;  %v2619_v40 = vshll.u32 %v2458_v23, 16 }
  0x5a   : > { %v5603_v53 = vrot.slane %v751_v35, 11  ;;  %v678_v35 = vld [vmem:[#allocation2 + $0xc0] sm:$0x8] }
  0x5c   : > { %4825 = vmatpush3.bf16.msra.mxu0 %v5268_v37  ;;  %v2521_v37 = vshll.u32 %v2444_v25, 16  ;;  %v2591_v25 = vshll.u32 %v2454_v7, 16  ;;  %v5639_v7 = vrot.slane %v2619_v40, 5  ;;  %v1306_v40 = vld [vmem:[#allocation2 + $0x44] sm:$0x1] }
  0x5d   : > { %4826 = vmatprep.subr.bf16.mxu0 %v5270_v43  ;;  %v1410_v39 = vshll.u32 %v1306_v40, 16  ;;  %v1312_v40 = vld [vmem:[#allocation2 + $0x80] sm:$0x1] }
  0x5e   : > { %6870 = vst [vmem:[#allocation15_spill] sm:$0xff] %v5639_v7 }
  0x5f   : > { %4811 = vmatmul.mubr.bf16.gmra.mrb[4].mxu0 %v428_v44  ;;  %v2448_v44 = vld [vmem:[#allocation2 + $0x50] sm:$0x1] }
  0x60   : > { %4814 = vmatprep.mubr.bf16.mxu0 %v429_v45  ;;  %4827 = vmatpush3.bf16.msra.mxu0 %v5270_v43  ;;  %v2446_v43 = vld [vmem:[#allocation2 + $0x44] sm:$0x1]  ;;  %v662_v45 = vld [vmem:[#allocation2 + $0x48] sm:$0x8] }
  0x61   : > { %4828 = vmatprep.subr.bf16.mxu0 %v5272_v55  ;;  %v2535_v56 = vshll.u32 %v2446_v43, 16  ;;  %v764_v58 = vshrl.u32 %v662_v45, 16  ;;  %v855_v43 = vshrl.u32 %v676_v30, 16  ;;  %v1354_v45 = vshll.u32 %v1298_v24, 16  ;;  %v1302_v30 = vld [vmem:[#allocation2 + $0x2c] sm:$0x1] }
  0x63   : > { %v5615_v14 = vrot.slane %v2535_v56, 5  ;;  %v5619_v16 = vrot.slane %v764_v58, 11  ;;  %v5629_v56 = vrot.slane %v829_v22, 11  ;;  %v2661_v58 = vshll.u32 %v2464_v34, 16  ;;  %v1304_v34 = vld [vmem:[#allocation2 + $0x38] sm:$0x1] }
  0x64   : > { %4829 = vmatpush3.bf16.msra.mxu0 %v5272_v55  ;;  %v5607_v55 = vrot.slane %v2521_v37, 5  ;;  %v5627_v37 = vrot.slane %v803_v20, 11  ;;  %v5643_v20 = vrot.slane %v855_v43, 11  ;;  %v5647_v23 = vrot.slane %v1354_v45, 5 }
  0x65   : > { %4830 = vmatprep.subr.bf16.mxu0 %v5274_v57  ;;  %6865 = vst [vmem:[#allocation10_spill] sm:$0xff] %v5629_v56  ;;  %v5661_v43 = vrot.slane %v2689_v28, 5  ;;  %v1382_v45 = vshll.u32 %v1302_v30, 16  ;;  %v1396_v6 = vshll.u32 %v1304_v34, 16  ;;  %v5667_v30 = vld [vmem:[#allocation2 + $0x70] sm:$0xf] }
  0x66   : > { %6872 = vst [vmem:[#allocation17_spill] sm:$0xff] %v5643_v20  ;;  %6874 = vst [vmem:[#allocation19_spill] sm:$0xff] %v5647_v23 }
  0x67   : > { %4815 = vmatmul.mubr.bf16.gmra.mrb[8].mxu0 %v430_v50  ;;  %v5599_v50 = vrot.slane %v738_v33, 11  ;;  %v2462_v33 = vld [vmem:[#allocation2 + $0xbc] sm:$0x1]  ;;  %6881 = vst [vmem:[#allocation26_spill] sm:$0xff] %v5661_v43  ;;  %v5665_v28 = vrot.slane %v1382_v45, 5 }
  0x68   : > { %4818 = vmatprep.mubr.bf16.mxu0 %v431_v51  ;;  %4831 = vmatpush3.bf16.msra.mxu0 %v5274_v57  ;;  %v2452_v51 = vld [vmem:[#allocation2 + $0x68] sm:$0x1]  ;;  %v2549_v57 = vshll.u32 %v2448_v44, 16  ;;  %v881_v44 = vshrl.u32 %v680_v31, 16  ;;  %v2907_v31 = vld [vmem:[#allocation2 + $0x30] sm:$0x8] }
  0x69   : > { %4832 = vmatprep.subr.bf16.mxu0 %v5276_v59  ;;  %v2577_v62 = vshll.u32 %v2452_v51, 16  ;;  %v2936_v51 = vshrl.u32 %v2903_v32, 16  ;;  %6883 = vst [vmem:[#allocation28_spill] sm:$0xff] %v5665_v28  ;;  %v2917_v43 = vld [vmem:[#allocation2 + $0x6c] sm:$0x8] }
  0x6a   : > { %v5617_v15 = vrot.slane %v2549_v57, 5  ;;  %v2647_v57 = vshll.u32 %v2462_v33, 16  ;;  %v5645_v22 = vrot.slane %v881_v44, 11  ;;  %v2921_v28 = vld [vmem:[#allocation2 + $0x9c] sm:$0x8] }
  0x6b   : > { %v5623_v21 = vrot.slane %v2577_v62, 5  ;;  %v5633_v62 = vrot.slane %v2605_v26, 5  ;;  %v5649_v24 = vrot.slane %v2936_v51, 11  ;;  %v5653_v26 = vrot.slane %v2661_v58, 5  ;;  %v2911_v51 = vld [vmem:[#allocation2 + $0x48] sm:$0x8] }
  0x6c   : > { %4833 = vmatpush3.bf16.msra.mxu0 %v5276_v59  ;;  %v2563_v59 = vshll.u32 %v2450_v41, 16  ;;  %v2633_v41 = vshll.u32 %v2460_v29, 16  ;;  %6873 = vst [vmem:[#allocation18_spill] sm:$0xff] %v5645_v22  ;;  %v1300_v29 = vld [vmem:[#allocation2 + $0x20] sm:$0x1] }
  0x6d   : > { %4834 = vmatprep.subr.bf16.mxu0 %v5278_v61  ;;  %6864 = vst [vmem:[#allocation9_spill] sm:$0xff] %v5623_v21  ;;  %6867 = vst [vmem:[#allocation12_spill] sm:$0xff] %v5633_v62  ;;  %v1368_v44 = vshll.u32 %v1300_v29, 16  ;;  %v2988_v29 = vshrl.u32 %v2911_v51, 16  ;;  %v5676_v51 = vrot.slane %v1396_v6, 5 }
  0x6e   : > { %v5621_v18 = vrot.slane %v2563_v59, 5  ;;  %v868_v59 = vshrl.u32 %v678_v35, 16  ;;  %v5641_v8 = vrot.slane %v2633_v41, 5  ;;  %6875 = vst [vmem:[#allocation20_spill] sm:$0xff] %v5649_v24  ;;  %6877 = vst [vmem:[#allocation22_spill] sm:$0xff] %v5653_v26  ;;  %v5678_v26 = vrot.slane %v1410_v39, 5 }
  0x6f   : > { %4819 = vmatmul.mubr.bf16.gmra.mrb[12].mxu0 %v432_v54  ;;  %v5605_v54 = vrot.slane %v2507_v36, 5  ;;  %v1311_v35 = vld [vmem:[#allocation2 + $0x7c] sm:$0xf]  ;;  %v2915_v24 = vld [vmem:[#allocation2 + $0x60] sm:$0x8]  ;;  %6886 = vst [vmem:[#allocation30_spill] sm:$0xff] %v5676_v51 }
  0x70   : > { %4835 = vmatpush3.bf16.msra.mxu0 %v5278_v61  ;;  %v666_v61 = vld [vmem:[#allocation2 + $0x78] sm:$0x8]  ;;  %6863 = vst [vmem:[#allocation8_spill] sm:$0xff] %v5621_v18  ;;  %6871 = vst [vmem:[#allocation16_spill] sm:$0xff] %v5641_v8  ;;  %v5655_v27 = vrot.slane %v868_v59, 11  ;;  %v1446_v58 = vshll.u32 %v1311_v35, 16 }
  0x71   : > { %4836 = vmatprep.subr.bf16.mxu0 %v5280_v63  ;;  %v790_v19 = vshrl.u32 %v666_v61, 16  ;;  %v5631_v61 = vrot.slane %v2591_v25, 5  ;;  %v5651_v25 = vrot.slane %v2647_v57, 5  ;;  %v2909_v41 = vld [vmem:[#allocation2 + $0x3c] sm:$0x8]  ;;  %v1443_v57 = vshrl.u32 %v1311_v35, 16 }
  0x72   : > { %6878 = vst [vmem:[#allocation23_spill] sm:$0xff] %v5655_v27  ;;  %v1763_v59 = vld [vmem:[#allocation2 + $0xc] sm:$0x8]  ;;  %v6884_v35 = vshll.u32 %v5577_v3, 16  ;;  %v3014_v45 = vshrl.u32 %v2915_v24, 16  ;;  %6887 = vst [vmem:[#allocation31_spill] sm:$0xff] %v5678_v26 }
  0x73   : > { %v5625_v36 = vrot.slane %v790_v19, 11  ;;  %6866 = vst [vmem:[#allocation11_spill] sm:$0xff] %v5631_v61  ;;  %v2949_v19 = vshrl.u32 %v2905_v42, 16  ;;  %6876 = vst [vmem:[#allocation21_spill] sm:$0xff] %v5651_v25  ;;  %v2913_v42 = vld [vmem:[#allocation2 + $0x54] sm:$0x8] }
  0x74   : > { %4837 = vmatpush3.bf16.msra.mxu0 %v5280_v63  ;;  %v5611_v63 = vrot.slane %v1337_v46, 4  ;;  %v2466_v46 = vld [vmem:[#allocation2 + $0xd4] sm:$0x1]  ;;  %v3001_v12 = vshrl.u32 %v2913_v42, 16  ;;  %v5672_v34 = vor.u32 %v6884_v35, %v5582_v11  ;;  %v1448_v42 = vrot.slane %v1446_v58, 5  ;;  %v5933_v27 = vld [vmem:[%s5485_s17 + $0x20] sm:$0xff]  }
  0x75   : > { %4854 = vmatprep.subr.bf16.mxu0 %v5570_v1  ;;  %v2675_v9 = vshll.u32 %v2466_v46, 16  ;;  %v5659_v33 = vrot.slane %v2949_v19, 11  ;;  %v2962_v46 = vshrl.u32 %v2907_v31, 16  ;;  %v1308_v19 = vld [vmem:[#allocation2 + $0x50] sm:$0x1]  ;;  %v1796_v31 = vshrl.u32 %v1763_v59, 16 }
  0x76   : > { %6861 = vst [vmem:[#allocation6_spill] sm:$0xff] %v5611_v63  ;;  %v5682_v25 = vrot.slane %v3001_v12, 11  ;;  %v1314_v11 = vld [vmem:[#allocation2 + $0x8c] sm:$0x1]  ;;  %v3027_v24 = vshrl.u32 %v2917_v43, 16  ;;  %v3032_v58 = vshrl.u32 %v5667_v30, 16 }
  0x77   : > { %v5657_v32 = vrot.slane %v2675_v9, 5  ;;  %6880 = vst [vmem:[#allocation25_spill] sm:$0xff] %v5659_v33  ;;  %v2975_v9 = vshrl.u32 %v2909_v41, 16  ;;  %v1310_v33 = vld [vmem:[#allocation2 + $0x5c] sm:$0x1]  ;;  %v1445_v41 = vrot.slane %v1443_v57, 4 }
  0x78   : > { %v5674_v23 = vrot.slane %v2962_v46, 11  ;;  %6889 = vst [vmem:[#allocation33_spill] sm:$0xff] %v5682_v25  ;;  %v5690_v46 = vrot.slane %v2988_v29, 11  ;;  %v2919_v6 = vld [vmem:[#allocation2 + $0x90] sm:$0x8]  ;;  %v5701_v35 = vrot.slane %v1796_v31, 11 }
  0x79   : > { %6879 = vst [vmem:[#allocation24_spill] sm:$0xff] %v5657_v32  ;;  %v5663_v32 = vrot.slane %v1368_v44, 5  ;;  %v1424_v44 = vshll.u32 %v1308_v19, 16  ;;  %v5680_v59 = vrot.slane %v2975_v9, 11  ;;  %v5698_v12 = vld [vmem:[%s301_s10] ss:$0 sm:$0xff]  ;;  %v1449_v39 = vor.u32 %v1448_v42, %v1445_v41 }
  0x7a   : > { %6885 = vst [vmem:[#allocation29_spill] sm:$0xff] %v5674_v23  ;;  %6892 = vst [vmem:[#allocation34_spill] sm:$0xff] %v5690_v46  ;;  %v3035_v9 = vshll.u32 %v5667_v30, 16  ;;  %v3053_v19 = vshrl.u32 %v2921_v28, 16  ;;  %v1466_v43 = vshll.u32 %v1314_v11, 16  ;;  %v6897_v30 = vshll.u32 %v5580_v10, 16 }
  0x7b   : > { %6882 = vst [vmem:[#allocation27_spill] sm:$0xff] %v5663_v32  ;;  %v1438_v32 = vshll.u32 %v1310_v33, 16  ;;  %6888 = vst [vmem:[#allocation32_spill] sm:$0xff] %v5680_v59  ;;  %v1452_v33 = vshll.u32 %v1312_v40, 16  ;;  %v5703_v25 = vrot.slane %v1424_v44, 5  ;;  %v5707_v40 = vrot.slane %v3014_v45, 11 }
  0x7c   : > { %6893 = vst [vmem:[#allocation35_spill] sm:$0xff] %v5701_v35  ;;  %v1316_v46 = vld [vmem:[#allocation2 + $0x98] sm:$0x1]  ;;  %v5716_v28 = vor.u32 %v6897_v30, %v5590_v38  ;;  %v3040_v31 = vshrl.u32 %v2919_v6, 16  ;;  %v1318_v41 = vld [vmem:[#allocation2 + $0xa4] sm:$0x1] }
  0x7d   : > { %6894 = vst [vmem:[#allocation36_spill] sm:$0xff] %v5703_v25  ;;  %v5705_v29 = vrot.slane %v1438_v32, 5  ;;  %6896 = vst [vmem:[#allocation38_spill] sm:$0xff] %v5707_v40  ;;  %v2923_v42 = vld [vmem:[#allocation2 + $0xa8] sm:$0x8]  ;;  %v5719_v45 = vrot.slane %v1452_v33, 5 }
  0x7e   : > { %v5721_v11 = vrot.slane %v3027_v24, 11  ;;  %v3034_v35 = vrot.slane %v3032_v58, 7  ;;  %v1765_v40 = vld [vmem:[#allocation2 + $0x18] sm:$0x8]  ;;  %v5724_v25 = vrot.slane %v1449_v39, 4  ;;  %v5726_v59 = vrot.slane %v3053_v19, 11 }
  0x7f   : > { %6895 = vst [vmem:[#allocation37_spill] sm:$0xff] %v5705_v29  ;;  %6898 = vst [vmem:[#allocation39_spill] sm:$0xff] %v5719_v45  ;;  %v1480_v38 = vshll.u32 %v1316_v46, 16  ;;  %v1320_v6 = vld [vmem:[#allocation2 + $0xb0] sm:$0x1]  ;;  %v1494_v33 = vshll.u32 %v1318_v41, 16 }
  0x80   : > { %6899 = vst [vmem:[#allocation40_spill] sm:$0xff] %v5721_v11  ;;  %6900 = vst [vmem:[#allocation41_spill] sm:$0xff] %v5724_v25  ;;  %v1322_v8 = vld [vmem:[#allocation2 + $0xbc] sm:$0x1]  ;;  %v3066_v24 = vshrl.u32 %v2923_v42, 16  ;;  %v5740_v46 = vrot.slane %v1466_v43, 5 }
  0x81   : > { %6901 = vst [vmem:[#allocation42_spill] sm:$0xff] %v5726_v59  ;;  %v5742_v19 = vrot.slane %v3040_v31, 11  ;;  %v1508_v42 = vshll.u32 %v1320_v6, 16  ;;  %v5752_v59 = vrot.slane %v1480_v38, 5  ;;  %v1522_v22 = vshll.u32 %v1322_v8, 16 }
  0x82   : > { %6906 = vst [vmem:[#allocation45_spill] sm:$0xff] %v5740_v46  ;;  %v2929_v43 = vld [vmem:[#allocation2 + $0xcc] sm:$0x8]  ;;  %v1324_v6 = vld [vmem:[#allocation2 + $0xc8] sm:$0x1] }
  0x83   : > { %6907 = vst [vmem:[#allocation46_spill] sm:$0xff] %v5742_v19  ;;  %6910 = vst [vmem:[#allocation49_spill] sm:$0xff] %v5752_v59  ;;  %v1536_v0 = vshll.u32 %v1324_v6, 16  ;;  %v5798_v6 = vld [vmem:[#allocation2 + $0xd8] sm:$0x8] }
  0x84   : > { %6922 = vst [vmem:[#allocation61_spill] sm:$0xff] %v5798_v6 }
 0x12a   : > { %v4808_v26 = vpop.f32.mrb[0].mxu0 }
 0x12b   : > { %v547_v32 = vadd.f32 %v4808_v26, %v5698_v12  ;;  %v538_v44 = vpop.f32.mrb[1].mxu0 }
 0x12c   : > { %v539_v29 = vadd.f32 %v5698_v12, %v538_v44  ;;  %v4809_v51 = vpop.f32.mrb[2].mxu0 }
 0x12d   : > { %v5728_v30 = vmax.f32 %v547_v32, 0.0  ;;  %v550_v26 = vadd.f32 %v4809_v51, %v5698_v12  ;;  %v541_v23 = vpop.f32.mrb[3].mxu0  ;;  %v1809_v32 = vshrl.u32 %v1765_v40, 16  ;;  %v5762_v40 = vrot.slane %v3066_v24, 11 }
 0x12e   : > { %v5731_v7 = vmax.f32 %v539_v29, 0.0  ;;  %v542_v58 = vadd.f32 %v5698_v12, %v541_v23  ;;  %v2925_v29 = vld [vmem:[#allocation2 + $0xb4] sm:$0x8] }
 0x12f   : > { %6902 = vst [vmem:[#allocation43_spill] sm:$0xff] %v5728_v30  ;;  %v619_v51 = vpack.c.bf16 %v5728_v30, %v5728_v30  ;;  %v5746_v41 = vmax.f32 %v550_v26, 0.0  ;;  %v5760_v26 = vrot.slane %v1494_v33, 5  ;;  %6912 = vst [vmem:[#allocation51_spill] sm:$0xff] %v5762_v40  ;;  %v2927_v30 = vld [vmem:[#allocation2 + $0xc0] sm:$0x8] }
 0x130   : > { %6903 = vst [vmem:[#allocation44_spill] sm:$0xff] %v5731_v7  ;;  %v617_v23 = vpack.c.bf16 %v5731_v7, %v5731_v7  ;;  %v5750_v44 = vmax.f32 %v542_v58, 0.0  ;;  %v1326_v58 = vld [vmem:[#allocation2 + $0xd4] sm:$0x1]  ;;  %v3079_v7 = vshrl.u32 %v2925_v29, 16  ;;  %v5775_v59 = vrot.slane %v1809_v32, 11 }
 0x131   : > { %6908 = vst [vmem:[#allocation47_spill] sm:$0xff] %v5746_v41  ;;  %636 = vst [vmem:[#allocation2 + $0x28] sm:$0xf] %v619_v51  ;;  %v620_v31 = vpack.c.bf16 %v5746_v41, %v5746_v41  ;;  %v5770_v41 = vor.u32 %v3035_v9, %v3034_v35  ;;  %v1767_v33 = vld [vmem:[#allocation2 + $0x24] sm:$0x8]  ;;  %v5778_v51 = vrot.slane %v1522_v22, 5 }
 0x132   : > { %6909 = vst [vmem:[#allocation48_spill] sm:$0xff] %v5750_v44  ;;  %6911 = vst [vmem:[#allocation50_spill] sm:$0xff] %v5760_v26  ;;  %v618_v8 = vpack.c.bf16 %v5750_v44, %v5750_v44  ;;  %v4812_v38 = vpop.f32.mrb[4].mxu0  ;;  %v5773_v26 = vrot.slane %v1508_v42, 5  ;;  %v1769_v44 = vld [vmem:[#allocation2 + $0x30] sm:$0x8] }
 0x133   : > { %634 = vst [vmem:[#allocation2 + $0x10] sm:$0xf] %v617_v23  ;;  %6913 = vst [vmem:[#allocation52_spill] sm:$0xff] %v5770_v41  ;;  %v563_v24 = vadd.f32 %v4812_v38, %v5698_v12  ;;  %v554_v40 = vpop.f32.mrb[5].mxu0  ;;  %v3105_v23 = vshrl.u32 %v2929_v43, 16  ;;  %v3092_v9 = vshrl.u32 %v2927_v30, 16 }
 0x134   : > { %637 = vst [vmem:[#allocation2 + $0x34] sm:$0xf] %v620_v31  ;;  %6914 = vst [vmem:[#allocation53_spill] sm:$0xff] %v5773_v26  ;;  %v555_v19 = vadd.f32 %v5698_v12, %v554_v40  ;;  %v4813_v46 = vpop.f32.mrb[6].mxu0  ;;  %v1550_v35 = vshll.u32 %v1326_v58, 16  ;;  %v1822_v42 = vshrl.u32 %v1767_v33, 16 }
 0x135   : > { %6915 = vst [vmem:[#allocation54_spill] sm:$0xff] %v5775_v59  ;;  %635 = vst [vmem:[#allocation2 + $0x1c] sm:$0xf] %v618_v8  ;;  %v5780_v29 = vmax.f32 %v563_v24, 0.0  ;;  %v566_v31 = vadd.f32 %v4813_v46, %v5698_v12  ;;  %v557_v38 = vpop.f32.mrb[7].mxu0  ;;  %v5786_v43 = vrot.slane %v3079_v7, 11 }
 0x136   : > { %6916 = vst [vmem:[#allocation55_spill] sm:$0xff] %v5778_v51  ;;  %v5783_v26 = vmax.f32 %v555_v19, 0.0  ;;  %v558_v32 = vadd.f32 %v5698_v12, %v557_v38  ;;  %v1835_v8 = vshrl.u32 %v1769_v44, 16  ;;  %v5796_v46 = vrot.slane %v3105_v23, 11  ;;  %v5800_v19 = vld [vmem:[#allocation2 + $0xe4] sm:$0x8] }
 0x137   : > { %6917 = vst [vmem:[#allocation56_spill] sm:$0xff] %v5780_v29  ;;  %6919 = vst [vmem:[#allocation58_spill] sm:$0xff] %v5786_v43  ;;  %v623_v22 = vpack.c.bf16 %v5780_v29, %v5780_v29  ;;  %v5790_v40 = vmax.f32 %v566_v31, 0.0  ;;  %v5812_v24 = vrot.slane %v3092_v9, 11  ;;  %v5814_v23 = vld [vmem:[#allocation2 + $0xe8] sm:$0xf] }
 0x138   : > { %6918 = vst [vmem:[#allocation57_spill] sm:$0xff] %v5783_v26  ;;  %6921 = vst [vmem:[#allocation60_spill] sm:$0xff] %v5796_v46  ;;  %v621_v7 = vpack.c.bf16 %v5783_v26, %v5783_v26  ;;  %v5804_v44 = vmax.f32 %v558_v32, 0.0  ;;  %v5806_v58 = vld [vmem:[#allocation2 + $0x28] sm:$0xf]  ;;  %v5820_v30 = vrot.slane %v1536_v0, 5 }
 0x139   : > { %6920 = vst [vmem:[#allocation59_spill] sm:$0xff] %v5790_v40  ;;  %6923 = vst [vmem:[#allocation62_spill] sm:$0xff] %v5800_v19  ;;  %v624_v31 = vpack.c.bf16 %v5790_v40, %v5790_v40  ;;  %v5822_v32 = vrot.slane %v1550_v35, 5  ;;  %v5824_v29 = vrot.slane %v1822_v42, 11  ;;  %v5831_v40 = vrot.slane %v1835_v8, 11 }
 0x13a   : > { %6924 = vst [vmem:[#allocation63_spill] sm:$0xff] %v5804_v44  ;;  %6925 = vst [vmem:[#allocation64_spill] sm:$0xff] %v5812_v24  ;;  %v5818_v38 = vld [vmem:[#allocation2 + $0x10] sm:$0xf]  ;;  %v622_v33 = vpack.c.bf16 %v5804_v44, %v5804_v44  ;;  %v4816_v9 = vpop.f32.mrb[8].mxu0 }
 0x13b   : > { %6926 = vst [vmem:[#allocation65_spill] sm:$0xff] %v5814_v23  ;;  %640 = vst [vmem:[#allocation2 + $0x58] sm:$0xf] %v623_v22  ;;  %v4408_v26 = vcombine.low %v5577_v3, %v5818_v38  ;;  %v730_v22 = vshrl.u32 %v5806_v58, 16  ;;  %v1764_v59 = vld [vmem:[#allocation2 + $0x10] sm:$0xf]  ;;  %v579_v0 = vadd.f32 %v4816_v9, %v5698_v12 }
 0x13c   : > { %6927 = vst [vmem:[#allocation66_spill] sm:$0xff] %v5820_v30  ;;  %6928 = vst [vmem:[#allocation67_spill] sm:$0xff] %v5822_v32  ;;  %v570_v35 = vpop.f32.mrb[9].mxu0  ;;  %v5834_v32 = vld [vmem:[#allocation2 + $0x1c] sm:$0xf]  ;;  %v704_v8 = vshrl.u32 %v5818_v38, 16 }
 0x13d   : > { %6929 = vst [vmem:[#allocation68_spill] sm:$0xff] %v5824_v29  ;;  %638 = vst [vmem:[#allocation2 + $0x40] sm:$0xf] %v621_v7  ;;  %v571_v3 = vadd.f32 %v5698_v12, %v570_v35  ;;  %v4817_v30 = vpop.f32.mrb[10].mxu0  ;;  %4838 = vmatprep.mubr.bf16.mxu0 %v4408_v26  ;;  %v5843_v29 = vmax.f32 %v579_v0, 0.0  ;;  %v4409_v44 = vcombine.low %v5834_v32, %v5806_v58  ;;  %v5288_v35 = vld [vmem:[%s5485_s17 + $0x8] sm:$0xff]  }
 0x13e   : > { %6930 = vst [vmem:[#allocation69_spill] sm:$0xff] %v5831_v40  ;;  %641 = vst [vmem:[#allocation2 + $0x64] sm:$0xf] %v624_v31  ;;  %v1766_v40 = vld [vmem:[#allocation2 + $0x1c] sm:$0xf]  ;;  %v582_v42 = vadd.f32 %v4817_v30, %v5698_v12  ;;  %v573_v7 = vpop.f32.mrb[11].mxu0 }
 0x13f   : > { %639 = vst [vmem:[#allocation2 + $0x4c] sm:$0xf] %v622_v33  ;;  %6931 = vst [vmem:[#allocation70_spill] sm:$0xff] %v5843_v29  ;;  %v1801_v33 = vshrl.u32 %v1764_v59, 16  ;;  %v5848_v19 = vld [vmem:[#allocation2 + $0x34] sm:$0xf]  ;;  %v574_v26 = vadd.f32 %v5698_v12, %v573_v7  ;;  %v627_v30 = vpack.c.bf16 %v5843_v29, %v5843_v29  ;;  %4839 = vmatmul.mubr.bf16.vlgmr.msra.gmra.mrb[16].mxu0 %v4409_v44 }
 0x140   : > { %v5851_v23 = vmax.f32 %v571_v3, 0.0  ;;  %v717_v9 = vshrl.u32 %v5834_v32, 16  ;;  %v5855_v31 = vrot.slane %v730_v22, 7  ;;  %v5859_v0 = vmax.f32 %v582_v42, 0.0  ;;  %v5861_v24 = vld [vmem:[#allocation2 + $0x28] sm:$0xf]  ;;  %4855 = vmatpush3.bf16.msra.mxu0 %v5570_v1 }
 0x141   : > { %v1803_v6 = vrot.slane %v1801_v33, 7  ;;  %v1814_v46 = vshrl.u32 %v1766_v40, 16  ;;  %v5865_v43 = vmax.f32 %v574_v26, 0.0  ;;  %v4488_v7 = vcombine.low %v1764_v59, %v1766_v40  ;;  %v5289_v29 = vld [vmem:[%s5485_s17 + $0x148] sm:$0xff]   ;;  %644 = vst [vmem:[#allocation2 + $0xa0] sm:$0xf] %v627_v30  ;;  %4856 = vmatprep.subr.bf16.mxu0 %v5288_v35 }
 0x142   : > { %6932 = vst [vmem:[#allocation71_spill] sm:$0xff] %v5851_v23  ;;  %6933 = vst [vmem:[#allocation72_spill] sm:$0xff] %v5859_v0  ;;  %v625_v3 = vpack.c.bf16 %v5851_v23, %v5851_v23  ;;  %v4489_v22 = vcombine.low %v5861_v24, %v5848_v19  ;;  %v628_v44 = vpack.c.bf16 %v5859_v0, %v5859_v0  ;;  %v5873_v42 = vrot.slane %v704_v8, 7  ;;  %v5875_v41 = vld [vmem:[#allocation2 + $0x34] sm:$0xf]  ;;  %v4820_v0 = vpop.f32.mrb[12].mxu0 }
 0x143   : > { %6934 = vst [vmem:[#allocation73_spill] sm:$0xff] %v5865_v43  ;;  %v1804_v33 = vshll.u32 %v1764_v59, 16  ;;  %v1816_v51 = vrot.slane %v1814_v46, 7  ;;  %v5292_v26 = vld [vmem:[%s5485_s17 + $0x10] sm:$0xff]   ;;  %v626_v1 = vpack.c.bf16 %v5865_v43, %v5865_v43  ;;  %4966 = vmatprep.mubr.bf16.mxu1 %v4488_v7  ;;  %v1827_v30 = vshrl.u32 %v5861_v24, 16  ;;  %v586_v43 = vpop.f32.mrb[13].mxu0 }
 0x144   : > { %642 = vst [vmem:[#allocation2 + $0x88] sm:$0xf] %v625_v3  ;;  %v1840_v11 = vshrl.u32 %v5848_v19, 16  ;;  %v5883_v8 = vld [vmem:[#allocation2 + $0x40] sm:$0xf]  ;;  %v5885_v59 = vrot.slane %v717_v9, 7  ;;  %4967 = vmatmul.mubr.bf16.vlgmr.msra.gmra.mrb[0].mxu1 %v4489_v22  ;;  %v595_v3 = vadd.f32 %v4820_v0, %v5698_v12  ;;  %v587_v25 = vadd.f32 %v5698_v12, %v586_v43  ;;  %4857 = vmatpush3.bf16.msra.mxu0 %v5288_v35 }
 0x145   : > { %645 = vst [vmem:[#allocation2 + $0xac] sm:$0xf] %v628_v44  ;;  %v5887_v46 = vor.u32 %v1804_v33, %v1803_v6  ;;  %v1817_v45 = vshll.u32 %v1766_v40, 16  ;;  %643 = vst [vmem:[#allocation2 + $0x94] sm:$0xf] %v626_v1  ;;  %4983 = vmatpush3.bf16.msra.mxu1 %v5574_v2  ;;  %v4821_v9 = vpop.f32.mrb[14].mxu0  ;;  %4858 = vmatprep.subr.bf16.mxu0 %v5292_v26 }
 0x146   : > { %v743_v6 = vshrl.u32 %v5875_v41, 16  ;;  %v5895_v40 = vld [vmem:[#allocation2 + $0x58] sm:$0xf]  ;;  %v5899_v0 = vmax.f32 %v595_v3, 0.0  ;;  %4984 = vmatprep.subr.bf16.mxu1 %v5289_v29  ;;  %v598_v44 = vadd.f32 %v4821_v9, %v5698_v12  ;;  %v756_v33 = vshrl.u32 %v5883_v8, 16  ;;  %v589_v2 = vpop.f32.mrb[15].mxu0 }
 0x147   : > { %6935 = vst [vmem:[#allocation74_spill] sm:$0xff] %v5887_v46  ;;  %v5897_v22 = vor.u32 %v1817_v45, %v1816_v51  ;;  %v5903_v1 = vld [vmem:[#allocation2 + $0x4c] sm:$0xf]  ;;  %v5294_v43 = vld [vmem:[%s5485_s17 + $0x150] sm:$0xff]   ;;  %v5906_v35 = vrot.slane %v1827_v30, 7  ;;  %v5908_v23 = vrot.slane %v1840_v11, 7  ;;  %v590_v46 = vadd.f32 %v5698_v12, %v589_v2 }
 0x148   : > { %6937 = vst [vmem:[#allocation76_spill] sm:$0xff] %v5899_v0  ;;  %v5910_v7 = vmax.f32 %v587_v25, 0.0  ;;  %v5296_v51 = vld [vmem:[%s5485_s17 + $0x18] sm:$0xff]   ;;  %v631_v3 = vpack.c.bf16 %v5899_v0, %v5899_v0  ;;  %v5916_v9 = vmax.f32 %v598_v44, 0.0  ;;  %v5921_v30 = vld [vmem:[#allocation2 + $0x40] sm:$0xf]  ;;  %4859 = vmatpush3.bf16.msra.mxu0 %v5292_v26 }
 0x149   : > { %6936 = vst [vmem:[#allocation75_spill] sm:$0xff] %v5897_v22  ;;  %v4410_v22 = vcombine.low %v5875_v41, %v5883_v8  ;;  %6940 = vst [vmem:[#allocation79_spill] sm:$0xff] %v5921_v30  ;;  %v5297_v11 = vld [vmem:[%s5485_s17 + $0x158] sm:$0xff]   ;;  %4985 = vmatpush3.bf16.msra.mxu1 %v5289_v29  ;;  %v5926_v63 = vrot.slane %v743_v6, 7  ;;  %v769_v45 = vshrl.u32 %v5903_v1, 16  ;;  %v782_v0 = vshrl.u32 %v5895_v40, 16  ;;  %4860 = vmatprep.subr.bf16.mxu0 %v5296_v51 }
 0x14a   : > { %6938 = vst [vmem:[#allocation77_spill] sm:$0xff] %v5910_v7  ;;  %6939 = vst [vmem:[#allocation78_spill] sm:$0xff] %v5916_v9  ;;  %v629_v25 = vpack.c.bf16 %v5910_v7, %v5910_v7  ;;  %v5930_v44 = vld [vmem:[#allocation2 + $0x4c] sm:$0xf]  ;;  %v632_v12 = vpack.c.bf16 %v5916_v9, %v5916_v9  ;;  %v5937_v2 = vrot.slane %v756_v33, 7  ;;  %v5939_v7 = vmax.f32 %v590_v46, 0.0  ;;  %4986 = vmatprep.subr.bf16.mxu1 %v5294_v43 }
 0x14b   : > { %6941 = vst [vmem:[#allocation80_spill] sm:$0xff] %v5930_v44  ;;  %648 = vst [vmem:[#allocation2 + $0xd0] sm:$0xf] %v631_v3  ;;  %4842 = vmatprep.mubr.bf16.mxu0 %v4410_v22  ;;  %v4411_v29 = vcombine.low %v5903_v1, %v5895_v40  ;;  %v5943_v6 = vld [vmem:[#allocation2 + $0x58] sm:$0xf]  ;;  %v1853_v33 = vshrl.u32 %v5921_v30, 16  ;;  %v4490_v26 = vcombine.low %v5921_v30, %v5930_v44 }
 0x14c   : > { %6942 = vst [vmem:[#allocation81_spill] sm:$0xff] %v5939_v7  ;;  %6943 = vst [vmem:[#allocation82_spill] sm:$0xff] %v5943_v6  ;;  %v5945_v62 = vld [vmem:[#allocation2 + $0x64] sm:$0xf]  ;;  %v5951_v46 = vld [vmem:[#allocation2 + $0x88] sm:$0xf]  ;;  %v630_v22 = vpack.c.bf16 %v5939_v7, %v5939_v7  ;;  %4861 = vmatpush3.bf16.msra.mxu0 %v5296_v51 }
 0x14d   : > { %6944 = vst [vmem:[#allocation83_spill] sm:$0xff] %v5945_v62  ;;  %646 = vst [vmem:[#allocation2 + $0xb8] sm:$0xf] %v629_v25  ;;  %v5955_v61 = vrot.slane %v769_v45, 7  ;;  %4843 = vmatmul.mubr.bf16.gmra.mrb[20].mxu0 %v4411_v29  ;;  %v1866_v25 = vshrl.u32 %v5930_v44, 16  ;;  %v5964_v20 = vrot.slane %v782_v0, 7  ;;  %4987 = vmatpush3.bf16.msra.mxu1 %v5294_v43  ;;  %v4491_v0 = vcombine.low %v5943_v6, %v5945_v62 }
 0x14e   : > { %649 = vst [vmem:[#allocation2 + $0xdc] sm:$0xf] %v632_v12  ;;  %v5960_v3 = vld [vmem:[#allocation2 + $0xa0] sm:$0xf]  ;;  %v5962_v9 = vld [vmem:[#allocation2 + $0x88] sm:$0xf]  ;;  %4970 = vmatprep.mubr.bf16.mxu1 %v4490_v26  ;;  %4988 = vmatprep.subr.bf16.mxu1 %v5297_v11 }
 0x14f   : > { %6945 = vst [vmem:[#allocation84_spill] sm:$0xff] %v5960_v3  ;;  %6946 = vst [vmem:[#allocation85_spill] sm:$0xff] %v5962_v9  ;;  %v1879_v21 = vshrl.u32 %v5943_v6, 16  ;;  %v1892_v45 = vshrl.u32 %v5945_v62, 16  ;;  %v5969_v29 = vld [vmem:[#allocation2 + $0x94] sm:$0xf]  ;;  %4862 = vmatprep.subr.bf16.mxu0 %v5933_v27  ;;  %4971 = vmatmul.mubr.bf16.gmra.mrb[4].mxu1 %v4491_v0 }
 0x150   : > { %647 = vst [vmem:[#allocation2 + $0xc4] sm:$0xf] %v630_v22  ;;  %v5971_v7 = vrot.slane %v1853_v33, 7  ;;  %v808_v12 = vshrl.u32 %v5951_v46, 16  ;;  %v5302_v30 = vld [vmem:[%s5485_s17 + $0x160] sm:$0xff]   ;;  %v5980_v43 = vrot.slane %v1866_v25, 7  ;;  %v4412_v33 = vcombine.low %v5580_v10, %v5951_v46  ;;  %4863 = vmatpush3.bf16.msra.mxu0 %v5933_v27 }
 0x151   : > { %v5978_v18 = vld [vmem:[#allocation2 + $0xa0] sm:$0xf]  ;;  %v5987_v26 = vld [vmem:[#allocation2 + $0x94] sm:$0xf]  ;;  %v5990_v44 = vrot.slane %v1879_v21, 7  ;;  %v821_v25 = vshrl.u32 %v5969_v29, 16  ;;  %4989 = vmatpush3.bf16.msra.mxu1 %v5297_v11  ;;  %v4413_v62 = vcombine.low %v5969_v29, %v5960_v3  ;;  %4864 = vmatprep.subr.bf16.mxu0 %v5304_v5 }
 0x152   : > { %6947 = vst [vmem:[#allocation86_spill] sm:$0xff] %v5971_v7  ;;  %6948 = vst [vmem:[#allocation87_spill] sm:$0xff] %v5978_v18  ;;  %v5992_v7 = vrot.slane %v1892_v45, 7  ;;  %v834_v51 = vshrl.u32 %v5960_v3, 16  ;;  %v5996_v6 = vld [vmem:[#allocation2 + $0xac] sm:$0xf]  ;;  %4846 = vmatprep.mubr.bf16.mxu0 %v4412_v33  ;;  %4990 = vmatprep.subr.bf16.mxu1 %v5302_v30  ;;  %v4492_v56 = vcombine.low %v5962_v9, %v5987_v26 }
 0x153   : > { %6949 = vst [vmem:[#allocation88_spill] sm:$0xff] %v5980_v43  ;;  %6950 = vst [vmem:[#allocation89_spill] sm:$0xff] %v5987_v26  ;;  %v5998_v22 = vrot.slane %v808_v12, 7  ;;  %v1905_v21 = vshrl.u32 %v5962_v9, 16  ;;  %v5305_v45 = vld [vmem:[%s5485_s17 + $0x168] sm:$0xff]   ;;  %v1918_v12 = vshrl.u32 %v5987_v26, 16 }
 0x154   : > { %6951 = vst [vmem:[#allocation90_spill] sm:$0xff] %v5990_v44  ;;  %6952 = vst [vmem:[#allocation91_spill] sm:$0xff] %v5992_v7  ;;  %v6005_v0 = vld [vmem:[#allocation2 + $0xac] sm:$0xf]  ;;  %v6012_v33 = vld [vmem:[#allocation2 + $0xb8] sm:$0xf]  ;;  %4974 = vmatprep.mubr.bf16.mxu1 %v4492_v56  ;;  %4865 = vmatpush3.bf16.msra.mxu0 %v5304_v5 }
 0x155   : > { %6953 = vst [vmem:[#allocation92_spill] sm:$0xff] %v5996_v6  ;;  %6954 = vst [vmem:[#allocation93_spill] sm:$0xff] %v6012_v33  ;;  %v6014_v10 = vrot.slane %v821_v25, 7  ;;  %v6016_v43 = vrot.slane %v834_v51, 7  ;;  %v1931_v7 = vshrl.u32 %v5978_v18, 16  ;;  %v5308_v44 = vld [vmem:[%s5485_s17 + $0x30] sm:$0xff]   ;;  %4847 = vmatmul.mubr.bf16.gmra.mrb[24].mxu0 %v4413_v62  ;;  %4991 = vmatpush3.bf16.msra.mxu1 %v5302_v30  ;;  %v4414_v56 = vcombine.low %v6005_v0, %v6012_v33 }
 0x156   : > { %v6022_v11 = vrot.slane %v1905_v21, 7  ;;  %v1944_v3 = vshrl.u32 %v5996_v6, 16  ;;  %v6027_v25 = vld [vmem:[#allocation2 + $0xd0] sm:$0xf]  ;;  %v6958_v51 = vshll.u32 %v5861_v24, 16  ;;  %v847_v21 = vshrl.u32 %v6005_v0, 16  ;;  %4992 = vmatprep.subr.bf16.mxu1 %v5305_v45  ;;  %4866 = vmatprep.subr.bf16.mxu0 %v5308_v44 }
 0x157   : > { %6955 = vst [vmem:[#allocation94_spill] sm:$0xff] %v6016_v43  ;;  %6957 = vst [vmem:[#allocation96_spill] sm:$0xff] %v6027_v25  ;;  %v6960_v43 = vshll.u32 %v5848_v19, 16  ;;  %v860_v27 = vshrl.u32 %v6012_v33, 16  ;;  %v6041_v4 = vld [vmem:[#allocation2 + $0xc4] sm:$0xf]  ;;  %4850 = vmatprep.mubr.bf16.mxu0 %v4414_v56 }
 0x158   : > { %6956 = vst [vmem:[#allocation95_spill] sm:$0xff] %v6022_v11  ;;  %v6032_v9 = vor.u32 %v6958_v51, %v5906_v35  ;;  %6962 = vst [vmem:[#allocation99_spill] sm:$0xff] %v6041_v4  ;;  %v6043_v26 = vld [vmem:[#allocation2 + $0xb8] sm:$0xf]  ;;  %v6045_v24 = vrot.slane %v1918_v12, 7  ;;  %v4493_v35 = vcombine.low %v5978_v18, %v5996_v6  ;;  %v873_v19 = vshrl.u32 %v6041_v4, 16  ;;  %4867 = vmatpush3.bf16.msra.mxu0 %v5308_v44 }
 0x159   : > { %v6037_v62 = vor.u32 %v6960_v43, %v5908_v23  ;;  %v6052_v23 = vld [vmem:[#allocation2 + $0xc4] sm:$0xf]  ;;  %v5310_v30 = vld [vmem:[%s5485_s17 + $0x170] sm:$0xff]   ;;  %v6055_v43 = vrot.slane %v1931_v7, 7  ;;  %v5312_v18 = vld [vmem:[%s5485_s17 + $0x38] sm:$0xff]   ;;  %v6061_v5 = vrot.slane %v1944_v3, 7  ;;  %4993 = vmatpush3.bf16.msra.mxu1 %v5305_v45 }
 0x15a   : > { %6959 = vst [vmem:[#allocation97_spill] sm:$0xff] %v6032_v9  ;;  %6963 = vst [vmem:[#allocation100_spill] sm:$0xff] %v6045_v24  ;;  %v886_v24 = vshrl.u32 %v6027_v25, 16  ;;  %4975 = vmatmul.mubr.bf16.gmra.mrb[8].mxu1 %v4493_v35  ;;  %v1957_v7 = vshrl.u32 %v6043_v26, 16  ;;  %v5313_v9 = vld [vmem:[%s5485_s17 + $0x178] sm:$0xff]   ;;  %v6068_v51 = vrot.slane %v847_v21, 7  ;;  %4994 = vmatprep.subr.bf16.mxu1 %v5310_v30 }
 0x15b   : > { %6961 = vst [vmem:[#allocation98_spill] sm:$0xff] %v6037_v62  ;;  %6964 = vst [vmem:[#allocation101_spill] sm:$0xff] %v6055_v43  ;;  %v4415_v62 = vcombine.low %v6041_v4, %v6027_v25  ;;  %v2437_v43 = vld [vmem:[#allocation2 + $0x10] sm:$0xf]  ;;  %v6070_v12 = vrot.slane %v860_v27, 7  ;;  %v1970_v3 = vshrl.u32 %v6052_v23, 16  ;;  %4868 = vmatprep.subr.bf16.mxu0 %v5312_v18 }
 0x15c   : > { %6965 = vst [vmem:[#allocation102_spill] sm:$0xff] %v6061_v5  ;;  %v6074_v35 = vld [vmem:[#allocation2 + $0xd0] sm:$0xf]  ;;  %v6076_v56 = vrot.slane %v873_v19, 7  ;;  %v4494_v5 = vcombine.low %v6043_v26, %v6052_v23  ;;  %v6967_v45 = vshll.u32 %v5818_v38, 16  ;;  %v6086_v4 = vrot.slane %v886_v24, 7  ;;  %4869 = vmatpush3.bf16.msra.mxu0 %v5312_v18 }
 0x15d   : > { %v6084_v21 = vld [vmem:[#allocation2 + $0xdc] sm:$0xf]  ;;  %v6088_v33 = vrot.slane %v1957_v7, 7  ;;  %v5314_v25 = vld [vmem:[%s5485_s17 + $0x80] sm:$0xff]   ;;  %4851 = vmatmul.mubr.bf16.gmra.mrb[28].mxu0 %v4415_v62  ;;  %v2470_v44 = vshrl.u32 %v2437_v43, 16  ;;  %v6968_v24 = vsel %vm5686_vm4, %v5585_v13, %v5672_v34  ;;  %4995 = vmatpush3.bf16.msra.mxu1 %v5310_v30  ;;  %v6972_v18 = vshll.u32 %v5883_v8, 16 }
 0x15e   : > { %6966 = vst [vmem:[#allocation103_spill] sm:$0xff] %v6076_v56  ;;  %v709_v27 = vor.u32 %v6967_v45, %v5873_v42  ;;  %v2439_v6 = vld [vmem:[#allocation2 + $0x1c] sm:$0xf]  ;;  %v6093_v56 = vrot.slane %v1970_v3, 7  ;;  %4978 = vmatprep.mubr.bf16.mxu1 %v4494_v5  ;;  %v4495_v62 = vcombine.low %v6074_v35, %v6084_v21  ;;  %v2473_v3 = vshll.u32 %v2437_v43, 16  ;;  %4996 = vmatprep.subr.bf16.mxu1 %v5313_v9  ;;  %v6113_v34 = vld [vmem:[%s5485_s17 + $0x180] sm:$0xff]  }
 0x15f   : > { %v2484_v5 = vshrl.u32 %v2439_v6, 16  ;;  %v2441_v45 = vld [vmem:[#allocation2 + $0x28] sm:$0xf]  ;;  %v2472_v11 = vrot.slane %v2470_v44, 4  ;;  %v2487_v19 = vshll.u32 %v2439_v6, 16  ;;  %v6970_v42 = vshll.u32 %v5806_v58, 16  ;;  %4886 = vmatprep.subr.bf16.mxu0 %v5314_v25 }
 0x160   : > { %v710_v38 = vsel %vm5686_vm4, %v5588_v17, %v709_v27  ;;  %v6969_v17 = vshll.u32 %v5834_v32, 16  ;;  %v6971_v43 = vshll.u32 %v5875_v41, 16  ;;  %v761_v44 = vor.u32 %v6972_v18, %v5937_v2 }
 0x161   : > { %v4424_v7 = vcombine.low %v6968_v24, %v710_v38  ;;  %v735_v13 = vor.u32 %v6970_v42, %v5855_v31  ;;  %v2475_v38 = vrot.slane %v2473_v3, 5  ;;  %v2486_v30 = vrot.slane %v2484_v5, 4  ;;  %v2445_v24 = vld [vmem:[#allocation2 + $0x40] sm:$0xf]  ;;  %4997 = vmatpush3.bf16.msra.mxu1 %v5313_v9  ;;  %v5316_v3 = vld [vmem:[%s5485_s17 + $0x88] sm:$0xff]  }
 0x162   : > { %v722_v27 = vor.u32 %v6969_v17, %v5885_v59  ;;  %v748_v6 = vor.u32 %v6971_v43, %v5926_v63  ;;  %4979 = vmatmul.mubr.bf16.gmra.mrb[12].mxu1 %v4495_v62  ;;  %v2489_v32 = vrot.slane %v2487_v19, 5  ;;  %v2443_v59 = vld [vmem:[#allocation2 + $0x34] sm:$0xf]  ;;  %v2498_v42 = vshrl.u32 %v2441_v45, 16  ;;  %5014 = vmatprep.subr.bf16.mxu1 %v6113_v34 }
 0x163   : > { %4870 = vmatprep.mubr.bf16.mxu0 %v4424_v7  ;;  %v736_v31 = vsel %vm5686_vm4, %v5597_v49, %v735_v13  ;;  %v2476_v41 = vor.u32 %v2475_v38, %v2472_v11  ;;  %v762_v2 = vsel %vm5686_vm4, %v5603_v53, %v761_v44  ;;  %v2501_v62 = vshll.u32 %v2441_v45, 16 }
 0x164   : > { %v723_v58 = vsel %vm5686_vm4, %v5595_v48, %v722_v27  ;;  %v749_v8 = vsel %vm5686_vm4, %v5599_v50, %v748_v6  ;;  %v2447_v48 = vld [vmem:[#allocation2 + $0x4c] sm:$0xf]  ;;  %v2490_v19 = vor.u32 %v2489_v32, %v2486_v30  ;;  %v2500_v49 = vrot.slane %v2498_v42, 4 }
 0x165   : > { %v4425_v63 = vcombine.low %v723_v58, %v736_v31  ;;  %v4426_v7 = vcombine.low %v749_v8, %v762_v2  ;;  %v2477_v5 = vrot.slane %v2476_v41, 4  ;;  %v2512_v11 = vshrl.u32 %v2443_v59, 16  ;;  %v5318_v58 = vld [vmem:[%s5485_s17 + $0x90] sm:$0xff]   ;;  %v2449_v31 = vld [vmem:[#allocation2 + $0x58] sm:$0xf] }
 0x166   : > { %v2515_v9 = vshll.u32 %v2443_v59, 16  ;;  %v2526_v17 = vshrl.u32 %v2445_v24, 16  ;;  %v2491_v27 = vrot.slane %v2490_v19, 4  ;;  %v2503_v50 = vrot.slane %v2501_v62, 5  ;;  %v2453_v62 = vld [vmem:[#allocation2 + $0x88] sm:$0xf] }
 0x167   : > { %4871 = vmatmul.mubr.bf16.vlgmr.msra.gmra.mrb[16].mxu0 %v4425_v63  ;;  %v2529_v13 = vshll.u32 %v2445_v24, 16  ;;  %v2540_v38 = vshrl.u32 %v2447_v48, 16  ;;  %v2482_v53 = vsel %vm5736_vm5, %v2477_v5, %v5593_v47  ;;  %v2514_v30 = vrot.slane %v2512_v11, 4 }
 0x168   : > { %4874 = vmatprep.mubr.bf16.mxu0 %v4426_v7  ;;  %4887 = vmatpush3.bf16.msra.mxu0 %v5314_v25  ;;  %v2517_v43 = vrot.slane %v2515_v9, 5  ;;  %v2528_v45 = vrot.slane %v2526_v17, 4  ;;  %v2496_v6 = vsel %vm5736_vm5, %v2491_v27, %v5601_v52  ;;  %v2504_v18 = vor.u32 %v2503_v50, %v2500_v49  ;;  %v5317_v17 = vld [vmem:[%s5485_s17 + $0x188] sm:$0xff]  }
 0x169   : > { %v2531_v44 = vrot.slane %v2529_v13, 5  ;;  %v2542_v32 = vrot.slane %v2540_v38, 4  ;;  %4888 = vmatprep.subr.bf16.mxu0 %v5316_v3  ;;  %v4504_v59 = vcombine.low %v2482_v53, %v2496_v6  ;;  %v2543_v24 = vshll.u32 %v2447_v48, 16  ;;  %v5320_v13 = vld [vmem:[%s5485_s17 + $0x98] sm:$0xff]  }
 0x16a   : > { %v2518_v42 = vor.u32 %v2517_v43, %v2514_v30  ;;  %v6973_v47 = vshll.u32 %v5903_v1, 16  ;;  %v2505_v41 = vrot.slane %v2504_v18, 4  ;;  %v6974_v8 = vshll.u32 %v5895_v40, 16 }
 0x16b   : > { %v2532_v63 = vor.u32 %v2531_v44, %v2528_v45  ;;  %v6975_v52 = vshll.u32 %v5951_v46, 16  ;;  %4998 = vmatprep.mubr.bf16.mxu1 %v4504_v59  ;;  %v2545_v49 = vrot.slane %v2543_v24, 5  ;;  %v2557_v50 = vshll.u32 %v2449_v31, 16 }
 0x16c   : > { %v774_v25 = vor.u32 %v6973_v47, %v5955_v61  ;;  %v787_v2 = vor.u32 %v6974_v8, %v5964_v20  ;;  %v2519_v7 = vrot.slane %v2518_v42, 4  ;;  %4889 = vmatpush3.bf16.msra.mxu0 %v5316_v3  ;;  %v2554_v61 = vshrl.u32 %v2449_v31, 16  ;;  %v5319_v31 = vld [vmem:[%s5485_s17 + $0x190] sm:$0xff]   ;;  %v5322_v47 = vld [vmem:[%s5485_s17 + $0xa0] sm:$0xff]  }
 0x16d   : > { %v813_v19 = vor.u32 %v6975_v52, %v5998_v22  ;;  %v2510_v1 = vsel %vm5736_vm5, %v2505_v41, %v5605_v54  ;;  %v2533_v40 = vrot.slane %v2532_v63, 4  ;;  %4890 = vmatprep.subr.bf16.mxu0 %v5318_v58  ;;  %v2451_v22 = vld [vmem:[#allocation2 + $0x64] sm:$0xf]  ;;  %v2546_v3 = vor.u32 %v2545_v49, %v2542_v32  ;;  %v6978_v8 = vld [vmem:[#allocation94_spill] sm:$0xff] }
 0x16e   : > { %v775_v48 = vsel %vm5686_vm4, %v5619_v16, %v774_v25  ;;  %v788_v20 = vsel %vm5686_vm4, %v5609_v60, %v787_v2  ;;  %v2524_v16 = vsel %vm5736_vm5, %v2519_v7, %v5607_v55  ;;  %v6976_v54 = vsel %vm5686_vm4, %v5625_v36, %v5716_v28  ;;  %v2455_v60 = vld [vmem:[#allocation2 + $0x94] sm:$0xf] }
 0x16f   : > { %v814_v46 = vsel %vm5686_vm4, %v5627_v37, %v813_v19  ;;  %v4427_v5 = vcombine.low %v775_v48, %v788_v20  ;;  %v4505_v9 = vcombine.low %v2510_v1, %v2524_v16  ;;  %v2538_v37 = vsel %vm5736_vm5, %v2533_v40, %v5615_v14  ;;  %v6982_v48 = vld [vmem:[#allocation93_spill] sm:$0xff]  ;;  %v2457_v40 = vld [vmem:[#allocation2 + $0xa0] sm:$0xf]  ;;  %v5321_v16 = vld [vmem:[%s5485_s17 + $0x198] sm:$0xff]  }
 0x170   : > { %v4428_v11 = vcombine.low %v6976_v54, %v814_v46  ;;  %v2556_v27 = vrot.slane %v2554_v61, 4  ;;  %v2547_v38 = vrot.slane %v2546_v3, 4  ;;  %v2568_v55 = vshrl.u32 %v2451_v22, 16  ;;  %4891 = vmatpush3.bf16.msra.mxu0 %v5318_v58  ;;  %v6984_v20 = vld [vmem:[#allocation13_spill] sm:$0xff] }
 0x171   : > { %4875 = vmatmul.mubr.bf16.gmra.mrb[20].mxu0 %v4427_v5  ;;  %v2571_v53 = vshll.u32 %v2451_v22, 16  ;;  %v2582_v30 = vshrl.u32 %v2453_v62, 16  ;;  %4999 = vmatmul.mubr.bf16.vlgmr.msra.gmra.mrb[0].mxu1 %v4505_v9  ;;  %v2559_v36 = vrot.slane %v2557_v50, 5  ;;  %v2585_v28 = vshll.u32 %v2453_v62, 16  ;;  %v6985_v22 = vld [vmem:[#allocation10_spill] sm:$0xff] }
 0x172   : > { %4878 = vmatprep.mubr.bf16.mxu0 %v4428_v11  ;;  %v2596_v43 = vshrl.u32 %v2455_v60, 16  ;;  %v2599_v45 = vshll.u32 %v2455_v60, 16  ;;  %5015 = vmatpush3.bf16.msra.mxu1 %v6113_v34  ;;  %v2552_v14 = vsel %vm5736_vm5, %v2547_v38, %v5617_v15  ;;  %v2570_v6 = vrot.slane %v2568_v55, 4  ;;  %v6979_v15 = vld [vmem:[#allocation84_spill] sm:$0xff]  ;;  %v6987_v5 = vld [vmem:[#allocation14_spill] sm:$0xff]  ;;  %v6988_v60 = vld [vmem:[#allocation9_spill] sm:$0xff] }
 0x173   : > { %v2573_v18 = vrot.slane %v2571_v53, 5  ;;  %v2584_v44 = vrot.slane %v2582_v30, 4  ;;  %v4506_v32 = vcombine.low %v2538_v37, %v2552_v14  ;;  %5016 = vmatprep.subr.bf16.mxu1 %v5317_v17  ;;  %v2560_v59 = vor.u32 %v2559_v36, %v2556_v27  ;;  %4892 = vmatprep.subr.bf16.mxu0 %v5320_v13  ;;  %v2459_v11 = vld [vmem:[#allocation2 + $0xac] sm:$0xf]  ;;  %v6990_v53 = vld [vmem:[#allocation11_spill] sm:$0xff] }
 0x174   : > { %v2587_v42 = vrot.slane %v2585_v28, 5  ;;  %v2598_v24 = vrot.slane %v2596_v43, 4  ;;  %v2601_v41 = vrot.slane %v2599_v45, 5  ;;  %v6977_v34 = vshll.u32 %v5969_v29, 16  ;;  %4893 = vmatpush3.bf16.msra.mxu0 %v5320_v13  ;;  %v2461_v13 = vld [vmem:[#allocation2 + $0xb8] sm:$0xf] }
 0x175   : > { %v2574_v25 = vor.u32 %v2573_v18, %v2570_v6  ;;  %v6980_v58 = vshll.u32 %v6979_v15, 16  ;;  %5002 = vmatprep.mubr.bf16.mxu1 %v4506_v32  ;;  %v2561_v52 = vrot.slane %v2560_v59, 4  ;;  %v6981_v7 = vshll.u32 %v6005_v0, 16  ;;  %v6986_v0 = vld [vmem:[#allocation8_spill] sm:$0xff]  ;;  %4894 = vmatprep.subr.bf16.mxu0 %v5322_v47  ;;  %v5324_v38 = vld [vmem:[%s5485_s17 + $0xa8] sm:$0xff]  }
 0x176   : > { %v826_v63 = vor.u32 %v6977_v34, %v6014_v10  ;;  %v2588_v19 = vor.u32 %v2587_v42, %v2584_v44  ;;  %v6983_v61 = vshll.u32 %v6982_v48, 16  ;;  %5017 = vmatpush3.bf16.msra.mxu1 %v5317_v17  ;;  %v2602_v10 = vor.u32 %v2601_v41, %v2598_v24  ;;  %v6989_v17 = vld [vmem:[#allocation17_spill] sm:$0xff]  ;;  %v2463_v43 = vld [vmem:[#allocation2 + $0xc4] sm:$0xf]  ;;  %v5326_v41 = vld [vmem:[%s5485_s17 + $0xb0] sm:$0xff]  }
 0x177   : > { %v839_v2 = vor.u32 %v6980_v58, %v6978_v8  ;;  %v852_v49 = vor.u32 %v6981_v7, %v6068_v51  ;;  %v2575_v29 = vrot.slane %v2574_v25, 4  ;;  %5018 = vmatprep.subr.bf16.mxu1 %v5319_v31  ;;  %v2566_v51 = vsel %vm5736_vm5, %v2561_v52, %v6986_v0  ;;  %v6991_v45 = vld [vmem:[#allocation12_spill] sm:$0xff]  ;;  %v1297_v15 = vld [vmem:[#allocation2 + $0x10] sm:$0xf]  ;;  %v6992_v52 = vld [vmem:[#allocation103_spill] sm:$0xff] }
 0x178   : > { %v865_v1 = vor.u32 %v6983_v61, %v6070_v12  ;;  %v827_v46 = vsel %vm5686_vm4, %v6984_v20, %v826_v63  ;;  %v2589_v12 = vrot.slane %v2588_v19, 4  ;;  %v2603_v37 = vrot.slane %v2602_v10, 4  ;;  %4895 = vmatpush3.bf16.msra.mxu0 %v5322_v47  ;;  %v5323_v59 = vld [vmem:[%s5485_s17 + $0x1a0] sm:$0xff]   ;;  %v6993_v19 = vld [vmem:[#allocation99_spill] sm:$0xff] }
 0x179   : > { %v840_v62 = vsel %vm5686_vm4, %v6985_v22, %v839_v2  ;;  %v853_v54 = vsel %vm5686_vm4, %v6987_v5, %v852_v49  ;;  %v2580_v9 = vsel %vm5736_vm5, %v2575_v29, %v6988_v60  ;;  %v2610_v50 = vshrl.u32 %v2457_v40, 16  ;;  %4896 = vmatprep.subr.bf16.mxu0 %v5324_v38  ;;  %v5325_v22 = vld [vmem:[%s5485_s17 + $0x1a8] sm:$0xff]   ;;  %v6998_v5 = vld [vmem:[#allocation18_spill] sm:$0xff]  ;;  %v2467_v60 = vld [vmem:[#allocation2 + $0xdc] sm:$0xf] }
 0x17a   : > { %v4429_v3 = vcombine.low %v827_v46, %v840_v62  ;;  %v866_v27 = vsel %vm5686_vm4, %v6989_v17, %v865_v1  ;;  %v4507_v55 = vcombine.low %v2566_v51, %v2580_v9  ;;  %v2594_v30 = vsel %vm5736_vm5, %v2589_v12, %v6990_v53  ;;  %5019 = vmatpush3.bf16.msra.mxu1 %v5319_v31  ;;  %v6997_v62 = vld [vmem:[#allocation23_spill] sm:$0xff]  ;;  %v2465_v12 = vld [vmem:[#allocation2 + $0xd0] sm:$0xf] }
 0x17b   : > { %v4430_v36 = vcombine.low %v853_v54, %v866_v27  ;;  %v2613_v28 = vshll.u32 %v2457_v40, 16  ;;  %v2608_v14 = vsel %vm5736_vm5, %v2603_v37, %v6991_v45  ;;  %v2612_v6 = vrot.slane %v2610_v50, 4  ;;  %5020 = vmatprep.subr.bf16.mxu1 %v5321_v16  ;;  %v6995_v40 = vld [vmem:[#allocation96_spill] sm:$0xff]  ;;  %v6999_v9 = vld [vmem:[#allocation15_spill] sm:$0xff] }
 0x17c   : > { %4879 = vmatmul.mubr.bf16.gmra.mrb[24].mxu0 %v4429_v3  ;;  %v2624_v18 = vshrl.u32 %v2459_v11, 16  ;;  %v2627_v44 = vshll.u32 %v2459_v11, 16  ;;  %5003 = vmatmul.mubr.bf16.gmra.mrb[4].mxu1 %v4507_v55  ;;  %v4508_v32 = vcombine.low %v2594_v30, %v2608_v14  ;;  %v2638_v24 = vshrl.u32 %v2461_v13, 16  ;;  %v5327_v14 = vld [vmem:[%s5485_s17 + $0x1b0] sm:$0xff]  }
 0x17d   : > { %v2615_v42 = vrot.slane %v2613_v28, 5  ;;  %v2641_v25 = vshll.u32 %v2461_v13, 16  ;;  %4882 = vmatprep.mubr.bf16.mxu0 %v4430_v36  ;;  %v2652_v31 = vshrl.u32 %v2463_v43, 16  ;;  %v2655_v8 = vshll.u32 %v2463_v43, 16  ;;  %4897 = vmatpush3.bf16.msra.mxu0 %v5324_v38  ;;  %v7000_v13 = vld [vmem:[#allocation16_spill] sm:$0xff]  ;;  %v7001_v43 = vld [vmem:[#allocation21_spill] sm:$0xff] }
 0x17e   : > { %v2626_v34 = vrot.slane %v2624_v18, 4  ;;  %v2629_v63 = vrot.slane %v2627_v44, 5  ;;  %5006 = vmatprep.mubr.bf16.mxu1 %v4508_v32  ;;  %v2640_v58 = vrot.slane %v2638_v24, 4  ;;  %v6994_v7 = vshll.u32 %v6993_v19, 16  ;;  %5021 = vmatpush3.bf16.msra.mxu1 %v5321_v16  ;;  %v6242_v36 = vld [vmem:[#allocation2 + $0x1c] sm:$0xf] }
 0x17f   : > { %v2616_v47 = vor.u32 %v2615_v42, %v2612_v6  ;;  %v2643_v2 = vrot.slane %v2641_v25, 5  ;;  %v2654_v61 = vrot.slane %v2652_v31, 4  ;;  %v2657_v1 = vrot.slane %v2655_v8, 5  ;;  %5022 = vmatprep.subr.bf16.mxu1 %v5323_v59  ;;  %4898 = vmatprep.subr.bf16.mxu0 %v5326_v41  ;;  %v6248_v44 = vld [vmem:[#allocation2 + $0x28] sm:$0xf]  ;;  %v7002_v32 = vld [vmem:[#allocation22_spill] sm:$0xff] }
 0x180   : > { %v878_v49 = vor.u32 %v6994_v7, %v6992_v52  ;;  %v2630_v48 = vor.u32 %v2629_v63, %v2626_v34  ;;  %v6996_v29 = vshll.u32 %v6995_v40, 16  ;;  %v1345_v51 = vshrl.u32 %v1297_v15, 16  ;;  %v6254_v34 = vld [vmem:[%s5485_s17 + $0xc0] sm:$0xff]   ;;  %v7003_v40 = vld [vmem:[#allocation19_spill] sm:$0xff] }
 0x181   : > { %v2617_v20 = vrot.slane %v2616_v47, 4  ;;  %v2644_v46 = vor.u32 %v2643_v2, %v2640_v58  ;;  %v2658_v3 = vor.u32 %v2657_v1, %v2654_v61  ;;  %v1348_v11 = vshll.u32 %v1297_v15, 16  ;;  %4899 = vmatpush3.bf16.msra.mxu0 %v5326_v41  ;;  %v1299_v41 = vld [vmem:[#allocation2 + $0x1c] sm:$0xf]  ;;  %v1301_v61 = vld [vmem:[#allocation2 + $0x28] sm:$0xf] }
 0x182   : > { %v891_v10 = vor.u32 %v6996_v29, %v6086_v4  ;;  %v879_v0 = vsel %vm5686_vm4, %v6997_v62, %v878_v49  ;;  %v2631_v16 = vrot.slane %v2630_v48, 4  ;;  %v5328_v4 = vld [vmem:[%s5485_s17 + $0xb8] sm:$0xff]   ;;  %v1347_v50 = vrot.slane %v1345_v51, 4  ;;  %5023 = vmatpush3.bf16.msra.mxu1 %v5323_v59  ;;  %v7004_v62 = vld [vmem:[#allocation6_spill] sm:$0xff] }
 0x183   : > { %v2622_v37 = vsel %vm5736_vm5, %v2617_v20, %v6999_v9  ;;  %v2645_v17 = vrot.slane %v2644_v46, 4  ;;  %v2659_v55 = vrot.slane %v2658_v3, 4  ;;  %v1350_v53 = vrot.slane %v1348_v11, 5  ;;  %5024 = vmatprep.subr.bf16.mxu1 %v5325_v22  ;;  %4900 = vmatprep.subr.bf16.mxu0 %v5328_v4  ;;  %v5329_v48 = vld [vmem:[%s5485_s17 + $0x1b8] sm:$0xff]   ;;  %v7007_v9 = vld [vmem:[#allocation24_spill] sm:$0xff] }
 0x184   : > { %v892_v54 = vsel %vm5686_vm4, %v6998_v5, %v891_v10  ;;  %v2636_v38 = vsel %vm5736_vm5, %v2631_v16, %v7000_v13  ;;  %v2666_v30 = vshrl.u32 %v2465_v12, 16  ;;  %v2669_v6 = vshll.u32 %v2465_v12, 16  ;;  %v6277_v13 = vld [vmem:[%s5485_s17 + $0x1c0] sm:$0xff]  }
 0x185   : > { %v4431_v27 = vcombine.low %v879_v0, %v892_v54  ;;  %v4509_v28 = vcombine.low %v2622_v37, %v2636_v38  ;;  %v2650_v45 = vsel %vm5736_vm5, %v2645_v17, %v7001_v43  ;;  %v2680_v18 = vshrl.u32 %v2467_v60, 16  ;;  %4901 = vmatpush3.bf16.msra.mxu0 %v5328_v4  ;;  %v7005_v0 = vld [vmem:[#allocation7_spill] sm:$0xff]  ;;  %v7008_v17 = vld [vmem:[#allocation20_spill] sm:$0xff] }
 0x186   : > { %v2664_v59 = vsel %vm5736_vm5, %v2659_v55, %v7002_v32  ;;  %v1351_v42 = vor.u32 %v1350_v53, %v1347_v50  ;;  %v2668_v24 = vrot.slane %v2666_v30, 4  ;;  %v2683_v25 = vshll.u32 %v2467_v60, 16  ;;  %5025 = vmatpush3.bf16.msra.mxu1 %v5325_v22  ;;  %4918 = vmatprep.subr.bf16.mxu0 %v6254_v34  ;;  %v1303_v22 = vld [vmem:[#allocation2 + $0x34] sm:$0xf]  ;;  %v1305_v38 = vld [vmem:[#allocation2 + $0x40] sm:$0xf] }
 0x187   : > { %4883 = vmatmul.mubr.bf16.gmra.mrb[28].mxu0 %v4431_v27  ;;  %5007 = vmatmul.mubr.bf16.gmra.mrb[8].mxu1 %v4509_v28  ;;  %v4510_v63 = vcombine.low %v2650_v45, %v2664_v59  ;;  %v2671_v31 = vrot.slane %v2669_v6, 5  ;;  %v2682_v8 = vrot.slane %v2680_v18, 4  ;;  %v2941_v15 = vshrl.u32 %v6242_v36, 16  ;;  %v7009_v53 = vld [vmem:[#allocation26_spill] sm:$0xff]  ;;  %v7010_v28 = vld [vmem:[#allocation25_spill] sm:$0xff] }
 0x188   : > { %v1352_v47 = vrot.slane %v1351_v42, 4  ;;  %v2685_v58 = vrot.slane %v2683_v25, 5  ;;  %v2944_v2 = vshll.u32 %v6242_v36, 16  ;;  %v2954_v52 = vshrl.u32 %v6248_v44, 16  ;;  %5026 = vmatprep.subr.bf16.mxu1 %v5327_v14  ;;  %v6285_v6 = vld [vmem:[#allocation2 + $0x34] sm:$0xf] }
 0x189   : > { %5010 = vmatprep.mubr.bf16.mxu1 %v4510_v63  ;;  %v2672_v19 = vor.u32 %v2671_v31, %v2668_v24  ;;  %v2943_v7 = vrot.slane %v2941_v15, 7  ;;  %v2957_v49 = vshll.u32 %v6248_v44, 16  ;;  %v1359_v1 = vshrl.u32 %v1299_v41, 16  ;;  %v6287_v18 = vld [vmem:[#allocation2 + $0x40] sm:$0xf] }
 0x18a   : > { %v1357_v29 = vsel %vm5736_vm5, %v1352_v47, %v7003_v40  ;;  %v2686_v10 = vor.u32 %v2685_v58, %v2682_v8  ;;  %v2956_v20 = vrot.slane %v2954_v52, 7  ;;  %v1362_v46 = vshll.u32 %v1299_v41, 16  ;;  %5027 = vmatpush3.bf16.msra.mxu1 %v5327_v14  ;;  %v7011_v52 = vld [vmem:[#allocation27_spill] sm:$0xff] }
 0x18b   : > { %v7006_v51 = vsel %vm5736_vm5, %v7004_v62, %v7005_v0  ;;  %v2673_v16 = vrot.slane %v2672_v19, 4  ;;  %v2946_v3 = vor.u32 %v2944_v2, %v2943_v7  ;;  %v1361_v5 = vrot.slane %v1359_v1, 4  ;;  %5028 = vmatprep.subr.bf16.mxu1 %v5329_v48  ;;  %v6293_v2 = vld [vmem:[#allocation2 + $0x4c] sm:$0xf]  ;;  %v7012_v0 = vld [vmem:[#allocation28_spill] sm:$0xff] }
 0x18c   : > { %v4440_v12 = vcombine.low %v7006_v51, %v1357_v29  ;;  %v2687_v54 = vrot.slane %v2686_v10, 4  ;;  %v2959_v11 = vor.u32 %v2957_v49, %v2956_v20  ;;  %v1364_v60 = vrot.slane %v1362_v46, 5 }
 0x18d   : > { %v1373_v4 = vshrl.u32 %v1301_v61, 16  ;;  %v2678_v37 = vsel %vm5736_vm5, %v2673_v16, %v7007_v9  ;;  %v2947_v27 = vsel %vm5686_vm4, %v7008_v17, %v2946_v3  ;;  %v1376_v50 = vshll.u32 %v1301_v61, 16  ;;  %v6298_v61 = vld [vmem:[#allocation2 + $0x58] sm:$0xf]  ;;  %v1307_v9 = vld [vmem:[#allocation2 + $0x4c] sm:$0xf] }
 0x18e   : > { %4902 = vmatprep.mubr.bf16.mxu0 %v4440_v12  ;;  %v1387_v55 = vshrl.u32 %v1303_v22, 16  ;;  %v2692_v30 = vsel %vm5736_vm5, %v2687_v54, %v7009_v53  ;;  %v2960_v43 = vsel %vm5686_vm4, %v7010_v28, %v2959_v11  ;;  %v1365_v45 = vor.u32 %v1364_v60, %v1361_v5  ;;  %5029 = vmatpush3.bf16.msra.mxu1 %v5329_v48  ;;  %v1309_v53 = vld [vmem:[#allocation2 + $0x58] sm:$0xf]  ;;  %v7015_v28 = vld [vmem:[#allocation30_spill] sm:$0xff] }
 0x18f   : > { %v1375_v14 = vrot.slane %v1373_v4, 4  ;;  %v4511_v32 = vcombine.low %v2678_v37, %v2692_v30  ;;  %v4536_v59 = vcombine.low %v2947_v27, %v2960_v43  ;;  %v1378_v42 = vrot.slane %v1376_v50, 5  ;;  %5046 = vmatprep.subr.bf16.mxu1 %v6277_v13  ;;  %v5332_v4 = vld [vmem:[%s5485_s17 + $0xc8] sm:$0xff]   ;;  %v7014_v27 = vld [vmem:[#allocation32_spill] sm:$0xff] }
 0x190   : > { %v1389_v24 = vrot.slane %v1387_v55, 4  ;;  %v1366_v25 = vrot.slane %v1365_v45, 4  ;;  %v1390_v41 = vshll.u32 %v1303_v22, 16  ;;  %v1401_v63 = vshrl.u32 %v1305_v38, 16  ;;  %v7013_v37 = vld [vmem:[#allocation29_spill] sm:$0xff]  ;;  %v7016_v45 = vld [vmem:[#allocation31_spill] sm:$0xff] }
 0x191   : > { %v1404_v31 = vshll.u32 %v1305_v38, 16  ;;  %5011 = vmatmul.mubr.bf16.gmra.mrb[12].mxu1 %v4511_v32  ;;  %v1379_v8 = vor.u32 %v1378_v42, %v1375_v14  ;;  %v2967_v15 = vshrl.u32 %v6285_v6, 16  ;;  %v2970_v47 = vshll.u32 %v6285_v6, 16  ;;  %v1313_v30 = vld [vmem:[#allocation2 + $0x88] sm:$0xf] }
 0x192   : > { %v2980_v58 = vshrl.u32 %v6287_v18, 16  ;;  %5030 = vmatprep.mubr.bf16.mxu1 %v4536_v59  ;;  %v1371_v19 = vsel %vm5736_vm5, %v1366_v25, %v7011_v52  ;;  %v1392_v7 = vrot.slane %v1390_v41, 5  ;;  %v1403_v49 = vrot.slane %v1401_v63, 4  ;;  %v5333_v42 = vld [vmem:[%s5485_s17 + $0x1c8] sm:$0xff]   ;;  %v5334_v52 = vld [vmem:[%s5485_s17 + $0xd0] sm:$0xff]  }
 0x193   : > { %v1406_v48 = vrot.slane %v1404_v31, 5  ;;  %v1380_v1 = vrot.slane %v1379_v8, 4  ;;  %v2969_v40 = vrot.slane %v2967_v15, 7  ;;  %v2983_v10 = vshll.u32 %v6287_v18, 16  ;;  %v6323_v31 = vld [vmem:[#allocation2 + $0x64] sm:$0xf] }
 0x194   : > { %v2982_v29 = vrot.slane %v2980_v58, 7  ;;  %v1393_v20 = vor.u32 %v1392_v7, %v1389_v24  ;;  %v2993_v22 = vshrl.u32 %v6293_v2, 16  ;;  %v2996_v62 = vshll.u32 %v6293_v2, 16  ;;  %v7017_v8 = vld [vmem:[#allocation34_spill] sm:$0xff] }
 0x195   : > { %v1407_v46 = vor.u32 %v1406_v48, %v1403_v49  ;;  %v1385_v51 = vsel %vm5736_vm5, %v1380_v1, %v7012_v0  ;;  %v2972_v12 = vor.u32 %v2970_v47, %v2969_v40  ;;  %v3006_v3 = vshrl.u32 %v6298_v61, 16  ;;  %v6329_v7 = vld [vmem:[#allocation2 + $0x94] sm:$0xf] }
 0x196   : > { %v2985_v16 = vor.u32 %v2983_v10, %v2982_v29  ;;  %v4441_v5 = vcombine.low %v1371_v19, %v1385_v51  ;;  %v1394_v54 = vrot.slane %v1393_v20, 4  ;;  %v2995_v60 = vrot.slane %v2993_v22, 7  ;;  %v6335_v29 = vld [vmem:[#allocation2 + $0xa0] sm:$0xf]  ;;  %v5335_v22 = vld [vmem:[%s5485_s17 + $0x1d0] sm:$0xff]  }
 0x197   : > { %v1408_v11 = vrot.slane %v1407_v46, 4  ;;  %v2973_v17 = vsel %vm5686_vm4, %v7013_v37, %v2972_v12  ;;  %v3008_v38 = vrot.slane %v3006_v3, 7  ;;  %v3009_v55 = vshll.u32 %v6298_v61, 16 }
 0x198   : > { %v2986_v50 = vsel %vm5686_vm4, %v7014_v27, %v2985_v16  ;;  %4903 = vmatmul.mubr.bf16.vlgmr.msra.gmra.mrb[16].mxu0 %v4441_v5  ;;  %v1399_v43 = vsel %vm5736_vm5, %v1394_v54, %v7015_v28  ;;  %v2998_v59 = vor.u32 %v2996_v62, %v2995_v60  ;;  %v1415_v41 = vshrl.u32 %v1307_v9, 16  ;;  %v1315_v16 = vld [vmem:[#allocation2 + $0x94] sm:$0xf]  ;;  %v5336_v60 = vld [vmem:[%s5485_s17 + $0xd8] sm:$0xff]  }
 0x199   : > { %v1413_v14 = vsel %vm5736_vm5, %v1408_v11, %v7016_v45  ;;  %v4537_v32 = vcombine.low %v2973_v17, %v2986_v50  ;;  %4919 = vmatpush3.bf16.msra.mxu0 %v6254_v34  ;;  %v3011_v25 = vor.u32 %v3009_v55, %v3008_v38  ;;  %v1418_v63 = vshll.u32 %v1307_v9, 16  ;;  %v7018_v34 = vld [vmem:[#allocation33_spill] sm:$0xff]  ;;  %v5337_v55 = vld [vmem:[%s5485_s17 + $0x1d8] sm:$0xff]  }
 0x19a   : > { %v4442_v24 = vcombine.low %v1399_v43, %v1413_v14  ;;  %v2999_v15 = vsel %vm5686_vm4, %v7017_v8, %v2998_v59  ;;  %4920 = vmatprep.subr.bf16.mxu0 %v5332_v4  ;;  %v1429_v47 = vshrl.u32 %v1309_v53, 16  ;;  %v1432_v58 = vshll.u32 %v1309_v53, 16  ;;  %v7021_v8 = vld [vmem:[#allocation45_spill] sm:$0xff] }
 0x19b   : > { %5031 = vmatmul.mubr.bf16.vlgmr.msra.gmra.mrb[0].mxu1 %v4537_v32  ;;  %v1457_v19 = vshrl.u32 %v1313_v30, 16  ;;  %v3012_v49 = vsel %vm5686_vm4, %v7018_v34, %v3011_v25  ;;  %v1417_v48 = vrot.slane %v1415_v41, 4  ;;  %v1420_v1 = vrot.slane %v1418_v63, 5  ;;  %v7020_v32 = vld [vmem:[#allocation37_spill] sm:$0xff]  ;;  %v1317_v25 = vld [vmem:[#allocation2 + $0xa0] sm:$0xf] }
 0x19c   : > { %4906 = vmatprep.mubr.bf16.mxu0 %v4442_v24  ;;  %5047 = vmatpush3.bf16.msra.mxu1 %v6277_v13  ;;  %v1460_v40 = vshll.u32 %v1313_v30, 16  ;;  %v4538_v10 = vcombine.low %v2999_v15, %v3012_v49  ;;  %v1431_v20 = vrot.slane %v1429_v47, 4  ;;  %v1434_v46 = vrot.slane %v1432_v58, 5  ;;  %v7019_v30 = vld [vmem:[#allocation36_spill] sm:$0xff]  ;;  %v7022_v47 = vld [vmem:[#allocation38_spill] sm:$0xff]  ;;  %v7023_v49 = vld [vmem:[#allocation41_spill] sm:$0xff] }
 0x19d   : > { %5048 = vmatprep.subr.bf16.mxu1 %v5333_v42  ;;  %v1459_v62 = vrot.slane %v1457_v19, 4  ;;  %4921 = vmatpush3.bf16.msra.mxu0 %v5332_v4  ;;  %v1421_v0 = vor.u32 %v1420_v1, %v1417_v48  ;;  %v3019_v13 = vshrl.u32 %v6323_v31, 16  ;;  %v3022_v12 = vshll.u32 %v6323_v31, 16  ;;  %v1319_v19 = vld [vmem:[#allocation2 + $0xac] sm:$0xf]  ;;  %v7024_v48 = vld [vmem:[#allocation39_spill] sm:$0xff] }
 0x19e   : > { %v1462_v51 = vrot.slane %v1460_v40, 5  ;;  %5034 = vmatprep.mubr.bf16.mxu1 %v4538_v10  ;;  %v1435_v3 = vor.u32 %v1434_v46, %v1431_v20  ;;  %4922 = vmatprep.subr.bf16.mxu0 %v5334_v52  ;;  %v3045_v5 = vshrl.u32 %v6329_v7, 16  ;;  %v3048_v54 = vshll.u32 %v6329_v7, 16  ;;  %v1321_v34 = vld [vmem:[#allocation2 + $0xb8] sm:$0xf]  ;;  %v7026_v10 = vld [vmem:[#allocation40_spill] sm:$0xff] }
 0x19f   : > { %v3058_v11 = vshrl.u32 %v6335_v29, 16  ;;  %v1422_v4 = vrot.slane %v1421_v0, 4  ;;  %v3021_v37 = vrot.slane %v3019_v13, 7  ;;  %v3061_v17 = vshll.u32 %v6335_v29, 16  ;;  %v7027_v20 = vld [vmem:[#allocation52_spill] sm:$0xff]  ;;  %v7029_v0 = vld [vmem:[#allocation46_spill] sm:$0xff] }
 0x1a0   : > { %5049 = vmatpush3.bf16.msra.mxu1 %v5333_v42  ;;  %v1463_v9 = vor.u32 %v1462_v51, %v1459_v62  ;;  %v1436_v27 = vrot.slane %v1435_v3, 4  ;;  %v3047_v50 = vrot.slane %v3045_v5, 7  ;;  %v1471_v53 = vshrl.u32 %v1315_v16, 16  ;;  %v7030_v51 = vld [vmem:[#allocation42_spill] sm:$0xff] }
 0x1a1   : > { %5050 = vmatprep.subr.bf16.mxu1 %v5335_v22  ;;  %v3060_v38 = vrot.slane %v3058_v11, 7  ;;  %v1427_v28 = vsel %vm5736_vm5, %v1422_v4, %v7019_v30  ;;  %4923 = vmatpush3.bf16.msra.mxu0 %v5334_v52  ;;  %v3024_v45 = vor.u32 %v3022_v12, %v3021_v37  ;;  %v1474_v14 = vshll.u32 %v1315_v16, 16  ;;  %v5338_v12 = vld [vmem:[%s5485_s17 + $0xe0] sm:$0xff]   ;;  %v6375_v16 = vld [vmem:[#allocation2 + $0xac] sm:$0xf] }
 0x1a2   : > { %v1464_v43 = vrot.slane %v1463_v9, 4  ;;  %v1441_v59 = vsel %vm5736_vm5, %v1436_v27, %v7020_v32  ;;  %v3050_v42 = vor.u32 %v3048_v54, %v3047_v50  ;;  %4924 = vmatprep.subr.bf16.mxu0 %v5336_v60  ;;  %v1473_v41 = vrot.slane %v1471_v53, 4  ;;  %v5339_v4 = vld [vmem:[%s5485_s17 + $0x1e0] sm:$0xff]   ;;  %v5340_v50 = vld [vmem:[%s5485_s17 + $0xe8] sm:$0xff]  }
 0x1a3   : > { %v3063_v24 = vor.u32 %v3061_v17, %v3060_v38  ;;  %v4443_v63 = vcombine.low %v1427_v28, %v1441_v59  ;;  %v3025_v58 = vsel %vm5686_vm4, %v7022_v47, %v3024_v45  ;;  %v1476_v52 = vrot.slane %v1474_v14, 5  ;;  %v6379_v28 = vld [vmem:[#allocation2 + $0xb8] sm:$0xf] }
 0x1a4   : > { %v1469_v15 = vsel %vm5736_vm5, %v1464_v43, %v7021_v8  ;;  %5051 = vmatpush3.bf16.msra.mxu1 %v5335_v22  ;;  %v7025_v1 = vsel %vm5736_vm5, %v7023_v49, %v7024_v48  ;;  %v7028_v46 = vsel %vm5686_vm4, %v7026_v10, %v7027_v20  ;;  %v3051_v22 = vsel %vm5686_vm4, %v7029_v0, %v3050_v42  ;;  %v6382_v42 = vld [vmem:[#allocation2 + $0xc4] sm:$0xf]  ;;  %v6388_v8 = vld [vmem:[#allocation2 + $0xd0] sm:$0xf] }
 0x1a5   : > { %v4444_v40 = vcombine.low %v7025_v1, %v1469_v15  ;;  %v4539_v62 = vcombine.low %v3025_v58, %v7028_v46  ;;  %v3064_v13 = vsel %vm5686_vm4, %v7030_v51, %v3063_v24  ;;  %5052 = vmatprep.subr.bf16.mxu1 %v5337_v55  ;;  %4907 = vmatmul.mubr.bf16.gmra.mrb[20].mxu0 %v4443_v63  ;;  %v1485_v54 = vshrl.u32 %v1317_v25, 16  ;;  %v7031_v24 = vld [vmem:[#allocation49_spill] sm:$0xff]  ;;  %v1323_v46 = vld [vmem:[#allocation2 + $0xc4] sm:$0xf] }
 0x1a6   : > { %v4540_v3 = vcombine.low %v3051_v22, %v3064_v13  ;;  %v1477_v5 = vor.u32 %v1476_v52, %v1473_v41  ;;  %v1488_v11 = vshll.u32 %v1317_v25, 16  ;;  %v1499_v9 = vshrl.u32 %v1319_v19, 16  ;;  %4925 = vmatpush3.bf16.msra.mxu0 %v5336_v60  ;;  %v5341_v15 = vld [vmem:[%s5485_s17 + $0x1e8] sm:$0xff]   ;;  %v7033_v22 = vld [vmem:[#allocation51_spill] sm:$0xff] }
 0x1a7   : > { %4910 = vmatprep.mubr.bf16.mxu0 %v4444_v40  ;;  %5035 = vmatmul.mubr.bf16.gmra.mrb[4].mxu1 %v4539_v62  ;;  %v1502_v37 = vshll.u32 %v1319_v19, 16  ;;  %v1513_v17 = vshrl.u32 %v1321_v34, 16  ;;  %v1516_v27 = vshll.u32 %v1321_v34, 16  ;;  %v1487_v53 = vrot.slane %v1485_v54, 4  ;;  %v7032_v62 = vld [vmem:[#allocation50_spill] sm:$0xff] }
 0x1a8   : > { %5038 = vmatprep.mubr.bf16.mxu1 %v4540_v3  ;;  %v1478_v38 = vrot.slane %v1477_v5, 4  ;;  %v1490_v30 = vrot.slane %v1488_v11, 5  ;;  %v3071_v43 = vshrl.u32 %v6375_v16, 16  ;;  %5053 = vmatpush3.bf16.msra.mxu1 %v5337_v55  ;;  %v1501_v45 = vrot.slane %v1499_v9, 4  ;;  %v1325_v3 = vld [vmem:[#allocation2 + $0xd0] sm:$0xf] }
 0x1a9   : > { %4926 = vmatprep.subr.bf16.mxu0 %v5338_v12  ;;  %v1504_v14 = vrot.slane %v1502_v37, 5  ;;  %v1515_v32 = vrot.slane %v1513_v17, 4  ;;  %v1518_v59 = vrot.slane %v1516_v27, 5  ;;  %5054 = vmatprep.subr.bf16.mxu1 %v5339_v4  ;;  %v3074_v63 = vshll.u32 %v6375_v16, 16  ;;  %v5342_v5 = vld [vmem:[%s5485_s17 + $0xf0] sm:$0xff]   ;;  %v7034_v11 = vld [vmem:[#allocation53_spill] sm:$0xff] }
 0x1aa   : > { %v1483_v60 = vsel %vm5736_vm5, %v1478_v38, %v7031_v24  ;;  %v1491_v25 = vor.u32 %v1490_v30, %v1487_v53  ;;  %v3073_v41 = vrot.slane %v3071_v43, 7  ;;  %v3084_v58 = vshrl.u32 %v6379_v28, 16  ;;  %4927 = vmatpush3.bf16.msra.mxu0 %v5338_v12  ;;  %v7035_v9 = vld [vmem:[#allocation55_spill] sm:$0xff]  ;;  %v5343_v27 = vld [vmem:[%s5485_s17 + $0x1f0] sm:$0xff]  }
 0x1ab   : > { %v1505_v55 = vor.u32 %v1504_v14, %v1501_v45  ;;  %v1519_v47 = vor.u32 %v1518_v59, %v1515_v32  ;;  %v3087_v52 = vshll.u32 %v6379_v28, 16  ;;  %v3097_v49 = vshrl.u32 %v6382_v42, 16  ;;  %4928 = vmatprep.subr.bf16.mxu0 %v5340_v50  ;;  %v7036_v45 = vld [vmem:[#allocation58_spill] sm:$0xff] }
 0x1ac   : > { %v1492_v19 = vrot.slane %v1491_v25, 4  ;;  %v3076_v34 = vor.u32 %v3074_v63, %v3073_v41  ;;  %v3100_v48 = vshll.u32 %v6382_v42, 16  ;;  %v3086_v10 = vrot.slane %v3084_v58, 7  ;;  %5055 = vmatpush3.bf16.msra.mxu1 %v5339_v4  ;;  %v7037_v41 = vld [vmem:[#allocation64_spill] sm:$0xff]  ;;  %v5346_v58 = vld [vmem:[%s5485_s17 + $0x1f8] sm:$0xff]  }
 0x1ad   : > { %v1506_v1 = vrot.slane %v1505_v55, 4  ;;  %v1520_v40 = vrot.slane %v1519_v47, 4  ;;  %v3110_v20 = vshrl.u32 %v6388_v8, 16  ;;  %v3099_v13 = vrot.slane %v3097_v49, 7  ;;  %5056 = vmatprep.subr.bf16.mxu1 %v5341_v15  ;;  %v5345_v47 = vld [vmem:[%s5485_s17 + $0xf8] sm:$0xff]   ;;  %v7038_v49 = vld [vmem:[#allocation60_spill] sm:$0xff] }
 0x1ae   : > { %v1497_v0 = vsel %vm5736_vm5, %v1492_v19, %v7032_v62  ;;  %v3077_v51 = vsel %vm5686_vm4, %v7033_v22, %v3076_v34  ;;  %v3113_v12 = vshll.u32 %v6388_v8, 16  ;;  %v3089_v17 = vor.u32 %v3087_v52, %v3086_v10  ;;  %4929 = vmatpush3.bf16.msra.mxu0 %v5340_v50 }
 0x1af   : > { %v4445_v54 = vcombine.low %v1483_v60, %v1497_v0  ;;  %v1511_v4 = vsel %vm5736_vm5, %v1506_v1, %v7034_v11  ;;  %v1525_v37 = vsel %vm5736_vm5, %v1520_v40, %v7035_v9  ;;  %v3102_v53 = vor.u32 %v3100_v48, %v3099_v13  ;;  %v6414_v60 = vld [vmem:[#allocation2 + $0xdc] sm:$0xf]  ;;  %4930 = vmatprep.subr.bf16.mxu0 %v5342_v5  ;;  %v7039_v1 = vld [vmem:[#allocation74_spill] sm:$0xff]  ;;  %v7045_v9 = vld [vmem:[#allocation65_spill] sm:$0xff] }
 0x1b0   : > { %v4446_v38 = vcombine.low %v1511_v4, %v1525_v37  ;;  %v3112_v30 = vrot.slane %v3110_v20, 7  ;;  %v1527_v43 = vshrl.u32 %v1323_v46, 16  ;;  %v3090_v14 = vsel %vm5686_vm4, %v7036_v45, %v3089_v17  ;;  %5057 = vmatpush3.bf16.msra.mxu1 %v5341_v15  ;;  %v7040_v40 = vld [vmem:[#allocation35_spill] sm:$0xff] }
 0x1b1   : > { %4911 = vmatmul.mubr.bf16.gmra.mrb[24].mxu0 %v4445_v54  ;;  %v1530_v32 = vshll.u32 %v1323_v46, 16  ;;  %v1541_v59 = vshrl.u32 %v1325_v3, 16  ;;  %v1544_v24 = vshll.u32 %v1325_v3, 16  ;;  %v4541_v25 = vcombine.low %v3077_v51, %v3090_v14  ;;  %5058 = vmatprep.subr.bf16.mxu1 %v5343_v27  ;;  %v7041_v20 = vld [vmem:[#allocation75_spill] sm:$0xff]  ;;  %v7042_v46 = vld [vmem:[#allocation54_spill] sm:$0xff]  ;;  %v7043_v3 = vld [vmem:[#allocation61_spill] sm:$0xff] }
 0x1b2   : > { %4914 = vmatprep.mubr.bf16.mxu0 %v4446_v38  ;;  %v3103_v63 = vsel %vm5686_vm4, %v7037_v41, %v3102_v53  ;;  %v3115_v50 = vor.u32 %v3113_v12, %v3112_v30  ;;  %v1529_v55 = vrot.slane %v1527_v43, 4  ;;  %v1996_v52 = vshrl.u32 %v6084_v21, 16  ;;  %4931 = vmatpush3.bf16.msra.mxu0 %v5342_v5  ;;  %v1771_v12 = vld [vmem:[#allocation2 + $0x3c] sm:$0x8]  ;;  %v6440_v38 = vld [vmem:[%s5485_s17 + $0x200] sm:$0xff]   ;;  %v7047_v43 = vld [vmem:[#allocation62_spill] sm:$0xff] }
 0x1b3   : > { %v1532_v19 = vrot.slane %v1530_v32, 5  ;;  %v1543_v15 = vrot.slane %v1541_v59, 4  ;;  %v1546_v34 = vrot.slane %v1544_v24, 5  ;;  %5039 = vmatmul.mubr.bf16.gmra.mrb[8].mxu1 %v4541_v25  ;;  %v1807_v10 = vsel %vm5686_vm4, %v7040_v40, %v7039_v1  ;;  %4932 = vmatprep.subr.bf16.mxu0 %v5345_v47  ;;  %v6444_v14 = vld [vmem:[#allocation2 + $0xe8] sm:$0xf]  ;;  %v7050_v25 = vld [vmem:[#allocation68_spill] sm:$0xff] }
 0x1b4   : > { %v3116_v48 = vsel %vm5686_vm4, %v7038_v49, %v3115_v50  ;;  %v1820_v21 = vsel %vm5686_vm4, %v7042_v46, %v7041_v20  ;;  %v3123_v62 = vshrl.u32 %v6414_v60, 16  ;;  %5059 = vmatpush3.bf16.msra.mxu1 %v5343_v27  ;;  %v7044_v5 = vshrl.u32 %v7043_v3, 16  ;;  %v7049_v24 = vld [vmem:[#allocation97_spill] sm:$0xff]  ;;  %v7057_v3 = vld [vmem:[#allocation79_spill] sm:$0xff] }
 0x1b5   : > { %v4542_v0 = vcombine.low %v3103_v63, %v3116_v48  ;;  %v1533_v22 = vor.u32 %v1532_v19, %v1529_v55  ;;  %v1547_v51 = vor.u32 %v1546_v34, %v1543_v15  ;;  %v4472_v13 = vcombine.low %v1807_v10, %v1820_v21  ;;  %5060 = vmatprep.subr.bf16.mxu1 %v5346_v58  ;;  %v7051_v63 = vld [vmem:[#allocation98_spill] sm:$0xff]  ;;  %v7052_v50 = vld [vmem:[#allocation69_spill] sm:$0xff]  ;;  %v7054_v48 = vld [vmem:[#allocation67_spill] sm:$0xff] }
 0x1b6   : > { %v4534_v54 = vrot.slane %v7044_v5, 11  ;;  %v3125_v11 = vrot.slane %v3123_v62, 7  ;;  %v3126_v4 = vshll.u32 %v6414_v60, 16  ;;  %v7046_v37 = vshrl.u32 %v7045_v9, 16  ;;  %4933 = vmatpush3.bf16.msra.mxu0 %v5345_v47  ;;  %v1773_v19 = vld [vmem:[#allocation2 + $0x48] sm:$0x8] }
 0x1b7   : > { %5042 = vmatprep.mubr.bf16.mxu1 %v4542_v0  ;;  %v1534_v53 = vrot.slane %v1533_v22, 4  ;;  %v1548_v30 = vrot.slane %v1547_v51, 4  ;;  %v7048_v45 = vshrl.u32 %v7047_v43, 16  ;;  %v3139_v32 = vshll.u32 %v6444_v14, 16  ;;  %v7053_v34 = vld [vmem:[#allocation66_spill] sm:$0xff] }
 0x1b8   : > { %v3138_v17 = vrot.slane %v7046_v37, 7  ;;  %v3128_v59 = vor.u32 %v3126_v4, %v3125_v11  ;;  %v1833_v41 = vsel %vm5686_vm4, %v7050_v25, %v7049_v24  ;;  %v1846_v55 = vsel %vm5686_vm4, %v7052_v50, %v7051_v63  ;;  %5061 = vmatpush3.bf16.msra.mxu1 %v5346_v58  ;;  %v1775_v10 = vld [vmem:[#allocation2 + $0x54] sm:$0x8]  ;;  %v1777_v22 = vld [vmem:[#allocation2 + $0x60] sm:$0x8]  ;;  %v7065_v63 = vld [vmem:[#allocation91_spill] sm:$0xff] }
 0x1b9   : > { %v4535_v27 = vrot.slane %v7048_v45, 11  ;;  %v1848_v15 = vshrl.u32 %v1771_v12, 16  ;;  %v1539_v49 = vsel %vm5736_vm5, %v1534_v53, %v7053_v34  ;;  %v1553_v47 = vsel %vm5736_vm5, %v1548_v30, %v7054_v48  ;;  %5078 = vmatprep.subr.bf16.mxu1 %v6440_v38  ;;  %v7056_v12 = vld [vmem:[#allocation86_spill] sm:$0xff]  ;;  %v7059_v4 = vld [vmem:[#allocation88_spill] sm:$0xff]  ;;  %v7066_v50 = vld [vmem:[#allocation83_spill] sm:$0xff] }
 0x1ba   : > { %v3141_v1 = vor.u32 %v3139_v32, %v3138_v17  ;;  %v4473_v40 = vcombine.low %v1833_v41, %v1846_v55  ;;  %v7055_v20 = vshrl.u32 %v6074_v35, 16  ;;  %v4447_v21 = vcombine.low %v1539_v49, %v1553_v47  ;;  %v7060_v35 = vld [vmem:[#allocation80_spill] sm:$0xff]  ;;  %v1781_v53 = vld [vmem:[#allocation2 + $0x90] sm:$0x8]  ;;  %v7068_v34 = vld [vmem:[#allocation95_spill] sm:$0xff] }
 0x1bb   : > { %v3129_v62 = vsel %vm5686_vm4, %v4534_v54, %v3128_v59  ;;  %v4460_v0 = vrot.slane %v1848_v15, 11  ;;  %v7058_v58 = vshll.u32 %v7057_v3, 16  ;;  %v1861_v11 = vshrl.u32 %v1773_v19, 16  ;;  %v1779_v17 = vld [vmem:[#allocation2 + $0x84] sm:$0x8]  ;;  %v7062_v32 = vld [vmem:[#allocation90_spill] sm:$0xff] }
 0x1bc   : > { %v6463_v46 = vrot.slane %v7055_v20, 7  ;;  %v3142_v51 = vsel %vm5686_vm4, %v4535_v27, %v3141_v1  ;;  %v7061_v9 = vshll.u32 %v7060_v35, 16  ;;  %v6476_v30 = vrot.slane %v1996_v52, 7  ;;  %4915 = vmatmul.mubr.bf16.gmra.mrb[28].mxu0 %v4447_v21  ;;  %v7063_v59 = vld [vmem:[#allocation82_spill] sm:$0xff]  ;;  %v7069_v49 = vld [vmem:[#allocation85_spill] sm:$0xff]  ;;  %v7071_v20 = vld [vmem:[#allocation100_spill] sm:$0xff] }
 0x1bd   : > { %v1858_v5 = vor.u32 %v7058_v58, %v7056_v12  ;;  %v4543_v54 = vcombine.low %v3129_v62, %v3142_v51  ;;  %v4552_v43 = vcombine.low %v6242_v36, %v6248_v44  ;;  %v1874_v45 = vshrl.u32 %v1775_v10, 16  ;;  %4934 = vmatprep.mubr.bf16.mxu0 %v4472_v13  ;;  %v1783_v44 = vld [vmem:[#allocation2 + $0x9c] sm:$0x8]  ;;  %v7072_v21 = vld [vmem:[#allocation89_spill] sm:$0xff] }
 0x1be   : > { %v1871_v37 = vor.u32 %v7061_v9, %v7059_v4  ;;  %v4461_v27 = vrot.slane %v1861_v11, 11  ;;  %v7064_v24 = vshll.u32 %v7063_v59, 16  ;;  %v1887_v41 = vshrl.u32 %v1777_v22, 16  ;;  %v1785_v51 = vld [vmem:[#allocation2 + $0xa8] sm:$0x8]  ;;  %v7077_v59 = vld [vmem:[#allocation102_spill] sm:$0xff] }
 0x1bf   : > { %v7067_v55 = vshll.u32 %v7066_v50, 16  ;;  %5043 = vmatmul.mubr.bf16.gmra.mrb[12].mxu1 %v4543_v54  ;;  %v4462_v52 = vrot.slane %v1874_v45, 11  ;;  %v1900_v15 = vshrl.u32 %v1779_v17, 16  ;;  %v7070_v48 = vshll.u32 %v7069_v49, 16  ;;  %v1787_v4 = vld [vmem:[#allocation2 + $0xb4] sm:$0x8] }
 0x1c0   : > { %v1884_v25 = vor.u32 %v7064_v24, %v7062_v32  ;;  %v1913_v36 = vshrl.u32 %v1781_v53, 16  ;;  %5062 = vmatprep.mubr.bf16.mxu1 %v4552_v43  ;;  %v1859_v13 = vsel %vm5686_vm4, %v4460_v0, %v1858_v5  ;;  %v1872_v1 = vsel %vm5686_vm4, %v4461_v27, %v1871_v37  ;;  %v7074_v9 = vld [vmem:[#allocation101_spill] sm:$0xff]  ;;  %v7075_v37 = vld [vmem:[#allocation87_spill] sm:$0xff]  ;;  %v1789_v54 = vld [vmem:[#allocation2 + $0xc0] sm:$0x8] }
 0x1c1   : > { %v1897_v19 = vor.u32 %v7067_v55, %v7065_v63  ;;  %v1910_v47 = vor.u32 %v7070_v48, %v7068_v34  ;;  %v4463_v10 = vrot.slane %v1887_v41, 11  ;;  %v7073_v62 = vshll.u32 %v7072_v21, 16  ;;  %v7078_v24 = vld [vmem:[#allocation92_spill] sm:$0xff]  ;;  %v1791_v50 = vld [vmem:[#allocation2 + $0xcc] sm:$0x8] }
 0x1c2   : > { %v4474_v12 = vcombine.low %v1859_v13, %v1872_v1  ;;  %v4553_v3 = vcombine.low %v6285_v6, %v6287_v18  ;;  %v4464_v58 = vrot.slane %v1900_v15, 11  ;;  %v4465_v11 = vrot.slane %v1913_v36, 11  ;;  %v5350_v55 = vld [vmem:[%s5485_s17 + $0x208] sm:$0xff]   ;;  %v5365_v36 = vld [vmem:[#allocation2 + $0xd0] sm:$0xf] }
 0x1c3   : > { %v1923_v22 = vor.u32 %v7073_v62, %v7071_v20  ;;  %v1885_v0 = vsel %vm5686_vm4, %v4462_v52, %v1884_v25  ;;  %v1898_v5 = vsel %vm5686_vm4, %v4463_v10, %v1897_v19  ;;  %v1926_v35 = vshrl.u32 %v1783_v44, 16  ;;  %v5366_v13 = vld [vmem:[#allocation2 + $0xdc] sm:$0xf] }
 0x1c4   : > { %v7076_v17 = vshll.u32 %v7075_v37, 16  ;;  %v4475_v43 = vcombine.low %v1885_v0, %v1898_v5  ;;  %v1911_v6 = vsel %vm5686_vm4, %v4464_v58, %v1910_v47  ;;  %v1939_v45 = vshrl.u32 %v1785_v51, 16  ;;  %4935 = vmatmul.mubr.bf16.vlgmr.msra.gmra.mrb[16].mxu0 %v4473_v40  ;;  %v1793_v47 = vld [vmem:[#allocation2 + $0xd8] sm:$0x8]  ;;  %v3577_v20 = vld [vmem:[#allocation2 + $0x1c] sm:$0xf] }
 0x1c5   : > { %v1924_v18 = vsel %vm5686_vm4, %v4465_v11, %v1923_v22  ;;  %v4466_v32 = vrot.slane %v1926_v35, 11  ;;  %v7079_v25 = vshll.u32 %v7078_v24, 16  ;;  %v1952_v63 = vshrl.u32 %v1787_v4, 16  ;;  %4938 = vmatprep.mubr.bf16.mxu0 %v4474_v12  ;;  %v3579_v22 = vld [vmem:[#allocation2 + $0x28] sm:$0xf]  ;;  %v5351_v51 = vld [vmem:[%s5485_s17 + $0x210] sm:$0xff]  }
 0x1c6   : > { %v1936_v53 = vor.u32 %v7076_v17, %v7074_v9  ;;  %v4476_v27 = vcombine.low %v1911_v6, %v1924_v18  ;;  %v4467_v19 = vrot.slane %v1939_v45, 11  ;;  %v7080_v52 = vshll.u32 %v6043_v26, 16  ;;  %v3578_v11 = vld [vmem:[#allocation2 + $0x20] sm:$0x1]  ;;  %v3581_v5 = vld [vmem:[#allocation2 + $0x34] sm:$0xf] }
 0x1c7   : > { %v1949_v41 = vor.u32 %v7079_v25, %v7077_v59  ;;  %v1965_v34 = vshrl.u32 %v1789_v54, 16  ;;  %v7081_v49 = vshll.u32 %v6052_v23, 16  ;;  %v1986_v44 = vshll.u32 %v5365_v36, 16  ;;  %5063 = vmatmul.mubr.bf16.vlgmr.msra.gmra.mrb[0].mxu1 %v4553_v3  ;;  %v5367_v35 = vld [vmem:[#allocation2 + $0x70] sm:$0xf] }
 0x1c8   : > { %v1962_v15 = vor.u32 %v7080_v52, %v6088_v33  ;;  %v1999_v1 = vshll.u32 %v5366_v13, 16  ;;  %v4554_v40 = vcombine.low %v6293_v2, %v6298_v61  ;;  %v4468_v10 = vrot.slane %v1952_v63, 11  ;;  %5079 = vmatpush3.bf16.msra.mxu1 %v6440_v38  ;;  %v3583_v45 = vld [vmem:[#allocation2 + $0x40] sm:$0xf] }
 0x1c9   : > { %v1975_v48 = vor.u32 %v7081_v49, %v6093_v56  ;;  %v1937_v26 = vsel %vm5686_vm4, %v4466_v32, %v1936_v53  ;;  %v1950_v33 = vsel %vm5686_vm4, %v4467_v19, %v1949_v41  ;;  %v4469_v23 = vrot.slane %v1965_v34, 11  ;;  %5080 = vmatprep.subr.bf16.mxu1 %v5350_v55  ;;  %v5354_v32 = vld [vmem:[%s5485_s17 + $0x218] sm:$0xff]   ;;  %v3584_v19 = vld [vmem:[#allocation2 + $0x44] sm:$0x1] }
 0x1ca   : > { %v1978_v56 = vshrl.u32 %v1791_v50, 16  ;;  %5066 = vmatprep.mubr.bf16.mxu1 %v4554_v40  ;;  %v6526_v21 = vcombine.low %v1937_v26, %v1950_v33  ;;  %v1988_v62 = vor.u32 %v1986_v44, %v6463_v46  ;;  %v1991_v2 = vshrl.u32 %v1793_v47, 16  ;;  %v3587_v44 = vld [vmem:[#allocation2 + $0x58] sm:$0xf]  ;;  %v3586_v33 = vld [vmem:[#allocation2 + $0x50] sm:$0x1] }
 0x1cb   : > { %v2001_v61 = vor.u32 %v1999_v1, %v6476_v30  ;;  %v1963_v12 = vsel %vm5686_vm4, %v4468_v10, %v1962_v15  ;;  %v1976_v3 = vsel %vm5686_vm4, %v4469_v23, %v1975_v48  ;;  %v3610_v38 = vshrl.u32 %v3577_v20, 16  ;;  %v5355_v15 = vld [vmem:[%s5485_s17 + $0x220] sm:$0xff]   ;;  %v3582_v10 = vld [vmem:[#allocation2 + $0x38] sm:$0x1] }
 0x1cc   : > { %v4470_v58 = vrot.slane %v1978_v56, 11  ;;  %v6535_v4 = vcombine.low %v1963_v12, %v1976_v3  ;;  %v4471_v0 = vrot.slane %v1991_v2, 11  ;;  %v3613_v46 = vshll.u32 %v3577_v20, 16  ;;  %5081 = vmatpush3.bf16.msra.mxu1 %v5350_v55  ;;  %4939 = vmatmul.mubr.bf16.gmra.mrb[20].mxu0 %v4475_v43  ;;  %v3585_v55 = vld [vmem:[#allocation2 + $0x4c] sm:$0xf] }
 0x1cd   : > { %v4555_v30 = vcombine.low %v6323_v31, %v5367_v35  ;;  %v3612_v9 = vrot.slane %v3610_v38, 4  ;;  %v3624_v37 = vshrl.u32 %v3579_v22, 16  ;;  %v3627_v17 = vshll.u32 %v3579_v22, 16  ;;  %5082 = vmatprep.subr.bf16.mxu1 %v5351_v51  ;;  %v3580_v31 = vld [vmem:[#allocation2 + $0x2c] sm:$0x1]  ;;  %4942 = vmatprep.mubr.bf16.mxu0 %v4476_v27 }
 0x1ce   : > { %v1989_v53 = vsel %vm5686_vm4, %v4470_v58, %v1988_v62  ;;  %v2002_v54 = vsel %vm5686_vm4, %v4471_v0, %v2001_v61  ;;  %v3615_v6 = vrot.slane %v3613_v46, 5  ;;  %v3619_v18 = vshll.u32 %v3578_v11, 16  ;;  %v5358_v61 = vld [vmem:[%s5485_s17 + $0x228] sm:$0xff]   ;;  %v3589_v3 = vld [vmem:[#allocation2 + $0x64] sm:$0xf] }
 0x1cf   : > { %v6543_v59 = vcombine.low %v1989_v53, %v2002_v54  ;;  %v3626_v24 = vrot.slane %v3624_v37, 4  ;;  %v3629_v25 = vrot.slane %v3627_v17, 5  ;;  %v3638_v41 = vshrl.u32 %v3581_v5, 16  ;;  %5067 = vmatmul.mubr.bf16.gmra.mrb[4].mxu1 %v4555_v30  ;;  %v3591_v38 = vld [vmem:[#allocation2 + $0x70] sm:$0xf] }
 0x1d0   : > { %v4556_v63 = vcombine.low %v6329_v7, %v6335_v29  ;;  %v3616_v50 = vor.u32 %v3615_v6, %v3612_v9  ;;  %v3641_v57 = vshll.u32 %v3581_v5, 16  ;;  %v3652_v52 = vshrl.u32 %v3583_v45, 16  ;;  %5083 = vmatpush3.bf16.msra.mxu1 %v5351_v51  ;;  %v3588_v5 = vld [vmem:[#allocation2 + $0x5c] sm:$0x1]  ;;  %v5359_v9 = vld [vmem:[%s5485_s17 + $0x230] sm:$0xff]  }
 0x1d1   : > { %v3655_v43 = vshll.u32 %v3583_v45, 16  ;;  %v3621_v34 = vrot.slane %v3619_v18, 5  ;;  %v3630_v49 = vor.u32 %v3629_v25, %v3626_v24  ;;  %v3633_v48 = vshll.u32 %v3580_v31, 16  ;;  %5084 = vmatprep.subr.bf16.mxu1 %v5354_v32 }
 0x1d2   : > { %5070 = vmatprep.mubr.bf16.mxu1 %v4556_v63  ;;  %v3640_v47 = vrot.slane %v3638_v41, 4  ;;  %v3654_v36 = vrot.slane %v3652_v52, 4  ;;  %v3666_v13 = vshrl.u32 %v3585_v55, 16  ;;  %v3617_v7 = vrot.slane %v3616_v50, 4  ;;  %v3590_v50 = vld [vmem:[#allocation2 + $0x68] sm:$0x1] }
 0x1d3   : > { %v3657_v27 = vrot.slane %v3655_v43, 5  ;;  %v3643_v29 = vrot.slane %v3641_v57, 5  ;;  %v3661_v1 = vshll.u32 %v3584_v19, 16  ;;  %v3669_v40 = vshll.u32 %v3585_v55, 16  ;;  %v3592_v57 = vld [vmem:[#allocation2 + $0x74] sm:$0x1] }
 0x1d4   : > { %5085 = vmatpush3.bf16.msra.mxu1 %v5354_v32  ;;  %v4557_v26 = vcombine.low %v6375_v16, %v6379_v28  ;;  %v3668_v23 = vrot.slane %v3666_v13, 4  ;;  %v3680_v62 = vshrl.u32 %v3587_v44, 16  ;;  %4943 = vmatmul.mubr.bf16.gmra.mrb[24].mxu0 %v6526_v21  ;;  %v4558_v2 = vcombine.low %v6382_v42, %v6388_v8  ;;  %v3593_v8 = vld [vmem:[#allocation2 + $0x94] sm:$0xf]  ;;  %v3595_v32 = vld [vmem:[#allocation2 + $0xa0] sm:$0xf] }
 0x1d5   : > { %v3658_v20 = vor.u32 %v3657_v27, %v3654_v36  ;;  %v3671_v56 = vrot.slane %v3669_v40, 5  ;;  %5086 = vmatprep.subr.bf16.mxu1 %v5355_v15  ;;  %v3631_v22 = vrot.slane %v3630_v49, 4  ;;  %v3635_v51 = vrot.slane %v3633_v48, 5  ;;  %4946 = vmatprep.mubr.bf16.mxu0 %v6535_v4  ;;  %v5361_v52 = vld [vmem:[%s5485_s17 + $0x238] sm:$0xff]   ;;  %v3596_v40 = vld [vmem:[#allocation2 + $0xa4] sm:$0x1] }
 0x1d6   : > { %v3683_v12 = vshll.u32 %v3587_v44, 16  ;;  %v3622_v16 = vsel %vm5736_vm5, %v3617_v7, %v3621_v34  ;;  %v3644_v28 = vor.u32 %v3643_v29, %v3640_v47  ;;  %v3647_v58 = vshll.u32 %v3582_v10, 16  ;;  %v3594_v36 = vld [vmem:[#allocation2 + $0x98] sm:$0x1] }
 0x1d7   : > { %v3663_v11 = vrot.slane %v3661_v1, 5  ;;  %5071 = vmatmul.mubr.bf16.gmra.mrb[8].mxu1 %v4557_v26  ;;  %v3659_v21 = vrot.slane %v3658_v20, 4  ;;  %v3675_v0 = vshll.u32 %v3586_v33, 16  ;;  %v3682_v46 = vrot.slane %v3680_v62, 4  ;;  %v3599_v29 = vld [vmem:[#allocation2 + $0xb8] sm:$0xf] }
 0x1d8   : > { %v3685_v42 = vrot.slane %v3683_v12, 5  ;;  %5087 = vmatpush3.bf16.msra.mxu1 %v5355_v15  ;;  %5074 = vmatprep.mubr.bf16.mxu1 %v4558_v2  ;;  %v3672_v35 = vor.u32 %v3671_v56, %v3668_v23  ;;  %v3694_v30 = vshrl.u32 %v3589_v3, 16  ;;  %v3697_v4 = vshll.u32 %v3589_v3, 16  ;;  %v3597_v26 = vld [vmem:[#allocation2 + $0xac] sm:$0xf] }
 0x1d9   : > { %5088 = vmatprep.subr.bf16.mxu1 %v5358_v61  ;;  %v4559_v37 = vcombine.low %v6414_v60, %v6444_v14  ;;  %v3636_v17 = vsel %vm5736_vm5, %v3631_v22, %v3635_v51  ;;  %v3708_v53 = vshrl.u32 %v3591_v38, 16  ;;  %v3711_v54 = vshll.u32 %v3591_v38, 16  ;;  %v3601_v2 = vld [vmem:[#allocation2 + $0xc4] sm:$0xf] }
 0x1da   : > { %v4568_v6 = vcombine.low %v3622_v16, %v3636_v17  ;;  %v3645_v18 = vrot.slane %v3644_v28, 4  ;;  %v3649_v45 = vrot.slane %v3647_v58, 5  ;;  %v3722_v31 = vshrl.u32 %v3593_v8, 16 }
 0x1db   : > { %v3664_v24 = vsel %vm5736_vm5, %v3659_v21, %v3663_v11  ;;  %v3677_v25 = vrot.slane %v3675_v0, 5  ;;  %v3686_v41 = vor.u32 %v3685_v42, %v3682_v46  ;;  %v3689_v63 = vshll.u32 %v3588_v5, 16  ;;  %v3603_v11 = vld [vmem:[#allocation2 + $0xd0] sm:$0xf] }
 0x1dc   : > { %5089 = vmatpush3.bf16.msra.mxu1 %v5358_v61  ;;  %v3673_v60 = vrot.slane %v3672_v35, 4  ;;  %v3696_v14 = vrot.slane %v3694_v30, 4  ;;  %v3699_v55 = vrot.slane %v3697_v4, 5  ;;  %v3725_v19 = vshll.u32 %v3593_v8, 16  ;;  %4947 = vmatmul.mubr.bf16.gmra.mrb[28].mxu0 %v6543_v59  ;;  %v3600_v35 = vld [vmem:[#allocation2 + $0xbc] sm:$0x1] }
 0x1dd   : > { %5090 = vmatprep.subr.bf16.mxu1 %v5359_v9  ;;  %v3710_v43 = vrot.slane %v3708_v53, 4  ;;  %v3713_v15 = vrot.slane %v3711_v54, 5  ;;  %v3724_v34 = vrot.slane %v3722_v31, 4  ;;  %v3736_v49 = vshrl.u32 %v3595_v32, 16  ;;  %v3602_v53 = vld [vmem:[#allocation2 + $0xc8] sm:$0x1] }
 0x1de   : > { %v3703_v48 = vshll.u32 %v3590_v50, 16  ;;  %v3717_v47 = vshll.u32 %v3592_v57, 16  ;;  %v3727_v27 = vrot.slane %v3725_v19, 5  ;;  %v3739_v44 = vshll.u32 %v3595_v32, 16  ;;  %v3605_v31 = vld [vmem:[#allocation2 + $0xdc] sm:$0xf] }
 0x1df   : > { %5075 = vmatmul.mubr.bf16.gmra.mrb[12].mxu1 %v4559_v37  ;;  %v3687_v13 = vrot.slane %v3686_v41, 4  ;;  %v3691_v7 = vrot.slane %v3689_v63, 5  ;;  %v3650_v59 = vsel %vm5736_vm5, %v3645_v18, %v3649_v45  ;;  %v3700_v1 = vor.u32 %v3699_v55, %v3696_v14  ;;  %v3607_v50 = vld [vmem:[#allocation2 + $0xe8] sm:$0xf] }
 0x1e0   : > { %5091 = vmatpush3.bf16.msra.mxu1 %v5359_v9  ;;  %5094 = vmatprep.mubr.bf16.mxu1 %v4568_v6  ;;  %v3738_v10 = vrot.slane %v3736_v49, 4  ;;  %v3741_v20 = vrot.slane %v3739_v44, 5  ;;  %v4569_v33 = vcombine.low %v3650_v59, %v3664_v24  ;;  %v3714_v23 = vor.u32 %v3713_v15, %v3710_v43  ;;  %v3598_v9 = vld [vmem:[#allocation2 + $0xb0] sm:$0x1] }
 0x1e1   : > { %5092 = vmatprep.subr.bf16.mxu1 %v5361_v52  ;;  %v3728_v56 = vor.u32 %v3727_v27, %v3724_v34  ;;  %v3731_v62 = vshll.u32 %v3594_v36, 16  ;;  %v3678_v61 = vsel %vm5736_vm5, %v3673_v60, %v3677_v25  ;;  %v3705_v22 = vrot.slane %v3703_v48, 5 }
 0x1e2   : > { %v3719_v51 = vrot.slane %v3717_v47, 5  ;;  %v3764_v12 = vshrl.u32 %v3599_v29, 16  ;;  %v3692_v3 = vsel %vm5736_vm5, %v3687_v13, %v3691_v7  ;;  %v3745_v16 = vshll.u32 %v3596_v40, 16 }
 0x1e3   : > { %v3750_v28 = vshrl.u32 %v3597_v26, 16  ;;  %v3767_v58 = vshll.u32 %v3599_v29, 16  ;;  %v3701_v38 = vrot.slane %v3700_v1, 4  ;;  %v3742_v21 = vor.u32 %v3741_v20, %v3738_v10  ;;  %v3606_v20 = vld [vmem:[#allocation2 + $0xe0] sm:$0x1] }
 0x1e4   : > { %5093 = vmatpush3.bf16.msra.mxu1 %v5361_v52  ;;  %v3753_v0 = vshll.u32 %v3597_v26, 16  ;;  %v3778_v46 = vshrl.u32 %v3601_v2, 16  ;;  %v3715_v42 = vrot.slane %v3714_v23, 4  ;;  %v3729_v8 = vrot.slane %v3728_v56, 4  ;;  %v3604_v52 = vld [vmem:[#allocation2 + $0xd4] sm:$0x1] }
 0x1e5   : > { %v3733_v5 = vrot.slane %v3731_v62, 5  ;;  %v3781_v30 = vshll.u32 %v3601_v2, 16  ;;  %v4570_v4 = vcombine.low %v3678_v61, %v3692_v3  ;;  %v3766_v37 = vrot.slane %v3764_v12, 4  ;;  %v3608_v2 = vld [vmem:[#allocation2 + $0xec] sm:$0x1] }
 0x1e6   : > { %v3769_v17 = vrot.slane %v3767_v58, 5  ;;  %v3792_v54 = vshrl.u32 %v3603_v11, 16  ;;  %v3747_v6 = vrot.slane %v3745_v16, 5  ;;  %v3752_v18 = vrot.slane %v3750_v28, 4 }
 0x1e7   : > { %5095 = vmatmul.mubr.bf16.vlgmr.msra.gmra.mrb[0].mxu1 %v4569_v33  ;;  %v3780_v45 = vrot.slane %v3778_v46, 4  ;;  %v3783_v32 = vrot.slane %v3781_v30, 5  ;;  %v3743_v24 = vrot.slane %v3742_v21, 4  ;;  %v3755_v25 = vrot.slane %v3753_v0, 5 }
 0x1e8   : > { %5098 = vmatprep.mubr.bf16.mxu1 %v4570_v4  ;;  %v3773_v41 = vshll.u32 %v3600_v35, 16  ;;  %v3795_v63 = vshll.u32 %v3603_v11, 16  ;;  %v3706_v57 = vsel %vm5736_vm5, %v3701_v38, %v3705_v22  ;;  %v3720_v60 = vsel %vm5736_vm5, %v3715_v42, %v3719_v51 }
 0x1e9   : > { %v3734_v14 = vsel %vm5736_vm5, %v3729_v8, %v3733_v5  ;;  %v3794_v55 = vrot.slane %v3792_v54, 4  ;;  %v3770_v19 = vor.u32 %v3769_v17, %v3766_v37  ;;  %v3806_v15 = vshrl.u32 %v3605_v31, 16 }
 0x1ea   : > { %v3797_v43 = vrot.slane %v3795_v63, 5  ;;  %v3809_v34 = vshll.u32 %v3605_v31, 16  ;;  %v3759_v49 = vshll.u32 %v3598_v9, 16  ;;  %v3784_v48 = vor.u32 %v3783_v32, %v3780_v45 }
 0x1eb   : > { %v3787_v47 = vshll.u32 %v3602_v53, 16  ;;  %v3820_v36 = vshrl.u32 %v3607_v50, 16  ;;  %v4571_v27 = vcombine.low %v3706_v57, %v3720_v60  ;;  %v3748_v44 = vsel %vm5736_vm5, %v3743_v24, %v3747_v6 }
 0x1ec   : > { %v3756_v13 = vor.u32 %v3755_v25, %v3752_v18  ;;  %v3775_v7 = vrot.slane %v3773_v41, 5  ;;  %v4572_v29 = vcombine.low %v3734_v14, %v3748_v44  ;;  %v3798_v59 = vor.u32 %v3797_v43, %v3794_v55 }
 0x1ed   : > { %v3801_v1 = vshll.u32 %v3604_v52, 16  ;;  %v3823_v40 = vshll.u32 %v3607_v50, 16  ;;  %v3771_v10 = vrot.slane %v3770_v19, 4  ;;  %v3808_v26 = vrot.slane %v3806_v15, 4 }
 0x1ee   : > { %v3811_v33 = vrot.slane %v3809_v34, 5  ;;  %v3822_v23 = vrot.slane %v3820_v36, 4  ;;  %v3785_v56 = vrot.slane %v3784_v48, 4  ;;  %v3789_v62 = vrot.slane %v3787_v47, 5 }
 0x1ef   : > { %5099 = vmatmul.mubr.bf16.gmra.mrb[4].mxu1 %v4571_v27  ;;  %v3825_v61 = vrot.slane %v3823_v40, 5  ;;  %v3757_v22 = vrot.slane %v3756_v13, 4  ;;  %v3761_v51 = vrot.slane %v3759_v49, 5  ;;  %v3799_v12 = vrot.slane %v3798_v59, 4 }
 0x1f0   : > { %5102 = vmatprep.mubr.bf16.mxu1 %v4572_v29  ;;  %v3803_v3 = vrot.slane %v3801_v1, 5  ;;  %v3815_v16 = vshll.u32 %v3606_v20, 16  ;;  %v3776_v28 = vsel %vm5736_vm5, %v3771_v10, %v3775_v7  ;;  %v3812_v58 = vor.u32 %v3811_v33, %v3808_v26 }
 0x1f1   : > { %v3826_v11 = vor.u32 %v3825_v61, %v3822_v23  ;;  %v3829_v38 = vshll.u32 %v3608_v2, 16  ;;  %v3790_v21 = vsel %vm5736_vm5, %v3785_v56, %v3789_v62  ;;  %v3762_v0 = vsel %vm5736_vm5, %v3757_v22, %v3761_v51 }
 0x1f2   : > { %v4573_v46 = vcombine.low %v3762_v0, %v3776_v28  ;;  %v3804_v42 = vsel %vm5736_vm5, %v3799_v12, %v3803_v3  ;;  %v3817_v8 = vrot.slane %v3815_v16, 5  ;;  %v3813_v35 = vrot.slane %v3812_v58, 4 }
 0x1f3   : > { %v4574_v5 = vcombine.low %v3790_v21, %v3804_v42  ;;  %v3827_v30 = vrot.slane %v3826_v11, 4  ;;  %v3831_v4 = vrot.slane %v3829_v38, 5 }
 0x1f4   : > { %v3818_v9 = vsel %vm5736_vm5, %v3813_v35, %v3817_v8 }
 0x1f5   : > { %v3832_v37 = vsel %vm5736_vm5, %v3827_v30, %v3831_v4 }
 0x1f6   : > { %v4575_v17 = vcombine.low %v3818_v9, %v3832_v37 }
 0x1f7   : > { %5103 = vmatmul.mubr.bf16.gmra.mrb[8].mxu1 %v4573_v46 }
 0x1f8   : > { %5106 = vmatprep.mubr.bf16.mxu1 %v4574_v5 }
 0x1ff   : > { %5107 = vmatmul.mubr.bf16.gmra.mrb[12].mxu1 %v4575_v17 }
 0x297   : > { %v4936_v53 = vpop.f32.mrb[16].mxu0 }
 0x298   : > { %v2133_v54 = vpop.f32.mrb[17].mxu0 }
 0x299   : > { %v4937_v6 = vpop.f32.mrb[18].mxu0 }
 0x29a   : > { %v2136_v18 = vpop.f32.mrb[19].mxu0 }
 0x29f   : > { %v4940_v45 = vpop.f32.mrb[20].mxu0 }
 0x2a0   : > { %v2149_v32 = vpop.f32.mrb[21].mxu0 }
 0x2a1   : > { %v4941_v31 = vpop.f32.mrb[22].mxu0 }
 0x2a2   : > { %v2152_v24 = vpop.f32.mrb[23].mxu0 }
 0x2a7   : > { %v4944_v25 = vpop.f32.mrb[24].mxu0 }
 0x2a8   : > { %v2165_v41 = vpop.f32.mrb[25].mxu0 }
 0x2a9   : > { %v4945_v63 = vpop.f32.mrb[26].mxu0 }
 0x2aa   : > { %v2168_v50 = vpop.f32.mrb[27].mxu0 }
 0x2af   : > { %v4948_v57 = vpop.f32.mrb[28].mxu0 }
 0x2b0   : > { %v2181_v60 = vpop.f32.mrb[29].mxu0 }
 0x2b1   : > { %v6592_v14 = vpop.f32.mrb[30].mxu0 }
 0x2b2   : > { %v6594_v39 = vpop.f32.mrb[31].mxu0 }
 0x2ba   : > { %v5096_v55 = vpop.f32.mrb[0].mxu1 }
 0x2bb   : > { %v6596_v19 = vadd.f32 %v5096_v55, %v4936_v53  ;;  %v3963_v52 = vpop.f32.mrb[1].mxu1 }
 0x2bc   : > { %v6598_v43 = vadd.f32 %v3963_v52, %v2133_v54  ;;  %v5097_v15 = vpop.f32.mrb[2].mxu1 }
 0x2bd   : > { %v6600_v34 = vadd.f32 %v5097_v15, %v4937_v6  ;;  %v3966_v49 = vpop.f32.mrb[3].mxu1  ;;  %v4066_v44 = vmul.f32 %v6596_v19, %v6596_v19 }
 0x2be   : > { %v6602_v48 = vadd.f32 %v3966_v49, %v2136_v18  ;;  %v4064_v47 = vmul.f32 %v6598_v43, %v6598_v43 }
 0x2bf   : > { %v4067_v40 = vmul.f32 %v6600_v34, %v6600_v34 }
 0x2c0   : > { %v4042_v36 = vadd.f32 %v6602_v48, %v6598_v43  ;;  %v4065_v27 = vmul.f32 %v6602_v48, %v6602_v48 }
 0x2c2   : > { %v4043_v13 = vadd.f32 %v6596_v19, %v4042_v36  ;;  %v4080_v7 = vadd.f32 %v4065_v27, %v4064_v47  ;;  %v5100_v29 = vpop.f32.mrb[4].mxu1 }
 0x2c3   : > { %v6613_v59 = vadd.f32 %v5100_v29, %v4940_v45  ;;  %v3979_v1 = vpop.f32.mrb[5].mxu1 }
 0x2c4   : > { %v4081_v10 = vadd.f32 %v4080_v7, %v4066_v44  ;;  %v6617_v20 = vadd.f32 %v3979_v1, %v2149_v32  ;;  %v4044_v26 = vadd.f32 %v6600_v34, %v4043_v13  ;;  %v5101_v33 = vpop.f32.mrb[6].mxu1 }
 0x2c5   : > { %v6620_v23 = vadd.f32 %v5101_v33, %v4941_v31  ;;  %v3982_v56 = vpop.f32.mrb[7].mxu1  ;;  %v4070_v16 = vmul.f32 %v6613_v59, %v6613_v59 }
 0x2c6   : > { %v4045_v62 = vadd.f32 %v6617_v20, %v4044_v26  ;;  %v4068_v2 = vmul.f32 %v6617_v20, %v6617_v20  ;;  %v4082_v61 = vadd.f32 %v4081_v10, %v4067_v40  ;;  %v6625_v22 = vadd.f32 %v3982_v56, %v2152_v24 }
 0x2c7   : > { %v4071_v0 = vmul.f32 %v6620_v23, %v6620_v23 }
 0x2c8   : > { %v4083_v51 = vadd.f32 %v4082_v61, %v4068_v2  ;;  %v4046_v12 = vadd.f32 %v6625_v22, %v4045_v62  ;;  %v4069_v3 = vmul.f32 %v6625_v22, %v6625_v22 }
 0x2ca   : > { %v4047_v28 = vadd.f32 %v6613_v59, %v4046_v12  ;;  %v4084_v58 = vadd.f32 %v4083_v51, %v4069_v3  ;;  %v5104_v11 = vpop.f32.mrb[8].mxu1 }
 0x2cb   : > { %v6633_v38 = vadd.f32 %v5104_v11, %v4944_v25  ;;  %v3995_v21 = vpop.f32.mrb[9].mxu1 }
 0x2cc   : > { %v4085_v46 = vadd.f32 %v4084_v58, %v4070_v16  ;;  %v6637_v42 = vadd.f32 %v3995_v21, %v2165_v41  ;;  %v4048_v8 = vadd.f32 %v6620_v23, %v4047_v28  ;;  %v5105_v5 = vpop.f32.mrb[10].mxu1 }
 0x2cd   : > { %v6640_v35 = vadd.f32 %v5105_v5, %v4945_v63  ;;  %v3998_v30 = vpop.f32.mrb[11].mxu1  ;;  %v4074_v18 = vmul.f32 %v6633_v38, %v6633_v38 }
 0x2ce   : > { %v4049_v4 = vadd.f32 %v6637_v42, %v4048_v8  ;;  %v4072_v9 = vmul.f32 %v6637_v42, %v6637_v42  ;;  %v4086_v37 = vadd.f32 %v4085_v46, %v4071_v0  ;;  %v6645_v17 = vadd.f32 %v3998_v30, %v2168_v50 }
 0x2cf   : > { %v4075_v41 = vmul.f32 %v6640_v35, %v6640_v35  ;;  %v5407_v30 = vmov 1966171168  }
 0x2d0   : > { %v4087_v53 = vadd.f32 %v4086_v37, %v4072_v9  ;;  %v4050_v54 = vadd.f32 %v6645_v17, %v4049_v4  ;;  %v4073_v6 = vmul.f32 %v6645_v17, %v6645_v17  ;;  %v4112_v4 = vunpack.c.l.s4 %v5407_v30  ;;  %v6724_v30 = vld [vmem:[%s5480_s14 + $0x38] sm:$0xff]  }
 0x2d1   : > { %v4114_v9 = vlaneseq }
 0x2d2   : > { %v4051_v45 = vadd.f32 %v6633_v38, %v4050_v54  ;;  %v4088_v32 = vadd.f32 %v4087_v53, %v4073_v6  ;;  %v5108_v31 = vpop.f32.mrb[12].mxu1  ;;  %v4113_v37 = vunpack.c.0.s8 %v4112_v4  ;;  %v4107_v54 = vld [vmem:[%s5465_s28] sm:$0x3] }
 0x2d3   : > { %v6653_v24 = vadd.f32 %v5108_v31, %v4948_v57  ;;  %v4011_v25 = vpop.f32.mrb[13].mxu1  ;;  %v4115_v53 = vshrl.u32 %v4114_v9, 7  ;;  %v4621_v9 = vunpack.c.l.bf16 %v6724_v30 }
 0x2d4   : > { %v4089_v63 = vadd.f32 %v4088_v32, %v4074_v18  ;;  %v6657_v50 = vadd.f32 %v4011_v25, %v2181_v60  ;;  %v4052_v55 = vadd.f32 %v6640_v35, %v4051_v45  ;;  %v5109_v52 = vpop.f32.mrb[14].mxu1  ;;  %v6680_v18 = vld [vmem:[%s5480_s14] sm:$0xff]   ;;  %v6683_v32 = vld [vmem:[%s5480_s14 + $0x8] sm:$0xff]  }
 0x2d5   : > { %v6661_v15 = vadd.f32 %v5109_v52, %v6592_v14  ;;  %v4014_v49 = vpop.f32.mrb[15].mxu1  ;;  %v4078_v14 = vmul.f32 %v6653_v24, %v6653_v24  ;;  %v4116_v6 = vsub.s32 %v4113_v37, %v4115_v53  ;;  %v4132_v25 = vsub.s32 0, %v4115_v53 }
 0x2d6   : > { %v4053_v47 = vadd.f32 %v6657_v50, %v4052_v55  ;;  %v4076_v57 = vmul.f32 %v6657_v50, %v6657_v50  ;;  %v4090_v36 = vadd.f32 %v4089_v63, %v4075_v41  ;;  %v6667_v27 = vadd.f32 %v4014_v49, %v6594_v39  ;;  %v6686_v41 = vld [vmem:[%s5480_s14 + $0x10] sm:$0xff]   ;;  %v6689_v63 = vld [vmem:[%s5480_s14 + $0x18] sm:$0xff]   ;;  %v4108_v55 = vld [vmem:[%s5465_s28 + $0x2] sm:$0x3]  ;;  %s4284_s28 = sshll.u32 %s5408_s23, 4  ;;  %s6785_s28 = int_to_ptr.vmem [resolvable:$true] %s4284_s28 }
 0x2d7   : > { %v4079_v1 = vmul.f32 %v6661_v15, %v6661_v15  ;;  %v4593_v52 = vunpack.c.l.bf16 %v6680_v18  ;;  %v4594_v49 = vunpack.c.h.bf16 %v6680_v18  ;;  %s5368_s10 = scalar_lea.vmem %s6785_s28, 2048  ;;  %p5375_p9 = scmp.lt.s32.totalorder %s6785_s28, %s6785_s28 }
 0x2d8   : > { %v4091_v44 = vadd.f32 %v4090_v36, %v4076_v57  ;;  %v4054_v60 = vadd.f32 %v6667_v27, %v4053_v47  ;;  %v4077_v13 = vmul.f32 %v6667_v27, %v6667_v27  ;;  %v6695_v47 = vld [vmem:[%s5480_s14 + $0x20] sm:$0xff]   ;;  %p5369_p6 = scmp.ne.s32.totalorder %s6785_s28, %s5368_s10  ;;  %p5376_p10 = scmp.lt.s32.totalorder %s5368_s10, %s5368_s10 }
 0x2da   : > { %v4055_v7 = vadd.f32 %v6653_v24, %v4054_v60  ;;  %v4092_v29 = vadd.f32 %v4091_v44, %v4077_v13  ;;  %v4597_v44 = vunpack.c.l.bf16 %v6683_v32  ;;  %v4598_v60 = vunpack.c.h.bf16 %v6683_v32  ;;  %v6700_v13 = vld [vmem:[%s5480_s14 + $0x28] sm:$0xff]   ;;  %p5370_p7 = pnand %p5369_p6, %p5243_p5  ;;  %p5377_p11 = por %p5376_p10, %p5375_p9 }
 0x2dc   : > { %v4056_v40 = vadd.f32 %v6661_v15, %v4055_v7  ;;  %v4093_v10 = vadd.f32 %v4092_v29, %v4078_v14  ;;  %v6703_v14 = vld [vmem:[%s5480_s14 + $0x30] sm:$0xff]   ;;  %v4601_v7 = vunpack.c.l.bf16 %v6686_v41  ;;  %v4602_v29 = vunpack.c.h.bf16 %v6686_v41  ;;  %p5371_p8 = pneg %p5370_p7 }
 0x2de   : > { %v4057_v39 = vrot.slane %v4056_v40, 4  ;;  %v4094_v26 = vadd.f32 %v4093_v10, %v4079_v1  ;;  %v4605_v1 = vunpack.c.l.bf16 %v6689_v63  ;;  %p5378_p12 = pnand %p5377_p11, %p5371_p8 }
 0x2e0   : > { %v4058_v33 = vadd.f32 %v4057_v39, %v4056_v40  ;;  %v4095_v56 = vrot.slane %v4094_v26, 4  ;;  %v4606_v40 = vunpack.c.h.bf16 %v6689_v63 }
 0x2e2   : > { %v4059_v62 = vrot.slane %v4058_v33, 2  ;;  %v4096_v2 = vadd.f32 %v4095_v56, %v4094_v26  ;;  %v4610_v56 = vunpack.c.h.bf16 %v6695_v47 }
 0x2e4   : > { %v4060_v61 = vadd.f32 %v4059_v62, %v4058_v33  ;;  %v4097_v51 = vrot.slane %v4096_v2, 2  ;;  %v4609_v33 = vunpack.c.l.bf16 %v6695_v47  ;;  %v4613_v62 = vunpack.c.l.bf16 %v6700_v13 }
 0x2e6   : > { %v4061_v12 = vrot.slane %v4060_v61, 1  ;;  %v4098_v3 = vadd.f32 %v4097_v51, %v4096_v2  ;;  %v4614_v2 = vunpack.c.h.bf16 %v6700_v13 }
 0x2e8   : > { %v4062_v16 = vadd.f32 %v4061_v12, %v4060_v61  ;;  %v4099_v28 = vrot.slane %v4098_v3, 1  ;;  %v4617_v61 = vunpack.c.l.bf16 %v6703_v14 }
 0x2ea   : > { %v4063_v58 = vmul.f32 0.0078125, %v4062_v16  ;;  %v4100_v11 = vadd.f32 %v4099_v28, %v4098_v3 }
 0x2ec   : > { %v4101_v21 = vmul.f32 0.0078125, %v4100_v11  ;;  %v4102_v0 = vmul.f32 %v4063_v58, %v4063_v58 }
 0x2ee   : > { %v4103_v46 = vsub.f32 %v4101_v21, %v4102_v0 }
 0x2f0   : > { %v4104_v8 = vmax.f32 %v4103_v46, 0.0 }
 0x2f2   : > { %v4105_v5 = vadd.f32 1e-05, %v4104_v8 }
 0x2f4   : > { %5362 = vrsqrt.f32 %v4105_v5 }
 0x2fe   : > { %v5363_v45 = vpop.eup %5362 }
 0x2ff   : > { %v4109_v31 = vmul.f32 %v5363_v45, %v4107_v54 }
 0x301   : > { %v4117_v57 = vrot.slane %v4109_v31, %v4116_v6  ;;  %v4119_v36 = vmul.f32 %v4109_v31, %v4063_v58 }
 0x303   : > { %v4118_v10 = vcombine.high %v4117_v57, %v4117_v57  ;;  %v4120_v39 = vsub.f32 %v4108_v55, %v4119_v36  ;;  %v4133_v26 = vrot.slane %v4117_v57, %v4132_v25 }
 0x305   : > { %v4128_v51 = vrot.slane %v4120_v39, %v4116_v6  ;;  %v4137_v12 = vrot.slane %v4118_v10, %v4132_v25  ;;  %v4140_v3 = vmul.f32 %v6598_v43, %v4133_v26  ;;  %v4141_v16 = vmul.f32 %v6602_v48, %v4133_v26 }
 0x306   : > { %v4142_v28 = vmul.f32 %v6596_v19, %v4133_v26  ;;  %v4143_v58 = vmul.f32 %v6600_v34, %v4133_v26  ;;  %v4144_v11 = vmul.f32 %v6617_v20, %v4133_v26  ;;  %v4145_v21 = vmul.f32 %v6625_v22, %v4133_v26 }
 0x307   : > { %v4129_v0 = vcombine.high %v4128_v51, %v4128_v51  ;;  %v4146_v46 = vmul.f32 %v6613_v59, %v4133_v26  ;;  %v4147_v8 = vmul.f32 %v6620_v23, %v4133_v26  ;;  %v4148_v5 = vmul.f32 %v6637_v42, %v4137_v12 }
 0x308   : > { %v4149_v43 = vmul.f32 %v6645_v17, %v4137_v12  ;;  %v4150_v48 = vmul.f32 %v6633_v38, %v4137_v12  ;;  %v4151_v19 = vmul.f32 %v6640_v35, %v4137_v12  ;;  %v4152_v34 = vmul.f32 %v6657_v50, %v4137_v12 }
 0x309   : > { %v4153_v20 = vmul.f32 %v6667_v27, %v4137_v12  ;;  %v4154_v22 = vmul.f32 %v6653_v24, %v4137_v12  ;;  %v4155_v59 = vmul.f32 %v6661_v15, %v4137_v12  ;;  %v4159_v4 = vrot.slane %v4128_v51, %v4132_v25 }
 0x30a   : > { %v4163_v23 = vrot.slane %v4129_v0, %v4132_v25  ;;  %v4618_v42 = vunpack.c.h.bf16 %v6703_v14  ;;  %v4622_v17 = vunpack.c.h.bf16 %v6724_v30 }
 0x30b   : > { %v4166_v37 = vadd.f32 %v4159_v4, %v4140_v3  ;;  %v4167_v38 = vadd.f32 %v4159_v4, %v4141_v16  ;;  %v4168_v53 = vadd.f32 %v4159_v4, %v4142_v28  ;;  %v4169_v35 = vadd.f32 %v4159_v4, %v4143_v58 }
 0x30c   : > { %v4170_v54 = vadd.f32 %v4159_v4, %v4144_v11  ;;  %v4171_v50 = vadd.f32 %v4159_v4, %v4145_v21  ;;  %v4172_v6 = vadd.f32 %v4159_v4, %v4146_v46  ;;  %v4173_v27 = vadd.f32 %v4159_v4, %v4147_v8  ;;  %v7085_v4 = vld [vmem:[#allocation47_spill] sm:$0xff] }
 0x30d   : > { %v4174_v45 = vadd.f32 %v4163_v23, %v4148_v5  ;;  %v4175_v24 = vadd.f32 %v4163_v23, %v4149_v43  ;;  %v4176_v31 = vadd.f32 %v4163_v23, %v4150_v48  ;;  %v4177_v15 = vadd.f32 %v4163_v23, %v4151_v19  ;;  %v7082_v48 = vld [vmem:[#allocation44_spill] sm:$0xff] }
 0x30e   : > { %v4178_v55 = vadd.f32 %v4163_v23, %v4152_v34  ;;  %v4179_v25 = vadd.f32 %v4163_v23, %v4153_v20  ;;  %v4180_v57 = vadd.f32 %v4163_v23, %v4154_v22  ;;  %v4181_v36 = vadd.f32 %v4163_v23, %v4155_v59  ;;  %v7083_v34 = vld [vmem:[#allocation48_spill] sm:$0xff]  ;;  %v7084_v22 = vld [vmem:[#allocation43_spill] sm:$0xff] }
 0x30f   : > { %v4182_v10 = vmax.f32 %v4166_v37, 0.0  ;;  %v4183_v39 = vmax.f32 %v4167_v38, 0.0  ;;  %v4184_v26 = vmax.f32 %v4168_v53, 0.0  ;;  %v4185_v51 = vmax.f32 %v4169_v35, 0.0  ;;  %v7086_v37 = vld [vmem:[#allocation57_spill] sm:$0xff]  ;;  %v7087_v53 = vld [vmem:[#allocation63_spill] sm:$0xff] }
 0x310   : > { %v4186_v12 = vmax.f32 %v4170_v54, 0.0  ;;  %v4187_v3 = vmax.f32 %v4171_v50, 0.0  ;;  %v4188_v16 = vmax.f32 %v4172_v6, 0.0  ;;  %v4189_v28 = vmax.f32 %v4173_v27, 0.0  ;;  %v7088_v54 = vld [vmem:[#allocation56_spill] sm:$0xff]  ;;  %v7089_v6 = vld [vmem:[#allocation59_spill] sm:$0xff] }
 0x311   : > { %v4190_v58 = vmax.f32 %v4174_v45, 0.0  ;;  %v4191_v11 = vmax.f32 %v4175_v24, 0.0  ;;  %v4192_v21 = vmax.f32 %v4176_v31, 0.0  ;;  %v4193_v0 = vmax.f32 %v4177_v15, 0.0  ;;  %v7090_v45 = vld [vmem:[#allocation71_spill] sm:$0xff]  ;;  %v7091_v31 = vld [vmem:[#allocation73_spill] sm:$0xff] }
 0x312   : > { %v4194_v46 = vmax.f32 %v4178_v55, 0.0  ;;  %v4195_v8 = vmax.f32 %v4179_v25, 0.0  ;;  %v4196_v5 = vmax.f32 %v4180_v57, 0.0  ;;  %v4197_v43 = vmax.f32 %v4181_v36, 0.0  ;;  %v7092_v55 = vld [vmem:[#allocation70_spill] sm:$0xff]  ;;  %v7093_v57 = vld [vmem:[#allocation72_spill] sm:$0xff] }
 0x313   : > { %v4198_v19 = vadd.f32 %v4182_v10, %v7082_v48  ;;  %v4199_v20 = vadd.f32 %v4183_v39, %v7083_v34  ;;  %v4200_v59 = vadd.f32 %v4184_v26, %v7084_v22  ;;  %v4201_v23 = vadd.f32 %v4185_v51, %v7085_v4  ;;  %v7094_v10 = vld [vmem:[#allocation77_spill] sm:$0xff]  ;;  %v7096_v48 = vld [vmem:[#allocation76_spill] sm:$0xff]  ;;  %v7097_v34 = vld [vmem:[#allocation78_spill] sm:$0xff] }
 0x314   : > { %v4202_v38 = vadd.f32 %v4186_v12, %v7086_v37  ;;  %v4203_v35 = vadd.f32 %v4187_v3, %v7087_v53  ;;  %v4204_v50 = vadd.f32 %v4188_v16, %v7088_v54  ;;  %v4205_v27 = vadd.f32 %v4189_v28, %v7089_v6  ;;  %v7095_v26 = vld [vmem:[#allocation81_spill] sm:$0xff] }
 0x315   : > { %v4206_v24 = vadd.f32 %v4190_v58, %v7090_v45  ;;  %v4207_v15 = vadd.f32 %v4191_v11, %v7091_v31  ;;  %v4208_v25 = vadd.f32 %v4192_v21, %v7092_v55  ;;  %v4209_v36 = vadd.f32 %v4193_v0, %v7093_v57 }
 0x316   : > { %v4210_v39 = vadd.f32 %v4194_v46, %v7094_v10  ;;  %v4211_v51 = vadd.f32 %v4195_v8, %v7095_v26  ;;  %v4212_v12 = vadd.f32 %v4196_v5, %v7096_v48  ;;  %v4213_v3 = vadd.f32 %v4197_v43, %v7097_v34 }
 0x317   : > { %v4246_v16 = vadd.f32 %v4593_v52, %v4198_v19  ;;  %v4247_v28 = vadd.f32 %v4594_v49, %v4199_v20  ;;  %v4248_v58 = vadd.f32 %v4597_v44, %v4200_v59  ;;  %v4249_v11 = vadd.f32 %v4598_v60, %v4201_v23 }
 0x318   : > { %v4250_v21 = vadd.f32 %v4601_v7, %v4202_v38  ;;  %v4251_v0 = vadd.f32 %v4602_v29, %v4203_v35  ;;  %v4252_v52 = vadd.f32 %v4605_v1, %v4204_v50  ;;  %v4253_v18 = vadd.f32 %v4606_v40, %v4205_v27 }
 0x319   : > { %v4254_v49 = vadd.f32 %v4609_v33, %v4206_v24  ;;  %v4255_v32 = vadd.f32 %v4610_v56, %v4207_v15  ;;  %v4256_v44 = vadd.f32 %v4613_v62, %v4208_v25  ;;  %v4257_v60 = vadd.f32 %v4614_v2, %v4209_v36  ;;  %4262 = vst [vmem:[#allocation3] sm:$0xff] %v4246_v16 }
 0x31a   : > { %4263 = vst [vmem:[#allocation3 + $0x8] sm:$0xff] %v4247_v28  ;;  %4264 = vst [vmem:[#allocation3 + $0x10] sm:$0xff] %v4248_v58  ;;  %v4258_v41 = vadd.f32 %v4617_v61, %v4210_v39  ;;  %v4259_v63 = vadd.f32 %v4618_v42, %v4211_v51  ;;  %v4260_v47 = vadd.f32 %v4621_v9, %v4212_v12 }
 0x31b   : > { %4265 = vst [vmem:[#allocation3 + $0x18] sm:$0xff] %v4249_v11  ;;  %v4261_v7 = vadd.f32 %v4622_v17, %v4213_v3  ;;  %4266 = vst [vmem:[#allocation3 + $0x20] sm:$0xff] %v4250_v21 }
 0x31c   : > { %4267 = vst [vmem:[#allocation3 + $0x28] sm:$0xff] %v4251_v0  ;;  %4268 = vst [vmem:[#allocation3 + $0x30] sm:$0xff] %v4252_v52 }
 0x31d   : > { %4269 = vst [vmem:[#allocation3 + $0x38] sm:$0xff] %v4253_v18  ;;  %4270 = vst [vmem:[#allocation3 + $0x40] sm:$0xff] %v4254_v49 }
 0x31e   : > { %4271 = vst [vmem:[#allocation3 + $0x48] sm:$0xff] %v4255_v32  ;;  %4272 = vst [vmem:[#allocation3 + $0x50] sm:$0xff] %v4256_v44 }
 0x31f   : > { %4273 = vst [vmem:[#allocation3 + $0x58] sm:$0xff] %v4257_v60  ;;  %4274 = vst [vmem:[#allocation3 + $0x60] sm:$0xff] %v4258_v41 }
 0x320   : > { %4275 = vst [vmem:[#allocation3 + $0x68] sm:$0xff] %v4259_v63  ;;  %4276 = vst [vmem:[#allocation3 + $0x70] sm:$0xff] %v4260_v47 }
 0x321   : > { %4277 = vst [vmem:[#allocation3 + $0x78] sm:$0xff] %v4261_v7 }
 0x322   : > { %5381 = shalt.err (!%p5378_p12)
}
 0x323   : > { %s5382_s19 = scalar_lea.hbm %s6823_s6, 2048 }
 0x324   : > { %p5383_p13 = scmp.ne.s32.totalorder %s6823_s6, %s5382_s19  ;;  %p5388_p2 = scmp.lt.u32.totalorder %s5382_s19, %s6823_s6 }
 0x326   : > { %p5384_p0 = pnand %p5383_p13, %p5243_p5 }
 0x328   : > { %p5385_p1 = pneg %p5384_p0 }
 0x32a   : > { %p5390_p3 = pnand %p5388_p2, %p5385_p1 }
 0x32c   : > { %5393 = shalt.err (!%p5390_p3)
}
 0x32d   : > { %s5409_s25 = smov 128   ;;  %s5410_s29 = smov 8  }
 0x32e   : > { %5240 = dma.vmem_to_hbm [thread:$0]  (%p5243_p5), %s6785_s28, 2048, %s6823_s6, [#allocation4], %s5409_s25, %s5409_s25, %s5410_s29  }
 0x32f   : > { %5399 = dma.done.wait (%p5243_p5), [#allocation4], 2048  }
 0x330   : > { %5401 = vsyncadd (%p5243_p5), [#allocation4], 4294965248 }
 0x331 PF: > { %s17_s21 = sadd.s32 1, %s5404_s21  }
 0x332   : > { %p14_p4 = scmp.ge.s32.totalorder %s17_s21, 4  }
 0x334   :  { %16 = sbr.rel (!%p14_p4) target bundleno = 1 (0x1), region = 89 }
 0x33b   :  { %4300 = vsyncpa [#allocation4], 1 }
 0x33c   :  { %4302 = vsyncpa [#allocation4 + $0x1], 1 }

</bundles_post_ra>
